<compile_context>
chip_gen: v5e
topology: v5e:2x2
jax: 0.10.0
libtpu: 0.0.40
codegen_flags: <defaults>
</compile_context>

<pallas_src>
import functools

import jax
import jax.numpy as jnp
from jax.experimental import pallas as pl
from jax.experimental.pallas import tpu as pltpu


def _round_up(x, m):
    return (x + m - 1) // m * m


def _pair(v):
    return (v, v) if isinstance(v, int) else tuple(v)


def _vmem_budget_and_limit():
    """Per-chip tile budget + scoped-VMEM limit (v5e/v6e: 128 MiB, v7x: 64 MiB)."""
    try:
        cap = int(pltpu.get_tpu_info().vmem_capacity_bytes)
    except Exception:
        cap = 64 << 20                      # conservative default (v7x per-TC)
    budget = min(cap // 2, 24 << 20)        # what we let the tiles consume
    limit = max(min(cap * 3 // 4, 96 << 20), 32 << 20)
    return budget, limit


# ---------------------------------------------------------------------------
# Path A: stride-1 convs — in-kernel tap gather, no HBM patch matrix.
# ---------------------------------------------------------------------------
def _tap_gather_kernel(x_ref, w_ref, b_ref, o_ref, *, th, w_out, k_h, k_w,
                       d_h, d_w, c_in):
    """x:(1,Hp,Wp,C) bf16 image, w:(KH*KW,C,2*Cp) bf16, b:(1,2*Cp) f32.

    Gathers the KH*KW shifted windows for a tile of `th` output rows directly
    from the VMEM-resident padded image and accumulates the tap matmuls in f32.
    """
    r0 = pl.multiple_of(pl.program_id(1) * th, th)
    cp = o_ref.shape[-1]
    acc = jnp.zeros((th * w_out, 2 * cp), jnp.float32)
    for i in range(k_h):                       # static unroll over taps
        for j in range(k_w):
            patch = x_ref[0, pl.ds(r0 + i * d_h, th), pl.ds(j * d_w, w_out), :]
            patch = patch.reshape(th * w_out, c_in)
            acc = acc + jnp.dot(patch, w_ref[i * k_w + j],
                                preferred_element_type=jnp.float32)
    y = acc + b_ref[...]
    a, g = y[:, :cp], y[:, cp:]
    gate = 0.5 + 0.5 * jnp.tanh(0.5 * g)       # sigmoid via a single EUP op
    o_ref[...] = (a * gate).astype(o_ref.dtype)


def _pick_th(batch, h_out, w_out, hp, wp, c_in, k_h, k_w, cp, budget):
    """Largest output-row tile (divisor of h_out) that fits the VMEM budget."""
    c_lane = _round_up(c_in, 128)
    fixed = (2 * hp * _round_up(wp, 8) * c_lane * 2          # x block (db, bf16)
             + 2 * k_h * k_w * _round_up(c_in, 8) * 2 * cp * 2  # weight block
             + 2 * 8 * 2 * cp * 4)                           # bias block
    if fixed > budget:
        return None

    def fits(th):
        dyn = (2 * th * w_out * cp * 2          # bf16 output block (db)
               + th * w_out * 2 * cp * 4        # f32 accumulator
               + 2 * th * w_out * c_lane * 2)   # patch temporaries (rough)
        return fixed + dyn <= budget

    cands = [t for t in range(h_out, 0, -1)
             if h_out % t == 0 and (t * w_out) % 8 == 0 and fits(t)]
    if not cands:
        return None
    # Prefer >=2 total grid steps so a megacore part (v7x) can split the work.
    for th in cands:
        if batch * (h_out // th) >= 2:
            return th
    return cands[0]


def _run_tap_gather(x_pad, w_full, b_full, *, h_out, w_out, k_h, k_w,
                    d_h, d_w, c_in, cp, budget, vmem_limit):
    batch, hp, wp, _ = x_pad.shape
    th = _pick_th(batch, h_out, w_out, hp, wp, c_in, k_h, k_w, cp, budget)
    if th is None:
        return None                      # image/weight too big -> im2col path
    n_h_tiles = h_out // th
    n_rows = batch * h_out * w_out
    k_dim = k_h * k_w * c_in
    w3 = w_full.reshape(k_h * k_w, c_in, 2 * cp)

    kernel = functools.partial(_tap_gather_kernel, th=th, w_out=w_out,
                               k_h=k_h, k_w=k_w, d_h=d_h, d_w=d_w, c_in=c_in)
    flops = 2 * n_rows * k_dim * 2 * cp
    bytes_accessed = (x_pad.size * 2 + w3.size * 2 + b_full.size * 4
                      + n_rows * cp * 2)

    return pl.pallas_call(
        kernel,
        out_shape=jax.ShapeDtypeStruct((n_rows, cp), jnp.bfloat16),
        grid=(batch, n_h_tiles),
        in_specs=[
            # Whole padded image per batch; block index only changes with b,
            # so the DMA is amortized over all row tiles of that batch.
            pl.BlockSpec((1, hp, wp, c_in), lambda b, r: (b, 0, 0, 0)),
            pl.BlockSpec((k_h * k_w, c_in, 2 * cp), lambda b, r: (0, 0, 0)),
            pl.BlockSpec((1, 2 * cp), lambda b, r: (0, 0)),
        ],
        out_specs=pl.BlockSpec((th * w_out, cp),
                               lambda b, r: (b * n_h_tiles + r, 0)),
        compiler_params=pltpu.CompilerParams(
            dimension_semantics=("parallel", "parallel"),
            vmem_limit_bytes=vmem_limit),
        cost_estimate=pl.CostEstimate(flops=int(flops),
                                      transcendentals=int(n_rows * cp),
                                      bytes_accessed=int(bytes_accessed)),
    )(x_pad, w3, b_full)


# ---------------------------------------------------------------------------
# Path B: general (strided / dilated / oversized) convs — bf16 im2col in the
# wrapper, K-tiled matmul with an f32 VMEM accumulator in the kernel.
# ---------------------------------------------------------------------------
def _im2col_kernel(x_ref, w_ref, b_ref, o_ref, acc_ref):
    """x:(tn,tk) bf16, w:(tk,2*Cp) bf16, b:(1,2*Cp) f32, acc:(tn,2*Cp) f32."""
    k = pl.program_id(1)

    @pl.when(k == 0)
    def _init():
        acc_ref[...] = jnp.zeros_like(acc_ref)

    acc_ref[...] += jnp.dot(x_ref[...], w_ref[...],
                            preferred_element_type=jnp.float32)

    @pl.when(k == pl.num_programs(1) - 1)
    def _finalize():
        cp = o_ref.shape[-1]
        y = acc_ref[...] + b_ref[...]
        a, g = y[:, :cp], y[:, cp:]
        gate = 0.5 + 0.5 * jnp.tanh(0.5 * g)
        o_ref[...] = (a * gate).astype(o_ref.dtype)


def _pick_tiles_im2col(n_rows, k_dim, cp, budget):
    tile_k = k_dim if k_dim <= 1024 else 512
    tile_n = 8
    for cand in (1024, 512, 256, 128, 64, 32, 16, 8):
        use = (2 * cand * _round_up(tile_k, 128) * 2        # cols block (db)
               + 2 * _round_up(tile_k, 8) * 2 * cp * 2      # weight block (db)
               + 2 * 8 * 2 * cp * 4                         # bias block
               + 2 * cand * cp * 2                          # bf16 output (db)
               + cand * 2 * cp * 4)                         # f32 accumulator
        if use <= budget:
            tile_n = cand
            break
    if n_rows >= 1024:
        # keep >=4 roughly balanced row tiles so v7x megacore can split them;
        # single-TC chips only pay ~0.35us/step extra for this.
        tile_n = min(tile_n, _round_up(pl.cdiv(n_rows, 4), 128))
    if n_rows >= 8:
        tile_n = min(tile_n, max(8, (n_rows // 8) * 8))
    else:
        tile_n = n_rows
    return tile_n, tile_k


def _run_im2col(x_pad, w_full, b_full, *, batch, h_out, w_out, k_h, k_w,
                s_h, s_w, d_h, d_w, c_in, cp, budget, vmem_limit):
    k_dim = k_h * k_w * c_in
    n_rows = batch * h_out * w_out

    # im2col stays in the wrapper for the strided path, but is bf16 end-to-end
    # so the patch matrix costs half the HBM bytes it used to.
    # TODO(synk): in-kernel DMA gather (pl.ANY + make_async_copy) to also kill
    # the KH*KW read amplification here.
    taps = [
        x_pad[:, i * d_h:i * d_h + (h_out - 1) * s_h + 1:s_h,
              j * d_w:j * d_w + (w_out - 1) * s_w + 1:s_w, :]
        for i in range(k_h) for j in range(k_w)
    ]
    cols = jnp.concatenate(taps, axis=-1).reshape(n_rows, k_dim)

    tile_n, tile_k = _pick_tiles_im2col(n_rows, k_dim, cp, budget)
    k_pad = _round_up(k_dim, tile_k)
    if k_pad != k_dim:
        cols = jnp.pad(cols, ((0, 0), (0, k_pad - k_dim)))
        w_full = jnp.pad(w_full, ((0, k_pad - k_dim), (0, 0)))
    n_k = k_pad // tile_k

    flops = 2 * n_rows * k_pad * 2 * cp
    bytes_accessed = (n_rows * k_pad * 2 + k_pad * 2 * cp * 2 + 2 * cp * 4
                      + n_rows * cp * 2)

    return pl.pallas_call(
        _im2col_kernel,
        out_shape=jax.ShapeDtypeStruct((n_rows, cp), jnp.bfloat16),
        grid=(pl.cdiv(n_rows, tile_n), n_k),
        in_specs=[
            pl.BlockSpec((tile_n, tile_k), lambda i, k: (i, k)),
            pl.BlockSpec((tile_k, 2 * cp), lambda i, k: (k, 0)),
            pl.BlockSpec((1, 2 * cp), lambda i, k: (0, 0)),
        ],
        out_specs=pl.BlockSpec((tile_n, cp), lambda i, k: (i, 0)),
        scratch_shapes=[pltpu.VMEM((tile_n, 2 * cp), jnp.float32)],
        compiler_params=pltpu.CompilerParams(
            dimension_semantics=("parallel", "arbitrary"),
            vmem_limit_bytes=vmem_limit),
        cost_estimate=pl.CostEstimate(flops=int(flops),
                                      transcendentals=int(n_rows * cp),
                                      bytes_accessed=int(bytes_accessed)),
    )(cols, w_full, b_full)


# ---------------------------------------------------------------------------
# Wrapper
# ---------------------------------------------------------------------------
def _prepare_weight_bias(weight, bias, c_out, cp):
    """(2C,Cin,KH,KW) -> (K, 2*Cp) bf16 with lane-padded [a | gate] halves."""
    _, c_in, k_h, k_w = weight.shape
    k_dim = k_h * k_w * c_in
    w_mat = jnp.transpose(weight, (2, 3, 1, 0)).reshape(k_dim, 2 * c_out)
    w_a = jnp.pad(w_mat[:, :c_out], ((0, 0), (0, cp - c_out)))
    w_g = jnp.pad(w_mat[:, c_out:], ((0, 0), (0, cp - c_out)))
    w_full = jnp.concatenate([w_a, w_g], axis=1).astype(jnp.bfloat16)
    b_a = jnp.pad(bias[:c_out].astype(jnp.float32), (0, cp - c_out))
    b_g = jnp.pad(bias[c_out:].astype(jnp.float32), (0, cp - c_out))
    b_full = jnp.concatenate([b_a, b_g]).reshape(1, 2 * cp)
    return w_full, b_full


def gated_conv2d(x_nchw, weight, bias, stride=1, padding=0, dilation=1):
    """Forward of GatedConv2d: y = Conv2d(x) with 2*C_out channels, GLU(y, 1)."""
    s_h, s_w = _pair(stride)
    p_h, p_w = _pair(padding)
    d_h, d_w = _pair(dilation)

    c2, c_in, k_h, k_w = weight.shape
    assert c2 % 2 == 0
    c_out = c2 // 2
    cp = _round_up(c_out, 128)          # lane-dense output columns

    # NHWC + bf16 from the start (matmul operands never round-trip HBM in f32).
    # TODO(synk): take/return NHWC at the API boundary to drop both transposes.
    x = jnp.transpose(x_nchw, (0, 2, 3, 1)).astype(jnp.bfloat16)
    batch, h, w, _ = x.shape
    h_out = (h + 2 * p_h - d_h * (k_h - 1) - 1) // s_h + 1
    w_out = (w + 2 * p_w - d_w * (k_w - 1) - 1) // s_w + 1
    x_pad = jnp.pad(x, ((0, 0), (p_h, p_h), (p_w, p_w), (0, 0)))

    w_full, b_full = _prepare_weight_bias(weight, bias, c_out, cp)
    budget, vmem_limit = _vmem_budget_and_limit()

    out = None
    if s_h == 1 and s_w == 1 and w_out % 8 == 0:
        # TODO(synk): lift the w_out % 8 restriction (keeps the in-kernel
        # (th, w_out, C) -> (th*w_out, C) reshape tile-aligned).
        out = _run_tap_gather(x_pad, w_full, b_full,
                              h_out=h_out, w_out=w_out, k_h=k_h, k_w=k_w,
                              d_h=d_h, d_w=d_w, c_in=c_in, cp=cp,
                              budget=budget, vmem_limit=vmem_limit)
    if out is None:
        out = _run_im2col(x_pad, w_full, b_full,
                          batch=batch, h_out=h_out, w_out=w_out, k_h=k_h,
                          k_w=k_w, s_h=s_h, s_w=s_w, d_h=d_h, d_w=d_w,
                          c_in=c_in, cp=cp, budget=budget,
                          vmem_limit=vmem_limit)

    out = out[:, :c_out].astype(jnp.float32)          # bf16 store -> f32 API
    out = out.reshape(batch, h_out, w_out, c_out)
    return jnp.transpose(out, (0, 3, 1, 2))           # back to NCHW


def _reference(x_nchw, weight, bias, stride, padding, dilation):
    """Pure-JAX f32 reference (lax conv + GLU), matches the PyTorch module."""
    s_h, s_w = _pair(stride)
    p_h, p_w = _pair(padding)
    d_h, d_w = _pair(dilation)
    y = jax.lax.conv_general_dilated(
        x_nchw.astype(jnp.float32), weight.astype(jnp.float32),
        window_strides=(s_h, s_w), padding=[(p_h, p_h), (p_w, p_w)],
        rhs_dilation=(d_h, d_w),
        dimension_numbers=("NCHW", "OIHW", "NCHW"))
    y = y + bias[None, :, None, None]
    c = y.shape[1] // 2
    return y[:, :c] * jax.nn.sigmoid(y[:, c:])


if __name__ == "__main__":
    key = jax.random.PRNGKey(0)
    batch = 2
    # (c_in, c_out, kernel, stride, padding, dilation, spatial)
    configs = [
        (4, 8, 3, 1, 1, 1, 16),   # stride-1 -> in-kernel tap-gather path
        (4, 8, 5, 2, 2, 1, 16),   # strided  -> K-tiled im2col path
    ]

    fwd = jax.jit(gated_conv2d,
                  static_argnames=("stride", "padding", "dilation"))

    for (c_in, c_out, k, s, p, d, hw) in configs:
        key, kx, kw_, kb_ = jax.random.split(key, 4)
        x = jax.random.normal(kx, (batch, c_in, hw, hw), jnp.float32)
        wgt = jax.random.normal(kw_, (2 * c_out, c_in, k, k), jnp.float32) * 0.05
        bia = jax.random.normal(kb_, (2 * c_out,), jnp.float32) * 0.05

        out = jax.block_until_ready(fwd(x, wgt, bia, stride=s, padding=p,
                                        dilation=d))
        ref = _reference(x, wgt, bia, s, p, d)
        assert out.shape == ref.shape, (out.shape, ref.shape)
        max_err = float(jnp.max(jnp.abs(out - ref)))
        # bf16 matmul inputs + bf16 output store -> bf16-level tolerance.
        assert max_err < 2e-2, max_err

    print("KERNEL_OK")
</pallas_src>

<mosaic_0001>
module attributes {stable_mosaic.version = 11 : i64} {
  func.func @_tap_gather_kernel(%arg0: i32, %arg1: i32, %arg2: memref<1x18x18x4xbf16, #tpu.memory_space<vmem>>, %arg3: memref<9x4x256xbf16, #tpu.memory_space<vmem>>, %arg4: memref<1x256xf32, #tpu.memory_space<vmem>>, %arg5: memref<256x128xbf16, #tpu.memory_space<vmem>>) attributes {dimension_semantics = [#tpu.dimension_semantics<parallel>, #tpu.dimension_semantics<parallel>], iteration_bounds = array<i64: 2, 1>, scalar_prefetch = 0 : i64, scratch_operands = 0 : i64, tpu.core_type = #tpu.core_type<tc>, window_params = [{transform_indices = @transform_0, window_bounds = array<i64: 1, 18, 18, 4>}, {pipeline_mode = #tpu.pipeline_mode<synchronous>, transform_indices = @transform_1, window_bounds = array<i64: 9, 4, 256>}, {pipeline_mode = #tpu.pipeline_mode<synchronous>, transform_indices = @transform_2, window_bounds = array<i64: 1, 256>}, {transform_indices = @transform_3, window_bounds = array<i64: 256, 128>}]} {
    %c16_i32 = arith.constant 16 : i32
    %0 = arith.muli %arg1, %c16_i32 : i32
    %1 = tpu.assume_multiple %0, 16 : i32
    %cst = arith.constant 0.000000e+00 : f32
    %2 = vector.broadcast %cst : f32 to vector<256x256xf32>
    %c0_i32 = arith.constant 0 : i32
    %3 = arith.addi %1, %c0_i32 : i32
    %c0 = arith.constant 0 : index
    %4 = arith.index_cast %3 : i32 to index
    %c0_0 = arith.constant 0 : index
    %c0_1 = arith.constant 0 : index
    %5 = vector.load %arg2[%c0, %4, %c0_0, %c0_1] : memref<1x18x18x4xbf16, #tpu.memory_space<vmem>>, vector<1x16x16x4xbf16>
    %6 = vector.shape_cast %5 : vector<1x16x16x4xbf16> to vector<16x16x4xbf16>
    %7 = vector.shape_cast %6 : vector<16x16x4xbf16> to vector<256x4xbf16>
    %c0_2 = arith.constant 0 : index
    %c0_3 = arith.constant 0 : index
    %c0_4 = arith.constant 0 : index
    %8 = vector.load %arg3[%c0_2, %c0_3, %c0_4] : memref<9x4x256xbf16, #tpu.memory_space<vmem>>, vector<1x4x256xbf16>
    %9 = vector.shape_cast %8 : vector<1x4x256xbf16> to vector<4x256xbf16>
    %cst_5 = arith.constant dense<0.000000e+00> : vector<256x256xf32>
    %10 = tpu.matmul %7, %9, %cst_5 {dimension_numbers = #tpu.dot_dimension_numbers<[1], [0], [0], [1], [0, 0, 1, 1], [], []>} : vector<256x4xbf16>, vector<4x256xbf16>, vector<256x256xf32> -> vector<256x256xf32>
    %11 = arith.addf %2, %10 : vector<256x256xf32>
    %c0_i32_6 = arith.constant 0 : i32
    %12 = arith.addi %1, %c0_i32_6 : i32
    %c0_7 = arith.constant 0 : index
    %13 = arith.index_cast %12 : i32 to index
    %c1 = arith.constant 1 : index
    %c0_8 = arith.constant 0 : index
    %14 = vector.load %arg2[%c0_7, %13, %c1, %c0_8] : memref<1x18x18x4xbf16, #tpu.memory_space<vmem>>, vector<1x16x16x4xbf16>
    %15 = vector.shape_cast %14 : vector<1x16x16x4xbf16> to vector<16x16x4xbf16>
    %16 = vector.shape_cast %15 : vector<16x16x4xbf16> to vector<256x4xbf16>
    %c1_9 = arith.constant 1 : index
    %c0_10 = arith.constant 0 : index
    %c0_11 = arith.constant 0 : index
    %17 = vector.load %arg3[%c1_9, %c0_10, %c0_11] : memref<9x4x256xbf16, #tpu.memory_space<vmem>>, vector<1x4x256xbf16>
    %18 = vector.shape_cast %17 : vector<1x4x256xbf16> to vector<4x256xbf16>
    %cst_12 = arith.constant dense<0.000000e+00> : vector<256x256xf32>
    %19 = tpu.matmul %16, %18, %cst_12 {dimension_numbers = #tpu.dot_dimension_numbers<[1], [0], [0], [1], [0, 0, 1, 1], [], []>} : vector<256x4xbf16>, vector<4x256xbf16>, vector<256x256xf32> -> vector<256x256xf32>
    %20 = arith.addf %11, %19 : vector<256x256xf32>
    %c0_i32_13 = arith.constant 0 : i32
    %21 = arith.addi %1, %c0_i32_13 : i32
    %c0_14 = arith.constant 0 : index
    %22 = arith.index_cast %21 : i32 to index
    %c2 = arith.constant 2 : index
    %c0_15 = arith.constant 0 : index
    %23 = vector.load %arg2[%c0_14, %22, %c2, %c0_15] : memref<1x18x18x4xbf16, #tpu.memory_space<vmem>>, vector<1x16x16x4xbf16>
    %24 = vector.shape_cast %23 : vector<1x16x16x4xbf16> to vector<16x16x4xbf16>
    %25 = vector.shape_cast %24 : vector<16x16x4xbf16> to vector<256x4xbf16>
    %c2_16 = arith.constant 2 : index
    %c0_17 = arith.constant 0 : index
    %c0_18 = arith.constant 0 : index
    %26 = vector.load %arg3[%c2_16, %c0_17, %c0_18] : memref<9x4x256xbf16, #tpu.memory_space<vmem>>, vector<1x4x256xbf16>
    %27 = vector.shape_cast %26 : vector<1x4x256xbf16> to vector<4x256xbf16>
    %cst_19 = arith.constant dense<0.000000e+00> : vector<256x256xf32>
    %28 = tpu.matmul %25, %27, %cst_19 {dimension_numbers = #tpu.dot_dimension_numbers<[1], [0], [0], [1], [0, 0, 1, 1], [], []>} : vector<256x4xbf16>, vector<4x256xbf16>, vector<256x256xf32> -> vector<256x256xf32>
    %29 = arith.addf %20, %28 : vector<256x256xf32>
    %c1_i32 = arith.constant 1 : i32
    %30 = arith.addi %1, %c1_i32 : i32
    %c0_20 = arith.constant 0 : index
    %31 = arith.index_cast %30 : i32 to index
    %c0_21 = arith.constant 0 : index
    %c0_22 = arith.constant 0 : index
    %32 = vector.load %arg2[%c0_20, %31, %c0_21, %c0_22] : memref<1x18x18x4xbf16, #tpu.memory_space<vmem>>, vector<1x16x16x4xbf16>
    %33 = vector.shape_cast %32 : vector<1x16x16x4xbf16> to vector<16x16x4xbf16>
    %34 = vector.shape_cast %33 : vector<16x16x4xbf16> to vector<256x4xbf16>
    %c3 = arith.constant 3 : index
    %c0_23 = arith.constant 0 : index
    %c0_24 = arith.constant 0 : index
    %35 = vector.load %arg3[%c3, %c0_23, %c0_24] : memref<9x4x256xbf16, #tpu.memory_space<vmem>>, vector<1x4x256xbf16>
    %36 = vector.shape_cast %35 : vector<1x4x256xbf16> to vector<4x256xbf16>
    %cst_25 = arith.constant dense<0.000000e+00> : vector<256x256xf32>
    %37 = tpu.matmul %34, %36, %cst_25 {dimension_numbers = #tpu.dot_dimension_numbers<[1], [0], [0], [1], [0, 0, 1, 1], [], []>} : vector<256x4xbf16>, vector<4x256xbf16>, vector<256x256xf32> -> vector<256x256xf32>
    %38 = arith.addf %29, %37 : vector<256x256xf32>
    %c1_i32_26 = arith.constant 1 : i32
    %39 = arith.addi %1, %c1_i32_26 : i32
    %c0_27 = arith.constant 0 : index
    %40 = arith.index_cast %39 : i32 to index
    %c1_28 = arith.constant 1 : index
    %c0_29 = arith.constant 0 : index
    %41 = vector.load %arg2[%c0_27, %40, %c1_28, %c0_29] : memref<1x18x18x4xbf16, #tpu.memory_space<vmem>>, vector<1x16x16x4xbf16>
    %42 = vector.shape_cast %41 : vector<1x16x16x4xbf16> to vector<16x16x4xbf16>
    %43 = vector.shape_cast %42 : vector<16x16x4xbf16> to vector<256x4xbf16>
    %c4 = arith.constant 4 : index
    %c0_30 = arith.constant 0 : index
    %c0_31 = arith.constant 0 : index
    %44 = vector.load %arg3[%c4, %c0_30, %c0_31] : memref<9x4x256xbf16, #tpu.memory_space<vmem>>, vector<1x4x256xbf16>
    %45 = vector.shape_cast %44 : vector<1x4x256xbf16> to vector<4x256xbf16>
    %cst_32 = arith.constant dense<0.000000e+00> : vector<256x256xf32>
    %46 = tpu.matmul %43, %45, %cst_32 {dimension_numbers = #tpu.dot_dimension_numbers<[1], [0], [0], [1], [0, 0, 1, 1], [], []>} : vector<256x4xbf16>, vector<4x256xbf16>, vector<256x256xf32> -> vector<256x256xf32>
    %47 = arith.addf %38, %46 : vector<256x256xf32>
    %c1_i32_33 = arith.constant 1 : i32
    %48 = arith.addi %1, %c1_i32_33 : i32
    %c0_34 = arith.constant 0 : index
    %49 = arith.index_cast %48 : i32 to index
    %c2_35 = arith.constant 2 : index
    %c0_36 = arith.constant 0 : index
    %50 = vector.load %arg2[%c0_34, %49, %c2_35, %c0_36] : memref<1x18x18x4xbf16, #tpu.memory_space<vmem>>, vector<1x16x16x4xbf16>
    %51 = vector.shape_cast %50 : vector<1x16x16x4xbf16> to vector<16x16x4xbf16>
    %52 = vector.shape_cast %51 : vector<16x16x4xbf16> to vector<256x4xbf16>
    %c5 = arith.constant 5 : index
    %c0_37 = arith.constant 0 : index
    %c0_38 = arith.constant 0 : index
    %53 = vector.load %arg3[%c5, %c0_37, %c0_38] : memref<9x4x256xbf16, #tpu.memory_space<vmem>>, vector<1x4x256xbf16>
    %54 = vector.shape_cast %53 : vector<1x4x256xbf16> to vector<4x256xbf16>
    %cst_39 = arith.constant dense<0.000000e+00> : vector<256x256xf32>
    %55 = tpu.matmul %52, %54, %cst_39 {dimension_numbers = #tpu.dot_dimension_numbers<[1], [0], [0], [1], [0, 0, 1, 1], [], []>} : vector<256x4xbf16>, vector<4x256xbf16>, vector<256x256xf32> -> vector<256x256xf32>
    %56 = arith.addf %47, %55 : vector<256x256xf32>
    %c2_i32 = arith.constant 2 : i32
    %57 = arith.addi %1, %c2_i32 : i32
    %c0_40 = arith.constant 0 : index
    %58 = arith.index_cast %57 : i32 to index
    %c0_41 = arith.constant 0 : index
    %c0_42 = arith.constant 0 : index
    %59 = vector.load %arg2[%c0_40, %58, %c0_41, %c0_42] : memref<1x18x18x4xbf16, #tpu.memory_space<vmem>>, vector<1x16x16x4xbf16>
    %60 = vector.shape_cast %59 : vector<1x16x16x4xbf16> to vector<16x16x4xbf16>
    %61 = vector.shape_cast %60 : vector<16x16x4xbf16> to vector<256x4xbf16>
    %c6 = arith.constant 6 : index
    %c0_43 = arith.constant 0 : index
    %c0_44 = arith.constant 0 : index
    %62 = vector.load %arg3[%c6, %c0_43, %c0_44] : memref<9x4x256xbf16, #tpu.memory_space<vmem>>, vector<1x4x256xbf16>
    %63 = vector.shape_cast %62 : vector<1x4x256xbf16> to vector<4x256xbf16>
    %cst_45 = arith.constant dense<0.000000e+00> : vector<256x256xf32>
    %64 = tpu.matmul %61, %63, %cst_45 {dimension_numbers = #tpu.dot_dimension_numbers<[1], [0], [0], [1], [0, 0, 1, 1], [], []>} : vector<256x4xbf16>, vector<4x256xbf16>, vector<256x256xf32> -> vector<256x256xf32>
    %65 = arith.addf %56, %64 : vector<256x256xf32>
    %c2_i32_46 = arith.constant 2 : i32
    %66 = arith.addi %1, %c2_i32_46 : i32
    %c0_47 = arith.constant 0 : index
    %67 = arith.index_cast %66 : i32 to index
    %c1_48 = arith.constant 1 : index
    %c0_49 = arith.constant 0 : index
    %68 = vector.load %arg2[%c0_47, %67, %c1_48, %c0_49] : memref<1x18x18x4xbf16, #tpu.memory_space<vmem>>, vector<1x16x16x4xbf16>
    %69 = vector.shape_cast %68 : vector<1x16x16x4xbf16> to vector<16x16x4xbf16>
    %70 = vector.shape_cast %69 : vector<16x16x4xbf16> to vector<256x4xbf16>
    %c7 = arith.constant 7 : index
    %c0_50 = arith.constant 0 : index
    %c0_51 = arith.constant 0 : index
    %71 = vector.load %arg3[%c7, %c0_50, %c0_51] : memref<9x4x256xbf16, #tpu.memory_space<vmem>>, vector<1x4x256xbf16>
    %72 = vector.shape_cast %71 : vector<1x4x256xbf16> to vector<4x256xbf16>
    %cst_52 = arith.constant dense<0.000000e+00> : vector<256x256xf32>
    %73 = tpu.matmul %70, %72, %cst_52 {dimension_numbers = #tpu.dot_dimension_numbers<[1], [0], [0], [1], [0, 0, 1, 1], [], []>} : vector<256x4xbf16>, vector<4x256xbf16>, vector<256x256xf32> -> vector<256x256xf32>
    %74 = arith.addf %65, %73 : vector<256x256xf32>
    %c2_i32_53 = arith.constant 2 : i32
    %75 = arith.addi %1, %c2_i32_53 : i32
    %c0_54 = arith.constant 0 : index
    %76 = arith.index_cast %75 : i32 to index
    %c2_55 = arith.constant 2 : index
    %c0_56 = arith.constant 0 : index
    %77 = vector.load %arg2[%c0_54, %76, %c2_55, %c0_56] : memref<1x18x18x4xbf16, #tpu.memory_space<vmem>>, vector<1x16x16x4xbf16>
    %78 = vector.shape_cast %77 : vector<1x16x16x4xbf16> to vector<16x16x4xbf16>
    %79 = vector.shape_cast %78 : vector<16x16x4xbf16> to vector<256x4xbf16>
    %c8 = arith.constant 8 : index
    %c0_57 = arith.constant 0 : index
    %c0_58 = arith.constant 0 : index
    %80 = vector.load %arg3[%c8, %c0_57, %c0_58] : memref<9x4x256xbf16, #tpu.memory_space<vmem>>, vector<1x4x256xbf16>
    %81 = vector.shape_cast %80 : vector<1x4x256xbf16> to vector<4x256xbf16>
    %cst_59 = arith.constant dense<0.000000e+00> : vector<256x256xf32>
    %82 = tpu.matmul %79, %81, %cst_59 {dimension_numbers = #tpu.dot_dimension_numbers<[1], [0], [0], [1], [0, 0, 1, 1], [], []>} : vector<256x4xbf16>, vector<4x256xbf16>, vector<256x256xf32> -> vector<256x256xf32>
    %83 = arith.addf %74, %82 : vector<256x256xf32>
    %c0_60 = arith.constant 0 : index
    %c0_61 = arith.constant 0 : index
    %84 = vector.load %arg4[%c0_60, %c0_61] : memref<1x256xf32, #tpu.memory_space<vmem>>, vector<1x256xf32>
    %85 = vector.broadcast %84 : vector<1x256xf32> to vector<256x256xf32>
    %86 = arith.addf %83, %85 : vector<256x256xf32>
    %87 = vector.extract_strided_slice %86 {offsets = [0, 0], sizes = [256, 128], strides = [1, 1]} : vector<256x256xf32> to vector<256x128xf32>
    %88 = vector.extract_strided_slice %86 {offsets = [0, 128], sizes = [256, 128], strides = [1, 1]} : vector<256x256xf32> to vector<256x128xf32>
    %cst_62 = arith.constant 5.000000e-01 : f32
    %89 = vector.broadcast %cst_62 : f32 to vector<256x128xf32>
    %90 = arith.mulf %89, %88 : vector<256x128xf32>
    %91 = math.tanh %90 : vector<256x128xf32>
    %cst_63 = arith.constant 5.000000e-01 : f32
    %92 = vector.broadcast %cst_63 : f32 to vector<256x128xf32>
    %93 = arith.mulf %92, %91 : vector<256x128xf32>
    %cst_64 = arith.constant 5.000000e-01 : f32
    %94 = vector.broadcast %cst_64 : f32 to vector<256x128xf32>
    %95 = arith.addf %94, %93 : vector<256x128xf32>
    %96 = arith.mulf %87, %95 : vector<256x128xf32>
    %97 = arith.truncf %96 : vector<256x128xf32> to vector<256x128xbf16>
    %c0_65 = arith.constant 0 : index
    %c0_66 = arith.constant 0 : index
    %98 = vector.load %arg5[%c0_65, %c0_66] : memref<256x128xbf16, #tpu.memory_space<vmem>>, vector<256x128xbf16>
    tpu.vector_store %arg5[%c0_65, %c0_66], %97 {strides = array<i32>} : memref<256x128xbf16, #tpu.memory_space<vmem>>, vector<256x128xbf16>,
    return
  }
  func.func @transform_0(%arg0: i32, %arg1: i32) -> (i32, i32, i32, i32) {
    %c0_i32 = arith.constant 0 : i32
    %c0_i32_0 = arith.constant 0 : i32
    %c0_i32_1 = arith.constant 0 : i32
    %c0_i32_2 = arith.constant 0 : i32
    return %arg0, %c0_i32, %c0_i32_0, %c0_i32_1 : i32, i32, i32, i32
  }
  func.func @transform_1(%arg0: i32, %arg1: i32) -> (i32, i32, i32) {
    %c0_i32 = arith.constant 0 : i32
    %c0_i32_0 = arith.constant 0 : i32
    %c0_i32_1 = arith.constant 0 : i32
    %c0_i32_2 = arith.constant 0 : i32
    return %c0_i32, %c0_i32_0, %c0_i32_1 : i32, i32, i32
  }
  func.func @transform_2(%arg0: i32, %arg1: i32) -> (i32, i32) {
    %c0_i32 = arith.constant 0 : i32
    %c0_i32_0 = arith.constant 0 : i32
    %c0_i32_1 = arith.constant 0 : i32
    return %c0_i32, %c0_i32_0 : i32, i32
  }
  func.func @transform_3(%arg0: i32, %arg1: i32) -> (i32, i32) {
    %c1_i32 = arith.constant 1 : i32
    %0 = arith.muli %arg0, %c1_i32 : i32
    %1 = arith.addi %0, %arg1 : i32
    %c0_i32 = arith.constant 0 : i32
    %c0_i32_0 = arith.constant 0 : i32
    return %1, %c0_i32 : i32, i32
  }
}

</mosaic_0001>

<bundles_post_ra>
// kernel: gated_conv2d.1
= control target key start
LH: loop header
LB: loop body
LE: loop exit
PB: predicated region body
PF: predicated region fallthrough
CT: control target
= control target key end

     0   :  { %s6745_s12 = smov 0   ;;  %s6747_s13 = smov 0   ;;  %s8772_s0 = inlined_call_operand.vmem [shape: bf16[2,18,18,4], index: 0, kind: input, shape index: {}]   ;;  %s8773_s1 = inlined_call_operand.vmem [shape: bf16[9,4,256], index: 1, kind: input, shape index: {}]   ;;  %s8774_s2 = inlined_call_operand.vmem [shape: f32[1,256], index: 2, kind: input, shape index: {}]   ;;  %s8775_s3 = inlined_call_operand.vmem [shape: bf16[512,128], index: 3, kind: output, shape index: {}]  }
   0x1   :  { %s6749_s14 = smov 0  }
   0x2 LB: > { %s25_s15 = sadd.s32 1, %s6719_s13  ;;  %p5669_p0 = scmp.ge.s32.totalorder %s6723_s14, 1  ;;  %s6723_s14 = sphi %s6749_s14, %s13_s14   ;;  %s6719_s13 = sphi %s6747_s13, %s8985_s13   ;;  %s6715_s12 = sphi %s6745_s12, %s8984_s12  }
   0x3   : > { %p27_p1 = scmp.ge.s32.totalorder %s25_s15, 2  ;;  %p151_p2 = scmp.lt.s32.totalorder %s6723_s14, 3 }
   0x5   : > { %s8987_s15 = smov (%p27_p1, %s25_s15), 0  ;;  %p152_p3 = pnand %p5669_p0, %p151_p2 }
   0x7   : > { %155 = sbr.rel (%p152_p3) target bundleno = 1335 (0x537), region = 32 }
   0xc   : > { %v5673_v0 = vld [vmem:[%s8773_s1 + $0x4] sm:$0xf]  ;;  %p176_p4 = scmp.lt.s32.totalorder %s6715_s12, 1  ;;  %vm733_vm0 = vcmask 1041408   ;;  %v226_v1 = vld [vmem:[%s8773_s1] sm:$0xf] }
   0xd   : > { %681 = vst [vmem:[#allocation1] ss:$4 sm:$0xff] %v5673_v0  ;;  %vm243_vm1 = vsmask.f32 3328  ;;  %vm244_vm2 = vsmask.f32 7440 }
   0xe   : > { %s177_s18 = scalar_select %p176_p4, %s6715_s12, 1  ;;  %vm684_vm3 = vcmask 31744   ;;  %v5818_v28 = vld [vmem:[%s8773_s1 + $0x8] sm:$0xf]  ;;  %vm6792_vm4 = vmor %vm243_vm1, %vm244_vm2  ;;  %vm1326_vm5 = vcmask 1042432   ;;  %vm1327_vm6 = vcmask 1046532  }
   0xf   : > { %vm6949_vm7 = vmor %vm1326_vm5, %vm1327_vm6 }
  0x10   : > { %s6612_s19 = smul.u32 216, %s177_s18  ;;  %s5671_s18 = sshll.u32 %s6715_s12, 5 }
  0x11   : > { %p183_p5 = scmp.lt.s32.totalorder %s5671_s18, 63 }
  0x12   : > { %s6776_s24 = scalar_lea.vmem %s8772_s0, %s6612_s19 }
  0x13   : > { %v210_v2 = vld [vmem:[%s6776_s24 + $0x60] sm:$0xf]  ;;  %v211_v3 = vld [vmem:[%s6776_s24 + $0x64] sm:$0xf]  ;;  %v235_v4 = vld [vmem:[%s6776_s24 + $0x68] sm:$0x1] }
  0x14   : > { %v682_v5 = vld.sshfl [vmem:[#allocation1] sm:$0xff pattern:$0x73625140]  ;;  %v683_v6 = vld.sshfl [vmem:[#allocation1 + $0x8] sm:$0xff pattern:$0x73625140] }
  0x15   : > { %v734_v7 = vsel %vm733_vm0, %v682_v5, 0  ;;  %v736_v8 = vsel %vm733_vm0, %v683_v6, 0  ;;  %997 = vst [vmem:[#allocation1] ss:$4 sm:$0xff] %v226_v1  ;;  %v439_v9 = vshrl.u32 %v210_v2, 16  ;;  %v442_v10 = vshll.u32 %v210_v2, 16 }
  0x16   : > { %6610 = vmatpush.bf16.msra.mxu2 %v734_v7  ;;  %834 = vmatpush.bf16.msra.mxu1 %v736_v8  ;;  %v448_v11 = vshll.u32 %v211_v3, 16  ;;  %v452_v12 = vshrl.u32 %v211_v3, 16  ;;  %v458_v13 = vshll.u32 %v235_v4, 16  ;;  %v194_v14 = vld [vmem:[%s6776_s24] sm:$0xf]  ;;  %s8989_s18 = smov (!%p183_p5, %s5671_s18), 63 }
  0x17   : > { %6611 = vmatpush.bf16.msra.mxu3 %v736_v8  ;;  %v441_v15 = vrot.slane %v439_v9, 4  ;;  %v444_v16 = vrot.slane %v442_v10, 5  ;;  %v195_v17 = vld [vmem:[%s6776_s24 + $0x4] sm:$0xf]  ;;  %v227_v18 = vld [vmem:[%s6776_s24 + $0x8] sm:$0x1]  ;;  %745 = vmatpush.bf16.msra.mxu0 %v734_v7 }
  0x18   : > { %v450_v19 = vrot.slane %v448_v11, 5  ;;  %v454_v20 = vrot.slane %v452_v12, 4  ;;  %v460_v21 = vrot.slane %v458_v13, 5  ;;  %v247_v22 = vshrl.u32 %v194_v14, 16  ;;  %v212_v23 = vld [vmem:[%s6776_s24 + $0x6c] sm:$0xf] }
  0x19   : > { %v445_v24 = vor.u32 %v444_v16, %v441_v15  ;;  %v250_v25 = vshll.u32 %v194_v14, 16  ;;  %v256_v26 = vshll.u32 %v195_v17, 16  ;;  %v260_v27 = vshrl.u32 %v195_v17, 16  ;;  %v213_v33 = vld [vmem:[%s6776_s24 + $0x70] sm:$0xf]  ;;  %s5672_s12 = sshll.u32 %s8989_s18, 2 }
  0x1a   : > { %v455_v30 = vor.u32 %v454_v20, %v450_v19  ;;  %v249_v31 = vrot.slane %v247_v22, 4  ;;  %v266_v32 = vshll.u32 %v227_v18, 16  ;;  %v463_v34 = vshrl.u32 %v212_v23, 16  ;;  %v236_v39 = vld [vmem:[%s6776_s24 + $0x74] sm:$0x1]  ;;  %s8502_s21 = scalar_lea.vmem %s8775_s3, %s5672_s12 }
  0x1b   : > { %v446_v35 = vrot.slane %v445_v24, 4  ;;  %v252_v36 = vrot.slane %v250_v25, 5  ;;  %v258_v37 = vrot.slane %v256_v26, 5  ;;  %v262_v38 = vrot.slane %v260_v27, 4  ;;  %v196_v49 = vld [vmem:[%s6776_s24 + $0xc] sm:$0xf] }
  0x1c   : > { %v456_v40 = vrot.slane %v455_v30, 4  ;;  %v268_v41 = vrot.slane %v266_v32, 5  ;;  %v998_v42 = vld.sshfl [vmem:[#allocation1] sm:$0xff pattern:$0x73625140]  ;;  %v465_v43 = vrot.slane %v463_v34, 4 }
  0x1d   : > { %v451_v44 = vsel %vm6792_vm4, %v446_v35, %v450_v19  ;;  %v253_v45 = vor.u32 %v252_v36, %v249_v31  ;;  %v263_v46 = vor.u32 %v262_v38, %v258_v37  ;;  %v999_v47 = vld.sshfl [vmem:[#allocation1 + $0x8] sm:$0xff pattern:$0x73625140]  ;;  %v1048_v48 = vsel %vm733_vm0, %v998_v42, 0  ;;  %v197_v61 = vld [vmem:[%s6776_s24 + $0x10] sm:$0xf] }
  0x1e   : > { %v461_v50 = vsel %vm6792_vm4, %v456_v40, %v460_v21  ;;  %v648_v51 = vunpack.c.l.b16 %v451_v44  ;;  %v1050_v52 = vsel %vm733_vm0, %v999_v47, 0  ;;  %1492 = vst [vmem:[#allocation1] ss:$4 sm:$0xff] %v5818_v28  ;;  %1059 = vmatpush.bf16.msrb.mxu2 %v1048_v48  ;;  %v466_v53 = vshll.u32 %v212_v23, 16  ;;  %v228_v7 = vld [vmem:[%s6776_s24 + $0x14] sm:$0x1] }
  0x1f   : > { %v649_v54 = vunpack.c.l.b16 %v461_v50  ;;  %v254_v55 = vrot.slane %v253_v45, 4  ;;  %v264_v56 = vrot.slane %v263_v46, 4  ;;  %1148 = vmatpush.bf16.msrb.mxu3 %v1050_v52  ;;  %v472_v57 = vshll.u32 %v213_v33, 16  ;;  %v5883_v12 = vld [vmem:[%s8773_s1 + $0xc] sm:$0xf] }
  0x20   : > { %v468_v58 = vrot.slane %v466_v53, 5  ;;  %v476_v59 = vshrl.u32 %v213_v33, 16  ;;  %v482_v60 = vshll.u32 %v236_v39, 16  ;;  %v271_v62 = vshrl.u32 %v196_v49, 16  ;;  %v214_v17 = vld [vmem:[%s6776_s24 + $0x78] sm:$0xf] }
  0x21   : > { %v672_v63 = vpack.c.b16 %v649_v54, %v648_v51  ;;  %v259_v0 = vsel %vm6792_vm4, %v254_v55, %v258_v37  ;;  %v269_v1 = vsel %vm6792_vm4, %v264_v56, %v268_v41  ;;  %v474_v2 = vrot.slane %v472_v57, 5  ;;  %v215_v18 = vld [vmem:[%s6776_s24 + $0x7c] sm:$0xf]  ;;  %v237_v37 = vld [vmem:[%s6776_s24 + $0x80] sm:$0x1] }
  0x22   : > { %v632_v3 = vunpack.c.l.b16 %v259_v0  ;;  %v633_v4 = vunpack.c.l.b16 %v269_v1  ;;  %v469_v5 = vor.u32 %v468_v58, %v465_v43  ;;  %v478_v6 = vrot.slane %v476_v59, 4  ;;  %v198_v44 = vld [vmem:[%s6776_s24 + $0x18] sm:$0xf] }
  0x23   : > { %5682 = vmatmul.msk.bf16.vlgmr.msra.gmra.mxu2 %vm684_vm3, %v672_v63  ;;  %5698 = vmatmul.msk.bf16.vlgmr.msra.gmra.mxu3 %vm684_vm3, %v672_v63  ;;  %v484_v8 = vrot.slane %v482_v60, 5  ;;  %v273_v9 = vrot.slane %v271_v62, 4  ;;  %v274_v10 = vshll.u32 %v196_v49, 16  ;;  %v280_v11 = vshll.u32 %v197_v61, 16  ;;  %v199_v49 = vld [vmem:[%s6776_s24 + $0x1c] sm:$0xf] }
  0x24   : > { %v664_v13 = vpack.c.b16 %v633_v4, %v632_v3  ;;  %v470_v14 = vrot.slane %v469_v5, 4  ;;  %v479_v15 = vor.u32 %v478_v6, %v474_v2  ;;  %v284_v16 = vshrl.u32 %v197_v61, 16  ;;  %v229_v63 = vld [vmem:[%s6776_s24 + $0x20] sm:$0x1] }
  0x25   : > { %v1494_v19 = vld.sshfl [vmem:[#allocation1 + $0x8] sm:$0xff pattern:$0x73625140]  ;;  %v276_v20 = vrot.slane %v274_v10, 5  ;;  %v282_v21 = vrot.slane %v280_v11, 5  ;;  %v290_v22 = vshll.u32 %v228_v7, 16 }
  0x26   : > { %5690 = vmatmul.msk.bf16.vlgmr.msra.gmra.mxu1 %vm684_vm3, %v664_v13  ;;  %5674 = vmatmul.msk.bf16.vlgmr.msra.gmra.mxu0 %vm684_vm3, %v664_v13  ;;  %v1545_v23 = vsel %vm733_vm0, %v1494_v19, 0  ;;  %v480_v24 = vrot.slane %v479_v15, 4  ;;  %v286_v25 = vrot.slane %v284_v16, 4  ;;  %v1493_v26 = vld.sshfl [vmem:[#allocation1] sm:$0xff pattern:$0x73625140]  ;;  %v475_v27 = vsel %vm6792_vm4, %v470_v14, %v474_v2 }
  0x27   : > { %1643 = vmatpush.bf16.msrb.mxu1 %v1545_v23  ;;  %v277_v28 = vor.u32 %v276_v20, %v273_v9  ;;  %v292_v30 = vrot.slane %v290_v22, 5  ;;  %v1543_v31 = vsel %vm733_vm0, %v1493_v26, 0  ;;  %1908 = vst [vmem:[#allocation1] ss:$4 sm:$0xff] %v5883_v12  ;;  %v487_v34 = vshrl.u32 %v214_v17, 16 }
  0x28   : > { %v485_v32 = vsel %vm6792_vm4, %v480_v24, %v484_v8  ;;  %v287_v33 = vor.u32 %v286_v25, %v282_v21  ;;  %1554 = vmatpush.bf16.msrb.mxu0 %v1543_v31  ;;  %v490_v35 = vshll.u32 %v214_v17, 16  ;;  %v496_v38 = vshll.u32 %v215_v18, 16  ;;  %v216_v7 = vld [vmem:[%s6776_s24 + $0x84] sm:$0xf]  ;;  %v217_v10 = vld [vmem:[%s6776_s24 + $0x88] sm:$0xf] }
  0x29   : > { %v278_v36 = vrot.slane %v277_v28, 4  ;;  %v500_v39 = vshrl.u32 %v215_v18, 16  ;;  %v650_v40 = vunpack.c.l.b16 %v475_v27  ;;  %v489_v42 = vrot.slane %v487_v34, 4  ;;  %v200_v20 = vld [vmem:[%s6776_s24 + $0x24] sm:$0xf] }
  0x2a   : > { %v288_v41 = vrot.slane %v287_v33, 4  ;;  %v492_v43 = vrot.slane %v490_v35, 5  ;;  %v651_v45 = vunpack.c.l.b16 %v485_v32  ;;  %v498_v47 = vrot.slane %v496_v38, 5  ;;  %v238_v27 = vld [vmem:[%s6776_s24 + $0x8c] sm:$0x1] }
  0x2b   : > { %v283_v46 = vsel %vm6792_vm4, %v278_v36, %v282_v21  ;;  %v502_v48 = vrot.slane %v500_v39, 4  ;;  %v506_v51 = vshll.u32 %v237_v37, 16  ;;  %v295_v54 = vshrl.u32 %v198_v44, 16  ;;  %v201_v21 = vld [vmem:[%s6776_s24 + $0x28] sm:$0xf] }
  0x2c   : > { %v293_v50 = vsel %vm6792_vm4, %v288_v41, %v292_v30  ;;  %v634_v52 = vunpack.c.l.b16 %v283_v46  ;;  %v493_v53 = vor.u32 %v492_v43, %v489_v42  ;;  %v298_v55 = vshll.u32 %v198_v44, 16  ;;  %v230_v46 = vld [vmem:[%s6776_s24 + $0x2c] sm:$0x1] }
  0x2d   : > { %v635_v56 = vunpack.c.l.b16 %v293_v50  ;;  %v503_v57 = vor.u32 %v502_v48, %v498_v47  ;;  %v304_v58 = vshll.u32 %v199_v49, 16  ;;  %v308_v59 = vshrl.u32 %v199_v49, 16 }
  0x2e   : > { %v673_v60 = vpack.c.b16 %v651_v45, %v650_v40  ;;  %v297_v61 = vrot.slane %v295_v54, 4  ;;  %v300_v62 = vrot.slane %v298_v55, 5  ;;  %v508_v2 = vrot.slane %v506_v51, 5  ;;  %v218_v54 = vld [vmem:[%s6776_s24 + $0x90] sm:$0xf] }
  0x2f   : > { %v306_v0 = vrot.slane %v304_v58, 5  ;;  %v310_v1 = vrot.slane %v308_v59, 4  ;;  %v665_v3 = vpack.c.b16 %v635_v56, %v634_v52  ;;  %v494_v4 = vrot.slane %v493_v53, 4  ;;  %v219_v55 = vld [vmem:[%s6776_s24 + $0x94] sm:$0xf] }
  0x30   : > { %v504_v5 = vrot.slane %v503_v57, 4  ;;  %v301_v6 = vor.u32 %v300_v62, %v297_v61  ;;  %v314_v9 = vshll.u32 %v229_v63, 16  ;;  %v511_v11 = vshrl.u32 %v216_v7, 16  ;;  %v202_v61 = vld [vmem:[%s6776_s24 + $0x30] sm:$0xf] }
  0x31   : > { %v311_v8 = vor.u32 %v310_v1, %v306_v0  ;;  %v514_v12 = vshll.u32 %v216_v7, 16  ;;  %v499_v13 = vsel %vm6792_vm4, %v494_v4, %v498_v47  ;;  %v520_v16 = vshll.u32 %v217_v10, 16 }
  0x32   : > { %v509_v14 = vsel %vm6792_vm4, %v504_v5, %v508_v2  ;;  %v302_v15 = vrot.slane %v301_v6, 4  ;;  %v316_v18 = vrot.slane %v314_v9, 5  ;;  %v524_v19 = vshrl.u32 %v217_v10, 16  ;;  %v203_v2 = vld [vmem:[%s6776_s24 + $0x34] sm:$0xf] }
  0x33   : > { %5683 = vmatmul.msk.bf16.gmra.mxu2 %vm684_vm3, %v673_v60  ;;  %5699 = vmatmul.msk.bf16.gmra.mxu3 %vm684_vm3, %v673_v60  ;;  %v312_v17 = vrot.slane %v311_v8, 4  ;;  %v652_v22 = vunpack.c.l.b16 %v499_v13  ;;  %v653_v23 = vunpack.c.l.b16 %v509_v14  ;;  %v513_v24 = vrot.slane %v511_v11, 4 }
  0x34   : > { %v516_v25 = vrot.slane %v514_v12, 5  ;;  %v307_v26 = vsel %vm6792_vm4, %v302_v15, %v306_v0  ;;  %v522_v28 = vrot.slane %v520_v16, 5  ;;  %v319_v30 = vshrl.u32 %v200_v20, 16  ;;  %v239_v15 = vld [vmem:[%s6776_s24 + $0x98] sm:$0x1] }
  0x35   : > { %v322_v31 = vshll.u32 %v200_v20, 16  ;;  %v317_v32 = vsel %vm6792_vm4, %v312_v17, %v316_v18  ;;  %v526_v33 = vrot.slane %v524_v19, 4  ;;  %v328_v34 = vshll.u32 %v201_v21, 16 }
  0x36   : > { %5691 = vmatmul.msk.bf16.gmra.mxu1 %vm684_vm3, %v665_v3  ;;  %5675 = vmatmul.msk.bf16.gmra.mxu0 %vm684_vm3, %v665_v3  ;;  %v332_v35 = vshrl.u32 %v201_v21, 16  ;;  %v674_v36 = vpack.c.b16 %v653_v23, %v652_v22  ;;  %v530_v37 = vshll.u32 %v238_v27, 16  ;;  %v636_v38 = vunpack.c.l.b16 %v307_v26  ;;  %v231_v26 = vld [vmem:[%s6776_s24 + $0x38] sm:$0x1] }
  0x37   : > { %v637_v39 = vunpack.c.l.b16 %v317_v32  ;;  %v321_v40 = vrot.slane %v319_v30, 4  ;;  %v324_v41 = vrot.slane %v322_v31, 5  ;;  %v517_v42 = vor.u32 %v516_v25, %v513_v24 }
  0x38   : > { %v527_v43 = vor.u32 %v526_v33, %v522_v28  ;;  %v330_v44 = vrot.slane %v328_v34, 5  ;;  %v334_v45 = vrot.slane %v332_v35, 4  ;;  %v532_v48 = vrot.slane %v530_v37, 5  ;;  %v221_v33 = vld [vmem:[%s6776_s24 + $0xa0] sm:$0xf] }
  0x39   : > { %v666_v47 = vpack.c.b16 %v637_v39, %v636_v38  ;;  %v325_v49 = vor.u32 %v324_v41, %v321_v40  ;;  %v518_v50 = vrot.slane %v517_v42, 4  ;;  %v338_v53 = vshll.u32 %v230_v46, 16  ;;  %v204_v41 = vld [vmem:[%s6776_s24 + $0x3c] sm:$0xf]  ;;  %v205_v42 = vld [vmem:[%s6776_s24 + $0x40] sm:$0xf] }
  0x3a   : > { %v528_v51 = vrot.slane %v527_v43, 4  ;;  %v335_v52 = vor.u32 %v334_v45, %v330_v44  ;;  %v535_v62 = vshrl.u32 %v218_v54, 16  ;;  %v538_v63 = vshll.u32 %v218_v54, 16 }
  0x3b   : > { %v326_v56 = vrot.slane %v325_v49, 4  ;;  %v523_v57 = vsel %vm6792_vm4, %v518_v50, %v522_v28  ;;  %v340_v60 = vrot.slane %v338_v53, 5  ;;  %v544_v0 = vshll.u32 %v219_v55, 16  ;;  %v220_v28 = vld [vmem:[%s6776_s24 + $0x9c] sm:$0xf] }
  0x3c   : > { %v533_v58 = vsel %vm6792_vm4, %v528_v51, %v532_v48  ;;  %v336_v59 = vrot.slane %v335_v52, 4  ;;  %v548_v1 = vshrl.u32 %v219_v55, 16  ;;  %v654_v3 = vunpack.c.l.b16 %v523_v57  ;;  %v240_v48 = vld [vmem:[%s6776_s24 + $0xa4] sm:$0x1] }
  0x3d   : > { %v655_v4 = vunpack.c.l.b16 %v533_v58  ;;  %v331_v5 = vsel %vm6792_vm4, %v326_v56, %v330_v44  ;;  %v343_v6 = vshrl.u32 %v202_v61, 16  ;;  %v346_v8 = vshll.u32 %v202_v61, 16 }
  0x3e   : > { %v341_v7 = vsel %vm6792_vm4, %v336_v59, %v340_v60  ;;  %v352_v9 = vshll.u32 %v203_v2, 16  ;;  %v356_v10 = vshrl.u32 %v203_v2, 16  ;;  %v537_v11 = vrot.slane %v535_v62, 4 }
  0x3f   : > { %v540_v12 = vrot.slane %v538_v63, 5  ;;  %v546_v13 = vrot.slane %v544_v0, 5  ;;  %v550_v14 = vrot.slane %v548_v1, 4  ;;  %v675_v16 = vpack.c.b16 %v655_v4, %v654_v3 }
  0x40   : > { %v638_v17 = vunpack.c.l.b16 %v331_v5  ;;  %v639_v18 = vunpack.c.l.b16 %v341_v7  ;;  %v345_v19 = vrot.slane %v343_v6, 4  ;;  %v348_v20 = vrot.slane %v346_v8, 5  ;;  %v232_v6 = vld [vmem:[%s6776_s24 + $0x44] sm:$0x1] }
  0x41   : > { %v354_v21 = vrot.slane %v352_v9, 5  ;;  %v358_v22 = vrot.slane %v356_v10, 4  ;;  %v541_v23 = vor.u32 %v540_v12, %v537_v11  ;;  %v551_v24 = vor.u32 %v550_v14, %v546_v13 }
  0x42   : > { %v554_v25 = vshll.u32 %v239_v15, 16  ;;  %v667_v27 = vpack.c.b16 %v639_v18, %v638_v17  ;;  %v349_v30 = vor.u32 %v348_v20, %v345_v19  ;;  %v362_v32 = vshll.u32 %v231_v26, 16  ;;  %v222_v15 = vld [vmem:[%s6776_s24 + $0xa8] sm:$0xf] }
  0x43   : > { %5684 = vmatmul.msk.bf16.gmra.mxu2 %vm684_vm3, %v674_v36  ;;  %5700 = vmatmul.msk.bf16.gmra.mxu3 %vm684_vm3, %v674_v36  ;;  %v359_v31 = vor.u32 %v358_v22, %v354_v21  ;;  %v542_v34 = vrot.slane %v541_v23, 4  ;;  %v552_v35 = vrot.slane %v551_v24, 4  ;;  %v559_v37 = vshrl.u32 %v220_v28, 16  ;;  %v206_v26 = vld [vmem:[%s6776_s24 + $0x48] sm:$0xf] }
  0x44   : > { %v556_v36 = vrot.slane %v554_v25, 5  ;;  %v562_v38 = vshll.u32 %v220_v28, 16  ;;  %v568_v39 = vshll.u32 %v221_v33, 16  ;;  %v572_v40 = vshrl.u32 %v221_v33, 16 }
  0x45   : > { %v350_v43 = vrot.slane %v349_v30, 4  ;;  %v360_v44 = vrot.slane %v359_v31, 4  ;;  %v364_v45 = vrot.slane %v362_v32, 5  ;;  %v547_v46 = vsel %vm6792_vm4, %v542_v34, %v546_v13 }
  0x46   : > { %5692 = vmatmul.msk.bf16.gmra.mxu1 %vm684_vm3, %v666_v47  ;;  %5676 = vmatmul.msk.bf16.gmra.mxu0 %vm684_vm3, %v666_v47  ;;  %v557_v47 = vsel %vm6792_vm4, %v552_v35, %v556_v36  ;;  %v367_v49 = vshrl.u32 %v204_v41, 16  ;;  %v370_v50 = vshll.u32 %v204_v41, 16  ;;  %v376_v51 = vshll.u32 %v205_v42, 16  ;;  %v241_v41 = vld [vmem:[%s6776_s24 + $0xb0] sm:$0x1] }
  0x47   : > { %v380_v52 = vshrl.u32 %v205_v42, 16  ;;  %v561_v53 = vrot.slane %v559_v37, 4  ;;  %v564_v54 = vrot.slane %v562_v38, 5  ;;  %v570_v55 = vrot.slane %v568_v39, 5 }
  0x48   : > { %v574_v56 = vrot.slane %v572_v40, 4  ;;  %v656_v57 = vunpack.c.l.b16 %v547_v46  ;;  %v657_v58 = vunpack.c.l.b16 %v557_v47  ;;  %v355_v59 = vsel %vm6792_vm4, %v350_v43, %v354_v21 }
  0x49   : > { %v365_v60 = vsel %vm6792_vm4, %v360_v44, %v364_v45  ;;  %v578_v61 = vshll.u32 %v240_v48, 16  ;;  %v369_v62 = vrot.slane %v367_v49, 4  ;;  %v372_v63 = vrot.slane %v370_v50, 5 }
  0x4a   : > { %v378_v0 = vrot.slane %v376_v51, 5  ;;  %v382_v1 = vrot.slane %v380_v52, 4  ;;  %v640_v2 = vunpack.c.l.b16 %v355_v59  ;;  %v641_v3 = vunpack.c.l.b16 %v365_v60  ;;  %v233_v52 = vld [vmem:[%s6776_s24 + $0x50] sm:$0x1]  ;;  %v224_v60 = vld [vmem:[%s6776_s24 + $0xb4] sm:$0xf] }
  0x4b   : > { %v565_v4 = vor.u32 %v564_v54, %v561_v53  ;;  %v575_v5 = vor.u32 %v574_v56, %v570_v55  ;;  %v676_v7 = vpack.c.b16 %v657_v58, %v656_v57  ;;  %v373_v8 = vor.u32 %v372_v63, %v369_v62 }
  0x4c   : > { %v383_v9 = vor.u32 %v382_v1, %v378_v0  ;;  %v386_v10 = vshll.u32 %v232_v6, 16  ;;  %v668_v11 = vpack.c.b16 %v641_v3, %v640_v2  ;;  %v580_v14 = vrot.slane %v578_v61, 5  ;;  %v225_v61 = vld [vmem:[%s6776_s24 + $0xb8] sm:$0xf] }
  0x4d   : > { %v566_v12 = vrot.slane %v565_v4, 4  ;;  %v576_v13 = vrot.slane %v575_v5, 4  ;;  %v374_v17 = vrot.slane %v373_v8, 4  ;;  %v583_v22 = vshrl.u32 %v222_v15, 16  ;;  %v209_v8 = vld [vmem:[%s6776_s24 + $0x58] sm:$0xf] }
  0x4e   : > { %v384_v18 = vrot.slane %v383_v9, 4  ;;  %v388_v19 = vrot.slane %v386_v10, 5  ;;  %v586_v23 = vshll.u32 %v222_v15, 16  ;;  %v391_v33 = vshrl.u32 %v206_v26, 16 }
  0x4f   : > { %v571_v20 = vsel %vm6792_vm4, %v566_v12, %v570_v55  ;;  %v581_v21 = vsel %vm6792_vm4, %v576_v13, %v580_v14  ;;  %v379_v31 = vsel %vm6792_vm4, %v374_v17, %v378_v0  ;;  %v394_v34 = vshll.u32 %v206_v26, 16 }
  0x50   : > { %v658_v28 = vunpack.c.l.b16 %v571_v20  ;;  %v659_v30 = vunpack.c.l.b16 %v581_v21  ;;  %v389_v32 = vsel %vm6792_vm4, %v384_v18, %v388_v19  ;;  %v585_v37 = vrot.slane %v583_v22, 4  ;;  %v242_v21 = vld [vmem:[%s6776_s24 + $0xbc] sm:$0x1] }
  0x51   : > { %v588_v38 = vrot.slane %v586_v23, 5  ;;  %v642_v42 = vunpack.c.l.b16 %v379_v31  ;;  %v643_v43 = vunpack.c.l.b16 %v389_v32  ;;  %v393_v44 = vrot.slane %v391_v33, 4  ;;  %v234_v33 = vld [vmem:[%s6776_s24 + $0x5c] sm:$0x1] }
  0x52   : > { %v396_v45 = vrot.slane %v394_v34, 5  ;;  %v677_v48 = vpack.c.b16 %v659_v30, %v658_v28  ;;  %v602_v51 = vshll.u32 %v241_v41, 16  ;;  %v410_v56 = vshll.u32 %v233_v52, 16 }
  0x53   : > { %5685 = vmatmul.msk.bf16.gmra.mxu2 %vm684_vm3, %v675_v16  ;;  %5701 = vmatmul.msk.bf16.gmra.mxu3 %vm684_vm3, %v675_v16  ;;  %v223_v16 = vld [vmem:[%s6776_s24 + $0xac] sm:$0xf]  ;;  %v589_v49 = vor.u32 %v588_v38, %v585_v37  ;;  %v669_v53 = vpack.c.b16 %v643_v43, %v642_v42  ;;  %v607_v3 = vshrl.u32 %v224_v60, 16  ;;  %v610_v4 = vshll.u32 %v224_v60, 16  ;;  %v6028_v43 = vld [vmem:[%s8773_s1 + $0x10] sm:$0xf] }
  0x54   : > { %v592_v24 = vshll.u32 %v223_v16, 16  ;;  %v596_v25 = vshrl.u32 %v223_v16, 16  ;;  %v397_v54 = vor.u32 %v396_v45, %v393_v44  ;;  %v604_v59 = vrot.slane %v602_v51, 5  ;;  %v1909_v38 = vld.sshfl [vmem:[#allocation1] sm:$0xff pattern:$0x73625140] }
  0x55   : > { %v590_v57 = vrot.slane %v589_v49, 4  ;;  %v412_v0 = vrot.slane %v410_v56, 5  ;;  %v616_v5 = vshll.u32 %v225_v61, 16  ;;  %v620_v6 = vshrl.u32 %v225_v61, 16 }
  0x56   : > { %5693 = vmatmul.msk.bf16.gmra.mxu1 %vm684_vm3, %v667_v27  ;;  %5677 = vmatmul.msk.bf16.gmra.mxu0 %vm684_vm3, %v667_v27  ;;  %v207_v27 = vld [vmem:[%s6776_s24 + $0x4c] sm:$0xf]  ;;  %v594_v39 = vrot.slane %v592_v24, 5  ;;  %v598_v40 = vrot.slane %v596_v25, 4  ;;  %v398_v62 = vrot.slane %v397_v54, 4  ;;  %v424_v15 = vshll.u32 %v209_v8, 16 }
  0x57   : > { %v400_v35 = vshll.u32 %v207_v27, 16  ;;  %v404_v36 = vshrl.u32 %v207_v27, 16  ;;  %v428_v16 = vshrl.u32 %v209_v8, 16  ;;  %v609_v17 = vrot.slane %v607_v3, 4 }
  0x58   : > { %v599_v50 = vor.u32 %v598_v40, %v594_v39  ;;  %v595_v1 = vsel %vm6792_vm4, %v590_v57, %v594_v39  ;;  %v612_v18 = vrot.slane %v610_v4, 5  ;;  %v618_v19 = vrot.slane %v616_v5, 5  ;;  %v1910_v42 = vld.sshfl [vmem:[#allocation1 + $0x8] sm:$0xff pattern:$0x73625140] }
  0x59   : > { %v402_v46 = vrot.slane %v400_v35, 5  ;;  %v406_v47 = vrot.slane %v404_v36, 4  ;;  %v660_v9 = vunpack.c.l.b16 %v595_v1  ;;  %v622_v20 = vrot.slane %v620_v6, 4  ;;  %2688 = vst [vmem:[#allocation1] ss:$4 sm:$0xff] %v6028_v43 }
  0x5a   : > { %v600_v58 = vrot.slane %v599_v50, 4  ;;  %v426_v27 = vrot.slane %v424_v15, 5  ;;  %v430_v28 = vrot.slane %v428_v16, 4  ;;  %v613_v30 = vor.u32 %v612_v18, %v609_v17  ;;  %v1233_v17 = vld [vmem:[%s6776_s24 + $0xc] sm:$0xe] }
  0x5b   : > { %v407_v55 = vor.u32 %v406_v47, %v402_v46  ;;  %v623_v31 = vor.u32 %v622_v20, %v618_v19  ;;  %v626_v32 = vshll.u32 %v242_v21, 16  ;;  %v434_v37 = vshll.u32 %v234_v33, 16  ;;  %v1235_v18 = vld [vmem:[%s6776_s24 + $0x14] sm:$0x1]  ;;  %v6468_v33 = vld [vmem:[%s6776_s24 + $0xc] sm:$0xff] }
  0x5c   : > { %v605_v2 = vsel %vm6792_vm4, %v600_v58, %v604_v59  ;;  %v431_v36 = vor.u32 %v430_v28, %v426_v27  ;;  %v614_v39 = vrot.slane %v613_v30, 4  ;;  %v1961_v47 = vsel %vm733_vm0, %v1910_v42, 0  ;;  %v1231_v59 = vld [vmem:[%s6776_s24 + $0x4] sm:$0xf] }
  0x5d   : > { %v408_v63 = vrot.slane %v407_v55, 4  ;;  %v661_v10 = vunpack.c.l.b16 %v605_v2  ;;  %v624_v40 = vrot.slane %v623_v31, 4  ;;  %v628_v41 = vrot.slane %v626_v32, 5  ;;  %2059 = vmatpush.bf16.msra.mxu3 %v1961_v47 }
  0x5e   : > { %v432_v45 = vrot.slane %v431_v36, 4  ;;  %v1331_v61 = vrot.slane %v1231_v59, 5  ;;  %v8780_v4 = vmov 0  ;;  %v5803_v21 = vrot.slane %v1233_v17, 9 }
  0x5f   : > { %v413_v12 = vsel %vm6792_vm4, %v408_v63, %v412_v0  ;;  %v678_v22 = vpack.c.b16 %v661_v10, %v660_v9  ;;  %v629_v49 = vsel %vm6792_vm4, %v624_v40, %v628_v41  ;;  %v1230_v63 = vld [vmem:[%s6776_s24] sm:$0xe]  ;;  %v1232_v0 = vld [vmem:[%s6776_s24 + $0x8] sm:$0x1]  ;;  %v8781_v4 = vsel %vm6949_vm7, 4294967295, %v8780_v4 }
  0x60   : > { %v645_v24 = vunpack.c.l.b16 %v413_v12  ;;  %v663_v51 = vunpack.c.l.b16 %v629_v49  ;;  %v2690_v56 = vld.sshfl [vmem:[#allocation1 + $0x8] sm:$0xff pattern:$0x73625140]  ;;  %v5802_v1 = vrot.slane %v1230_v63, 9  ;;  %v1333_v2 = vrot.slane %v1331_v61, 4  ;;  %8782 = vst [vmem:[#allocation2_spill] sm:$0xff] %v8781_v4 }
  0x61   : > { %v2741_v58 = vsel %vm733_vm0, %v2690_v56, 0  ;;  %v1334_v3 = vrot.slane %v1232_v0, 5  ;;  %v1234_v12 = vld [vmem:[%s6776_s24 + $0x10] sm:$0xf]  ;;  %v1238_v40 = vld [vmem:[%s6776_s24 + $0x20] sm:$0x1] }
  0x62   : > { %2839 = vmatpush.bf16.msra.mxu1 %v2741_v58  ;;  %v1332_v5 = vsel %vm6949_vm7, %v5802_v1, %v1331_v61  ;;  %v1338_v16 = vrot.slane %v1234_v12, 5  ;;  %v1241_v61 = vld [vmem:[%s6776_s24 + $0x2c] sm:$0x1]  ;;  %v6470_v12 = vld [vmem:[%s6776_s24 + $0x24] sm:$0xff] }
  0x63   : > { %5686 = vmatmul.msk.bf16.gmra.mxu2 %vm684_vm3, %v676_v7  ;;  %5702 = vmatmul.msk.bf16.gmra.mxu3 %vm684_vm3, %v676_v7  ;;  %v208_v7 = vld [vmem:[%s6776_s24 + $0x54] sm:$0xf]  ;;  %v1335_v6 = vsel %vm6949_vm7, %v1333_v2, %v1334_v3  ;;  %v1443_v9 = vunpack.c.l.b16 %v1332_v5  ;;  %v1355_v2 = vrot.slane %v1241_v61, 5 }
  0x64   : > { %v415_v13 = vshrl.u32 %v208_v7, 16  ;;  %v418_v14 = vshll.u32 %v208_v7, 16  ;;  %v2689_v7 = vld.sshfl [vmem:[#allocation1] sm:$0xff pattern:$0x73625140]  ;;  %v1444_v10 = vunpack.c.l.b16 %v1335_v6 }
  0x65   : > { %v2739_v8 = vsel %vm733_vm0, %v2689_v7, 0 }
  0x66   : > { %5694 = vmatmul.msk.bf16.gmra.mxu1 %vm684_vm3, %v668_v11  ;;  %5678 = vmatmul.msk.bf16.gmra.mxu0 %vm684_vm3, %v668_v11  ;;  %v403_v11 = vsel %vm6792_vm4, %v398_v62, %v402_v46  ;;  %v417_v25 = vrot.slane %v415_v13, 4  ;;  %v420_v26 = vrot.slane %v418_v14, 5  ;;  %v436_v46 = vrot.slane %v434_v37, 5 }
  0x67   : > { %v644_v23 = vunpack.c.l.b16 %v403_v11  ;;  %v1959_v62 = vsel %vm733_vm0, %v1909_v38, 0  ;;  %2750 = vmatpush.bf16.msra.mxu0 %v2739_v8  ;;  %v6467_v11 = vld [vmem:[%s6776_s24] sm:$0xff]  ;;  %v1475_v13 = vpack.c.b16 %v1444_v10, %v1443_v9 }
  0x68   : > { %v421_v35 = vor.u32 %v420_v26, %v417_v25  ;;  %1970 = vmatpush.bf16.msra.mxu2 %v1959_v62  ;;  %v1339_v26 = vsel %vm6949_vm7, %v5803_v21, %v1338_v16 }
  0x69   : > { %v670_v34 = vpack.c.b16 %v645_v24, %v644_v23  ;;  %v1341_v23 = vrot.slane %v1235_v18, 5  ;;  %v1445_v31 = vunpack.c.l.b16 %v1339_v26 }
  0x6a   : > { %v422_v44 = vrot.slane %v421_v35, 4 }
  0x6c   : > { %v427_v52 = vsel %vm6792_vm4, %v422_v44, %v426_v27 }
  0x6d   : > { %v646_v54 = vunpack.c.l.b16 %v427_v52 }
  0x73   : > { %5687 = vmatmul.msk.bf16.gmra.mxu2 %vm684_vm3, %v677_v48  ;;  %5703 = vmatmul.msk.bf16.gmra.mxu3 %vm684_vm3, %v677_v48  ;;  %v619_v48 = vsel %vm6792_vm4, %v614_v39, %v618_v19  ;;  %v1236_v39 = vld [vmem:[%s6776_s24 + $0x18] sm:$0xe] }
  0x74   : > { %v662_v50 = vunpack.c.l.b16 %v619_v48  ;;  %v5804_v43 = vrot.slane %v1236_v39, 9 }
  0x76   : > { %5695 = vmatmul.msk.bf16.gmra.mxu1 %vm684_vm3, %v669_v53  ;;  %5679 = vmatmul.msk.bf16.gmra.mxu0 %vm684_vm3, %v669_v53  ;;  %v437_v53 = vsel %vm6792_vm4, %v432_v45, %v436_v46  ;;  %v679_v57 = vpack.c.b16 %v663_v51, %v662_v50  ;;  %v1348_v45 = vrot.slane %v1238_v40, 5 }
  0x77   : > { %v647_v55 = vunpack.c.l.b16 %v437_v53 }
  0x79   : > { %v671_v60 = vpack.c.b16 %v647_v55, %v646_v54  ;;  %v6469_v54 = vld [vmem:[%s6776_s24 + $0x18] sm:$0xff]  ;;  %v1240_v55 = vld [vmem:[%s6776_s24 + $0x28] sm:$0xf] }
  0x7a   : > { %v1352_v59 = vrot.slane %v1240_v55, 5 }
  0x7c   : > { %v1354_v1 = vrot.slane %v1352_v59, 4 }
  0x7e   : > { %v1356_v7 = vsel %vm6949_vm7, %v1354_v1, %v1355_v2 }
  0x83   : > { %5688 = vmatmul.msk.bf16.gmra.mxu2 %vm684_vm3, %v678_v22  ;;  %5704 = vmatmul.msk.bf16.gmra.mxu3 %vm684_vm3, %v678_v22  ;;  %v1340_v22 = vrot.slane %v1338_v16, 4 }
  0x85   : > { %v1342_v27 = vsel %vm6949_vm7, %v1340_v22, %v1341_v23  ;;  %v1242_v22 = vld [vmem:[%s6776_s24 + $0x30] sm:$0xe]  ;;  %v1244_v23 = vld [vmem:[%s6776_s24 + $0x38] sm:$0x1] }
  0x86   : > { %5696 = vmatmul.msk.bf16.gmra.mxu1 %vm684_vm3, %v670_v34  ;;  %5680 = vmatmul.msk.bf16.gmra.mxu0 %vm684_vm3, %v670_v34  ;;  %v1446_v32 = vunpack.c.l.b16 %v1342_v27  ;;  %v1237_v34 = vld [vmem:[%s6776_s24 + $0x1c] sm:$0xf] }
  0x87   : > { %v1345_v38 = vrot.slane %v1237_v34, 5 }
  0x88   : > { %v1476_v35 = vpack.c.b16 %v1446_v32, %v1445_v31  ;;  %v5806_v31 = vrot.slane %v1242_v22, 9  ;;  %v6472_v22 = vld [vmem:[%s6776_s24 + $0x3c] sm:$0xff] }
  0x89   : > { %v1347_v44 = vrot.slane %v1345_v38, 4  ;;  %v1346_v48 = vsel %vm6949_vm7, %v5804_v43, %v1345_v38 }
  0x8a   : > { %v1447_v52 = vunpack.c.l.b16 %v1346_v48  ;;  %v6471_v48 = vld [vmem:[%s6776_s24 + $0x30] sm:$0xff] }
  0x8b   : > { %v1349_v49 = vsel %vm6949_vm7, %v1347_v44, %v1348_v45 }
  0x8c   : > { %v1448_v53 = vunpack.c.l.b16 %v1349_v49  ;;  %v1246_v49 = vld [vmem:[%s6776_s24 + $0x40] sm:$0xf] }
  0x8d   : > { %v1366_v55 = vrot.slane %v1246_v49, 5 }
  0x8e   : > { %v1477_v56 = vpack.c.b16 %v1448_v53, %v1447_v52 }
  0x8f   : > { %v1368_v1 = vrot.slane %v1366_v55, 4 }
  0x93   : > { %5689 = vmatmul.msk.bf16.gmra.mxu2 %vm684_vm3, %v679_v57  ;;  %5705 = vmatmul.msk.bf16.gmra.mxu3 %vm684_vm3, %v679_v57 }
  0x96   : > { %5697 = vmatmul.msk.bf16.gmra.mxu1 %vm684_vm3, %v671_v60  ;;  %5681 = vmatmul.msk.bf16.gmra.mxu0 %vm684_vm3, %v671_v60  ;;  %v1239_v60 = vld [vmem:[%s6776_s24 + $0x24] sm:$0xe] }
  0x97   : > { %v5805_v0 = vrot.slane %v1239_v60, 9 }
  0x99   : > { %v1353_v6 = vsel %vm6949_vm7, %v5805_v0, %v1352_v59  ;;  %v1247_v59 = vld [vmem:[%s6776_s24 + $0x44] sm:$0x1] }
  0x9a   : > { %v1449_v10 = vunpack.c.l.b16 %v1353_v6  ;;  %v1369_v2 = vrot.slane %v1247_v59, 5 }
  0xa3   : > { %v6960_v14 = vpop.f32.mrf.mxu1  ;;  %5770 = vmatmul.msk.bf16.vlgmr.msrb.gmra.mxu2 %vm684_vm3, %v6467_v11  ;;  %5786 = vmatmul.msk.bf16.vlgmr.msrb.gmra.mxu3 %vm684_vm3, %v6467_v11  ;;  %v6964_v15 = vpop.f32.mrf.mxu0  ;;  %v1450_v11 = vunpack.c.l.b16 %v1356_v7 }
  0xa5   : > { %v1478_v16 = vpack.c.b16 %v1450_v11, %v1449_v10  ;;  %v1370_v11 = vsel %vm6949_vm7, %v1368_v1, %v1369_v2 }
  0xa6   : > { %5835 = vmatmul.msk.bf16.vlgmr.msrb.gmra.mxu1 %vm684_vm3, %v1475_v13  ;;  %v6969_v19 = vpop.f32.mrf.mxu2  ;;  %v6971_v20 = vpop.f32.mrf.mxu3  ;;  %5819 = vmatmul.msk.bf16.vlgmr.msrb.gmra.mxu0 %vm684_vm3, %v1475_v13  ;;  %v1243_v13 = vld [vmem:[%s6776_s24 + $0x34] sm:$0xf] }
  0xa7   : > { %v1359_v21 = vrot.slane %v1243_v13, 5 }
  0xa9   : > { %v1361_v32 = vrot.slane %v1359_v21, 4  ;;  %v1360_v38 = vsel %vm6949_vm7, %v5806_v31, %v1359_v21  ;;  %v1454_v21 = vunpack.c.l.b16 %v1370_v11 }
  0xaa   : > { %v1451_v44 = vunpack.c.l.b16 %v1360_v38 }
  0xab   : > { %v6974_v24 = vpop.f32.mrf.mxu1  ;;  %v6976_v25 = vpop.f32.mrf.mxu0 }
  0xae   : > { %v6982_v28 = vpop.f32.mrf.mxu2  ;;  %v6984_v30 = vpop.f32.mrf.mxu3 }
  0xb3   : > { %v6988_v36 = vpop.f32.mrf.mxu1  ;;  %5771 = vmatmul.msk.bf16.gmra.mxu2 %vm684_vm3, %v6468_v33  ;;  %5787 = vmatmul.msk.bf16.gmra.mxu3 %vm684_vm3, %v6468_v33  ;;  %v6992_v37 = vpop.f32.mrf.mxu0  ;;  %v1362_v33 = vrot.slane %v1244_v23, 5  ;;  %v1249_v23 = vld [vmem:[%s6776_s24 + $0x4c] sm:$0xf] }
  0xb4   : > { %v1373_v38 = vrot.slane %v1249_v23, 5 }
  0xb5   : > { %v1363_v39 = vsel %vm6949_vm7, %v1361_v32, %v1362_v33 }
  0xb6   : > { %5836 = vmatmul.msk.bf16.gmra.mxu1 %vm684_vm3, %v1476_v35  ;;  %v6997_v41 = vpop.f32.mrf.mxu2  ;;  %v6999_v42 = vpop.f32.mrf.mxu3  ;;  %5820 = vmatmul.msk.bf16.gmra.mxu0 %vm684_vm3, %v1476_v35  ;;  %v1452_v45 = vunpack.c.l.b16 %v1363_v39  ;;  %v1248_v39 = vld [vmem:[%s6776_s24 + $0x48] sm:$0xe] }
  0xb7   : > { %v5808_v49 = vrot.slane %v1248_v39, 9 }
  0xb8   : > { %v1479_v52 = vpack.c.b16 %v1452_v45, %v1451_v44  ;;  %v1250_v44 = vld [vmem:[%s6776_s24 + $0x50] sm:$0x1] }
  0xbb   : > { %v7002_v46 = vpop.f32.mrf.mxu1  ;;  %v7004_v47 = vpop.f32.mrf.mxu0 }
  0xbe   : > { %v7010_v50 = vpop.f32.mrf.mxu2  ;;  %v7012_v51 = vpop.f32.mrf.mxu3 }
  0xc3   : > { %v7016_v57 = vpop.f32.mrf.mxu1  ;;  %5772 = vmatmul.msk.bf16.gmra.mxu2 %vm684_vm3, %v6469_v54  ;;  %5788 = vmatmul.msk.bf16.gmra.mxu3 %vm684_vm3, %v6469_v54  ;;  %v7020_v58 = vpop.f32.mrf.mxu0 }
  0xc6   : > { %5837 = vmatmul.msk.bf16.gmra.mxu1 %vm684_vm3, %v1477_v56  ;;  %v7025_v62 = vpop.f32.mrf.mxu2  ;;  %v7027_v63 = vpop.f32.mrf.mxu3  ;;  %5821 = vmatmul.msk.bf16.gmra.mxu0 %vm684_vm3, %v1477_v56  ;;  %v1245_v56 = vld [vmem:[%s6776_s24 + $0x3c] sm:$0xe] }
  0xc7   : > { %v5807_v0 = vrot.slane %v1245_v56, 9 }
  0xc9   : > { %v1367_v10 = vsel %vm6949_vm7, %v5807_v0, %v1366_v55  ;;  %v1376_v55 = vrot.slane %v1250_v44, 5  ;;  %v1374_v0 = vsel %vm6949_vm7, %v5808_v49, %v1373_v38  ;;  %v1251_v44 = vld [vmem:[%s6776_s24 + $0x54] sm:$0xe]  ;;  %v1253_v49 = vld [vmem:[%s6776_s24 + $0x5c] sm:$0x1] }
  0xca   : > { %v1455_v11 = vunpack.c.l.b16 %v1374_v0  ;;  %v5809_v0 = vrot.slane %v1251_v44, 9 }
  0xcb   : > { %v7030_v3 = vpop.f32.mrf.mxu1  ;;  %v7032_v5 = vpop.f32.mrf.mxu0 }
  0xce   : > { %v7038_v8 = vpop.f32.mrf.mxu2  ;;  %v7040_v9 = vpop.f32.mrf.mxu3 }
  0xd3   : > { %v7044_v17 = vpop.f32.mrf.mxu1  ;;  %5773 = vmatmul.msk.bf16.gmra.mxu2 %vm684_vm3, %v6470_v12  ;;  %5789 = vmatmul.msk.bf16.gmra.mxu3 %vm684_vm3, %v6470_v12  ;;  %v7048_v18 = vpop.f32.mrf.mxu0 }
  0xd6   : > { %5838 = vmatmul.msk.bf16.gmra.mxu1 %vm684_vm3, %v1478_v16  ;;  %v7053_v26 = vpop.f32.mrf.mxu2  ;;  %v7055_v27 = vpop.f32.mrf.mxu3  ;;  %5822 = vmatmul.msk.bf16.gmra.mxu0 %vm684_vm3, %v1478_v16  ;;  %v1453_v16 = vunpack.c.l.b16 %v1367_v10 }
  0xd7   : > { %8783 = vst [vmem:[#allocation3_spill] sm:$0xff] %v7053_v26 }
  0xd8   : > { %8784 = vst [vmem:[#allocation4_spill] sm:$0xff] %v7055_v27  ;;  %v1480_v31 = vpack.c.b16 %v1454_v21, %v1453_v16  ;;  %v6473_v21 = vld [vmem:[%s6776_s24 + $0x48] sm:$0xff] }
  0xdb   : > { %v7058_v34 = vpop.f32.mrf.mxu1  ;;  %v7060_v35 = vpop.f32.mrf.mxu0 }
  0xde   : > { %v7066_v40 = vpop.f32.mrf.mxu2  ;;  %v7068_v43 = vpop.f32.mrf.mxu3 }
  0xdf   : > { %8785 = vst [vmem:[#allocation5_spill] sm:$0xff] %v7066_v40  ;;  %v1257_v40 = vld [vmem:[%s6776_s24 + $0x6c] sm:$0xe] }
  0xe0   : > { %8786 = vst [vmem:[#allocation6_spill] sm:$0xff] %v7068_v43 }
  0xe3   : > { %v7072_v53 = vpop.f32.mrf.mxu1  ;;  %5774 = vmatmul.msk.bf16.gmra.mxu2 %vm684_vm3, %v6471_v48  ;;  %5790 = vmatmul.msk.bf16.gmra.mxu3 %vm684_vm3, %v6471_v48  ;;  %v7076_v54 = vpop.f32.mrf.mxu0 }
  0xe6   : > { %5839 = vmatmul.msk.bf16.gmra.mxu1 %vm684_vm3, %v1479_v52  ;;  %v7081_v60 = vpop.f32.mrf.mxu2  ;;  %v7083_v61 = vpop.f32.mrf.mxu3  ;;  %5823 = vmatmul.msk.bf16.gmra.mxu0 %vm684_vm3, %v1479_v52  ;;  %v1375_v52 = vrot.slane %v1373_v38, 4 }
  0xe7   : > { %8787 = vst [vmem:[#allocation7_spill] sm:$0xff] %v7081_v60 }
  0xe8   : > { %8788 = vst [vmem:[#allocation8_spill] sm:$0xff] %v7083_v61  ;;  %v1377_v1 = vsel %vm6949_vm7, %v1375_v52, %v1376_v55 }
  0xe9   : > { %v1456_v16 = vunpack.c.l.b16 %v1377_v1 }
  0xeb   : > { %v7086_v6 = vpop.f32.mrf.mxu1  ;;  %v7088_v7 = vpop.f32.mrf.mxu0  ;;  %v1481_v23 = vpack.c.b16 %v1456_v16, %v1455_v11  ;;  %v1383_v11 = vrot.slane %v1253_v49, 5  ;;  %v1255_v49 = vld [vmem:[%s6776_s24 + $0x64] sm:$0xf] }
  0xee   : > { %v7094_v12 = vpop.f32.mrf.mxu2  ;;  %v7096_v13 = vpop.f32.mrf.mxu3 }
  0xef   : > { %8789 = vst [vmem:[#allocation9_spill] sm:$0xff] %v7094_v12  ;;  %v6475_v12 = vld [vmem:[%s6776_s24 + $0x60] sm:$0xff] }
  0xf0   : > { %8790 = vst [vmem:[#allocation10_spill] sm:$0xff] %v7096_v13 }
  0xf3   : > { %v7100_v32 = vpop.f32.mrf.mxu1  ;;  %5775 = vmatmul.msk.bf16.gmra.mxu2 %vm684_vm3, %v6472_v22  ;;  %5791 = vmatmul.msk.bf16.gmra.mxu3 %vm684_vm3, %v6472_v22  ;;  %v7104_v33 = vpop.f32.mrf.mxu0  ;;  %v1252_v22 = vld [vmem:[%s6776_s24 + $0x58] sm:$0xf] }
  0xf4   : > { %v1380_v38 = vrot.slane %v1252_v22, 5 }
  0xf6   : > { %5840 = vmatmul.msk.bf16.gmra.mxu1 %vm684_vm3, %v1480_v31  ;;  %v7109_v45 = vpop.f32.mrf.mxu2  ;;  %v7111_v48 = vpop.f32.mrf.mxu3  ;;  %5824 = vmatmul.msk.bf16.gmra.mxu0 %vm684_vm3, %v1480_v31  ;;  %v1382_v1 = vrot.slane %v1380_v38, 4  ;;  %v1381_v22 = vsel %vm6949_vm7, %v5809_v0, %v1380_v38  ;;  %v1387_v38 = vrot.slane %v1255_v49, 5  ;;  %v1254_v0 = vld [vmem:[%s6776_s24 + $0x60] sm:$0xe] }
  0xf7   : > { %8791 = vst [vmem:[#allocation11_spill] sm:$0xff] %v7109_v45 }
  0xf8   : > { %8792 = vst [vmem:[#allocation12_spill] sm:$0xff] %v7111_v48 }
  0xfb   : > { %v7114_v56 = vpop.f32.mrf.mxu1  ;;  %v7116_v59 = vpop.f32.mrf.mxu0 }
  0xfe   : > { %v7122_v2 = vpop.f32.mrf.mxu2  ;;  %v7124_v10 = vpop.f32.mrf.mxu3 }
  0xff   : > { %8793 = vst [vmem:[#allocation13_spill] sm:$0xff] %v7122_v2  ;;  %v6474_v2 = vld [vmem:[%s6776_s24 + $0x54] sm:$0xff] }
 0x100   : > { %8794 = vst [vmem:[#allocation14_spill] sm:$0xff] %v7124_v10  ;;  %v1384_v10 = vsel %vm6949_vm7, %v1382_v1, %v1383_v11  ;;  %v1256_v1 = vld [vmem:[%s6776_s24 + $0x68] sm:$0x1] }
 0x101   : > { %v1458_v44 = vunpack.c.l.b16 %v1384_v10 }
 0x103   : > { %v7128_v31 = vpop.f32.mrf.mxu1  ;;  %5776 = vmatmul.msk.bf16.gmra.mxu2 %vm684_vm3, %v6473_v21  ;;  %5792 = vmatmul.msk.bf16.gmra.mxu3 %vm684_vm3, %v6473_v21  ;;  %v7132_v39 = vpop.f32.mrf.mxu0 }
 0x106   : > { %5841 = vmatmul.msk.bf16.gmra.mxu1 %vm684_vm3, %v1481_v23  ;;  %v7137_v52 = vpop.f32.mrf.mxu2  ;;  %v7139_v55 = vpop.f32.mrf.mxu3  ;;  %5825 = vmatmul.msk.bf16.gmra.mxu0 %vm684_vm3, %v1481_v23  ;;  %v1457_v23 = vunpack.c.l.b16 %v1381_v22  ;;  %v5810_v22 = vrot.slane %v1254_v0, 9 }
 0x107   : > { %8795 = vst [vmem:[#allocation15_spill] sm:$0xff] %v7137_v52 }
 0x108   : > { %8796 = vst [vmem:[#allocation16_spill] sm:$0xff] %v7139_v55  ;;  %v1482_v48 = vpack.c.b16 %v1458_v44, %v1457_v23  ;;  %v1389_v23 = vrot.slane %v1387_v38, 4  ;;  %v1390_v44 = vrot.slane %v1256_v1, 5  ;;  %v1388_v49 = vsel %vm6949_vm7, %v5810_v22, %v1387_v38  ;;  %v1258_v1 = vld [vmem:[%s6776_s24 + $0x70] sm:$0xf] }
 0x109   : > { %v1394_v38 = vrot.slane %v1258_v1, 5  ;;  %v1259_v22 = vld [vmem:[%s6776_s24 + $0x74] sm:$0x1] }
 0x10b   : > { %v7142_v16 = vpop.f32.mrf.mxu1  ;;  %v7144_v21 = vpop.f32.mrf.mxu0 }
 0x10e   : > { %v7150_v52 = vpop.f32.mrf.mxu2  ;;  %v7152_v55 = vpop.f32.mrf.mxu3 }
 0x10f   : > { %8797 = vst [vmem:[#allocation17_spill] sm:$0xff] %v7150_v52  ;;  %v1391_v52 = vsel %vm6949_vm7, %v1389_v23, %v1390_v44 }
 0x110   : > { %8798 = vst [vmem:[#allocation18_spill] sm:$0xff] %v7152_v55  ;;  %v1460_v0 = vunpack.c.l.b16 %v1391_v52 }
 0x113   : > { %v7156_v45 = vpop.f32.mrf.mxu1  ;;  %5777 = vmatmul.msk.bf16.gmra.mxu2 %vm684_vm3, %v6474_v2  ;;  %5793 = vmatmul.msk.bf16.gmra.mxu3 %vm684_vm3, %v6474_v2  ;;  %v7160_v13 = vpop.f32.mrf.mxu0 }
 0x116   : > { %5842 = vmatmul.msk.bf16.gmra.mxu1 %vm684_vm3, %v1482_v48  ;;  %v7165_v11 = vpop.f32.mrf.mxu2  ;;  %v7167_v10 = vpop.f32.mrf.mxu3  ;;  %5826 = vmatmul.msk.bf16.gmra.mxu0 %vm684_vm3, %v1482_v48  ;;  %v1459_v48 = vunpack.c.l.b16 %v1388_v49  ;;  %v5811_v49 = vrot.slane %v1257_v40, 9 }
 0x117   : > { %8799 = vst [vmem:[#allocation19_spill] sm:$0xff] %v7165_v11 }
 0x118   : > { %8800 = vst [vmem:[#allocation20_spill] sm:$0xff] %v7167_v10  ;;  %v1483_v61 = vpack.c.b16 %v1460_v0, %v1459_v48  ;;  %v1396_v0 = vrot.slane %v1394_v38, 4  ;;  %v1395_v26 = vsel %vm6949_vm7, %v5811_v49, %v1394_v38 }
 0x11b   : > { %v7170_v2 = vpop.f32.mrf.mxu1  ;;  %v7172_v55 = vpop.f32.mrf.mxu0 }
 0x11e   : > { %v7178_v11 = vpop.f32.mrf.mxu2  ;;  %v7180_v10 = vpop.f32.mrf.mxu3 }
 0x11f   : > { %8801 = vst [vmem:[#allocation21_spill] sm:$0xff] %v7178_v11 }
 0x120   : > { %8802 = vst [vmem:[#allocation22_spill] sm:$0xff] %v7180_v10  ;;  %v1397_v10 = vrot.slane %v1259_v22, 5 }
 0x122   : > { %v1398_v40 = vsel %vm6949_vm7, %v1396_v0, %v1397_v10  ;;  %v1260_v0 = vld [vmem:[%s6776_s24 + $0x78] sm:$0xe] }
 0x123   : > { %v1645_v60 = vpop.f32.mrf.mxu1  ;;  %5778 = vmatmul.msk.bf16.gmra.mxu2 %vm684_vm3, %v6475_v12  ;;  %5794 = vmatmul.msk.bf16.gmra.mxu3 %vm684_vm3, %v6475_v12  ;;  %v1556_v43 = vpop.f32.mrf.mxu0 }
 0x126   : > { %5843 = vmatmul.msk.bf16.gmra.mxu1 %vm684_vm3, %v1483_v61  ;;  %v1061_v23 = vpop.f32.mrf.mxu2  ;;  %v1150_v44 = vpop.f32.mrf.mxu3  ;;  %5827 = vmatmul.msk.bf16.gmra.mxu0 %vm684_vm3, %v1483_v61 }
 0x127   : > { %v1062_v52 = vadd.f32 %v1061_v23, %v6964_v15  ;;  %v1151_v48 = vadd.f32 %v1150_v44, %v6960_v14  ;;  %v1461_v14 = vunpack.c.l.b16 %v1395_v26  ;;  %v1462_v23 = vunpack.c.l.b16 %v1398_v40  ;;  %v1261_v44 = vld [vmem:[%s6776_s24 + $0x7c] sm:$0xf]  ;;  %v1262_v40 = vld [vmem:[%s6776_s24 + $0x80] sm:$0x1] }
 0x128   : > { %v1401_v26 = vrot.slane %v1261_v44, 5 }
 0x129   : > { %v7192_v12 = vadd.f32 %v1556_v43, %v1062_v52  ;;  %v7194_v11 = vadd.f32 %v1645_v60, %v1151_v48  ;;  %v6476_v60 = vld [vmem:[%s6776_s24 + $0x6c] sm:$0xff]  ;;  %v1484_v38 = vpack.c.b16 %v1462_v23, %v1461_v14  ;;  %v1404_v14 = vrot.slane %v1262_v40, 5 }
 0x12b   : > { %v1647_v1 = vpop.f32.mrf.mxu1  ;;  %v1558_v27 = vpop.f32.mrf.mxu0 }
 0x12e   : > { %v1063_v15 = vpop.f32.mrf.mxu2  ;;  %v1152_v61 = vpop.f32.mrf.mxu3 }
 0x12f   : > { %v1064_v22 = vadd.f32 %v1063_v15, %v6976_v25  ;;  %v1153_v43 = vadd.f32 %v1152_v61, %v6974_v24  ;;  %v1403_v61 = vrot.slane %v1401_v26, 4 }
 0x131   : > { %v7204_v52 = vadd.f32 %v1558_v27, %v1064_v22  ;;  %v7206_v48 = vadd.f32 %v1647_v1, %v1153_v43  ;;  %v5812_v27 = vrot.slane %v1260_v0, 9 }
 0x133   : > { %v1650_v49 = vpop.f32.mrf.mxu1  ;;  %5779 = vmatmul.msk.bf16.gmra.mxu2 %vm684_vm3, %v6476_v60  ;;  %5795 = vmatmul.msk.bf16.gmra.mxu3 %vm684_vm3, %v6476_v60  ;;  %v1561_v10 = vpop.f32.mrf.mxu0  ;;  %v1402_v44 = vsel %vm6949_vm7, %v5812_v27, %v1401_v26 }
 0x136   : > { %5844 = vmatmul.msk.bf16.gmra.mxu1 %vm684_vm3, %v1484_v38  ;;  %v1066_v25 = vpop.f32.mrf.mxu2  ;;  %v1155_v24 = vpop.f32.mrf.mxu3  ;;  %5828 = vmatmul.msk.bf16.gmra.mxu0 %vm684_vm3, %v1484_v38  ;;  %v1405_v38 = vsel %vm6949_vm7, %v1403_v61, %v1404_v14  ;;  %v1263_v14 = vld [vmem:[%s6776_s24 + $0x84] sm:$0xe] }
 0x137   : > { %v1067_v1 = vadd.f32 %v1066_v25, %v6992_v37  ;;  %v1156_v15 = vadd.f32 %v1155_v24, %v6988_v36  ;;  %v1463_v36 = vunpack.c.l.b16 %v1402_v44  ;;  %v1464_v25 = vunpack.c.l.b16 %v1405_v38  ;;  %v1264_v24 = vld [vmem:[%s6776_s24 + $0x88] sm:$0xf]  ;;  %v1265_v38 = vld [vmem:[%s6776_s24 + $0x8c] sm:$0x1] }
 0x138   : > { %v1408_v44 = vrot.slane %v1264_v24, 5 }
 0x139   : > { %v7216_v23 = vadd.f32 %v1561_v10, %v1067_v1  ;;  %v7218_v22 = vadd.f32 %v1650_v49, %v1156_v15  ;;  %v6477_v49 = vld [vmem:[%s6776_s24 + $0x78] sm:$0xff]  ;;  %v1485_v26 = vpack.c.b16 %v1464_v25, %v1463_v36  ;;  %v1411_v36 = vrot.slane %v1265_v38, 5 }
 0x13b   : > { %v1652_v43 = vpop.f32.mrf.mxu1  ;;  %v1563_v60 = vpop.f32.mrf.mxu0 }
 0x13e   : > { %v1068_v37 = vpop.f32.mrf.mxu2  ;;  %v1157_v0 = vpop.f32.mrf.mxu3 }
 0x13f   : > { %v1069_v40 = vadd.f32 %v1068_v37, %v7004_v47  ;;  %v1158_v10 = vadd.f32 %v1157_v0, %v7002_v46  ;;  %v1410_v0 = vrot.slane %v1408_v44, 4 }
 0x141   : > { %v7228_v1 = vadd.f32 %v1563_v60, %v1069_v40  ;;  %v7230_v15 = vadd.f32 %v1652_v43, %v1158_v10  ;;  %v5813_v60 = vrot.slane %v1263_v14, 9 }
 0x143   : > { %v1655_v27 = vpop.f32.mrf.mxu1  ;;  %5780 = vmatmul.msk.bf16.gmra.mxu2 %vm684_vm3, %v6477_v49  ;;  %5796 = vmatmul.msk.bf16.gmra.mxu3 %vm684_vm3, %v6477_v49  ;;  %v1566_v61 = vpop.f32.mrf.mxu0  ;;  %v1409_v24 = vsel %vm6949_vm7, %v5813_v60, %v1408_v44 }
 0x146   : > { %5845 = vmatmul.msk.bf16.gmra.mxu1 %vm684_vm3, %v1485_v26  ;;  %v1071_v47 = vpop.f32.mrf.mxu2  ;;  %v1160_v46 = vpop.f32.mrf.mxu3  ;;  %5829 = vmatmul.msk.bf16.gmra.mxu0 %vm684_vm3, %v1485_v26  ;;  %v1412_v26 = vsel %vm6949_vm7, %v1410_v0, %v1411_v36  ;;  %v1266_v36 = vld [vmem:[%s6776_s24 + $0x90] sm:$0xe] }
 0x147   : > { %v1072_v43 = vadd.f32 %v1071_v47, %v7020_v58  ;;  %v1161_v37 = vadd.f32 %v1160_v46, %v7016_v57  ;;  %v1465_v57 = vunpack.c.l.b16 %v1409_v24  ;;  %v1466_v47 = vunpack.c.l.b16 %v1412_v26  ;;  %v1267_v46 = vld [vmem:[%s6776_s24 + $0x94] sm:$0xf]  ;;  %v1268_v26 = vld [vmem:[%s6776_s24 + $0x98] sm:$0x1] }
 0x148   : > { %v1415_v24 = vrot.slane %v1267_v46, 5 }
 0x149   : > { %v7240_v25 = vadd.f32 %v1566_v61, %v1072_v43  ;;  %v7242_v40 = vadd.f32 %v1655_v27, %v1161_v37  ;;  %v6478_v27 = vld [vmem:[%s6776_s24 + $0x84] sm:$0xff]  ;;  %v1486_v44 = vpack.c.b16 %v1466_v47, %v1465_v57  ;;  %v1418_v57 = vrot.slane %v1268_v26, 5 }
 0x14b   : > { %v1657_v10 = vpop.f32.mrf.mxu1  ;;  %v1568_v49 = vpop.f32.mrf.mxu0 }
 0x14e   : > { %v1073_v58 = vpop.f32.mrf.mxu2  ;;  %v1162_v14 = vpop.f32.mrf.mxu3 }
 0x14f   : > { %v1074_v38 = vadd.f32 %v1073_v58, %v7032_v5  ;;  %v1163_v61 = vadd.f32 %v1162_v14, %v7030_v3  ;;  %v1417_v14 = vrot.slane %v1415_v24, 4 }
 0x151   : > { %v7252_v43 = vadd.f32 %v1568_v49, %v1074_v38  ;;  %v7254_v37 = vadd.f32 %v1657_v10, %v1163_v61  ;;  %v5814_v49 = vrot.slane %v1266_v36, 9 }
 0x153   : > { %v1660_v60 = vpop.f32.mrf.mxu1  ;;  %5781 = vmatmul.msk.bf16.gmra.mxu2 %vm684_vm3, %v6478_v27  ;;  %5797 = vmatmul.msk.bf16.gmra.mxu3 %vm684_vm3, %v6478_v27  ;;  %v1571_v0 = vpop.f32.mrf.mxu0  ;;  %v1416_v46 = vsel %vm6949_vm7, %v5814_v49, %v1415_v24 }
 0x156   : > { %5846 = vmatmul.msk.bf16.gmra.mxu1 %vm684_vm3, %v1486_v44  ;;  %v1076_v5 = vpop.f32.mrf.mxu2  ;;  %v1165_v3 = vpop.f32.mrf.mxu3  ;;  %5830 = vmatmul.msk.bf16.gmra.mxu0 %vm684_vm3, %v1486_v44  ;;  %v1419_v44 = vsel %vm6949_vm7, %v1417_v14, %v1418_v57  ;;  %v1269_v57 = vld [vmem:[%s6776_s24 + $0x9c] sm:$0xe] }
 0x157   : > { %v1077_v10 = vadd.f32 %v1076_v5, %v7048_v18  ;;  %v1166_v58 = vadd.f32 %v1165_v3, %v7044_v17  ;;  %v1467_v17 = vunpack.c.l.b16 %v1416_v46  ;;  %v1468_v5 = vunpack.c.l.b16 %v1419_v44  ;;  %v1270_v3 = vld [vmem:[%s6776_s24 + $0xa0] sm:$0xf]  ;;  %v1271_v44 = vld [vmem:[%s6776_s24 + $0xa4] sm:$0x1] }
 0x158   : > { %v1422_v46 = vrot.slane %v1270_v3, 5 }
 0x159   : > { %v7264_v47 = vadd.f32 %v1571_v0, %v1077_v10  ;;  %v7266_v38 = vadd.f32 %v1660_v60, %v1166_v58  ;;  %v6479_v60 = vld [vmem:[%s6776_s24 + $0x90] sm:$0xff]  ;;  %v1487_v24 = vpack.c.b16 %v1468_v5, %v1467_v17  ;;  %v1425_v17 = vrot.slane %v1271_v44, 5 }
 0x15b   : > { %v1662_v61 = vpop.f32.mrf.mxu1  ;;  %v1573_v27 = vpop.f32.mrf.mxu0 }
 0x15e   : > { %v1078_v18 = vpop.f32.mrf.mxu2  ;;  %v1167_v36 = vpop.f32.mrf.mxu3 }
 0x15f   : > { %v1079_v26 = vadd.f32 %v1078_v18, %v7060_v35  ;;  %v1168_v0 = vadd.f32 %v1167_v36, %v7058_v34  ;;  %v1424_v36 = vrot.slane %v1422_v46, 4 }
 0x161   : > { %v7276_v10 = vadd.f32 %v1573_v27, %v1079_v26  ;;  %v7278_v58 = vadd.f32 %v1662_v61, %v1168_v0  ;;  %v5815_v27 = vrot.slane %v1269_v57, 9 }
 0x163   : > { %v1665_v49 = vpop.f32.mrf.mxu1  ;;  %5782 = vmatmul.msk.bf16.gmra.mxu2 %vm684_vm3, %v6479_v60  ;;  %5798 = vmatmul.msk.bf16.gmra.mxu3 %vm684_vm3, %v6479_v60  ;;  %v1576_v14 = vpop.f32.mrf.mxu0  ;;  %v1423_v3 = vsel %vm6949_vm7, %v5815_v27, %v1422_v46 }
 0x166   : > { %5847 = vmatmul.msk.bf16.gmra.mxu1 %vm684_vm3, %v1487_v24  ;;  %v1081_v35 = vpop.f32.mrf.mxu2  ;;  %v1170_v34 = vpop.f32.mrf.mxu3  ;;  %5831 = vmatmul.msk.bf16.gmra.mxu0 %vm684_vm3, %v1487_v24  ;;  %v1426_v24 = vsel %vm6949_vm7, %v1424_v36, %v1425_v17  ;;  %v1272_v17 = vld [vmem:[%s6776_s24 + $0xa8] sm:$0xe] }
 0x167   : > { %v1082_v61 = vadd.f32 %v1081_v35, %v7076_v54  ;;  %v1171_v18 = vadd.f32 %v1170_v34, %v7072_v53  ;;  %v1469_v53 = vunpack.c.l.b16 %v1423_v3  ;;  %v1470_v35 = vunpack.c.l.b16 %v1426_v24  ;;  %v1273_v34 = vld [vmem:[%s6776_s24 + $0xac] sm:$0xf]  ;;  %v1274_v24 = vld [vmem:[%s6776_s24 + $0xb0] sm:$0x1] }
 0x168   : > { %v1429_v3 = vrot.slane %v1273_v34, 5 }
 0x169   : > { %v7288_v5 = vadd.f32 %v1576_v14, %v1082_v61  ;;  %v7290_v26 = vadd.f32 %v1665_v49, %v1171_v18  ;;  %v6480_v49 = vld [vmem:[%s6776_s24 + $0x9c] sm:$0xff]  ;;  %v1488_v46 = vpack.c.b16 %v1470_v35, %v1469_v53  ;;  %v1432_v53 = vrot.slane %v1274_v24, 5 }
 0x16b   : > { %v1667_v0 = vpop.f32.mrf.mxu1  ;;  %v1578_v60 = vpop.f32.mrf.mxu0 }
 0x16e   : > { %v1083_v54 = vpop.f32.mrf.mxu2  ;;  %v1172_v57 = vpop.f32.mrf.mxu3 }
 0x16f   : > { %v1084_v44 = vadd.f32 %v1083_v54, %v7088_v7  ;;  %v1173_v14 = vadd.f32 %v1172_v57, %v7086_v6  ;;  %v1431_v57 = vrot.slane %v1429_v3, 4 }
 0x171   : > { %v7300_v61 = vadd.f32 %v1578_v60, %v1084_v44  ;;  %v7302_v18 = vadd.f32 %v1667_v0, %v1173_v14  ;;  %v5816_v60 = vrot.slane %v1272_v17, 9 }
 0x173   : > { %v1670_v27 = vpop.f32.mrf.mxu1  ;;  %5783 = vmatmul.msk.bf16.gmra.mxu2 %vm684_vm3, %v6480_v49  ;;  %5799 = vmatmul.msk.bf16.gmra.mxu3 %vm684_vm3, %v6480_v49  ;;  %v1581_v36 = vpop.f32.mrf.mxu0  ;;  %v1430_v34 = vsel %vm6949_vm7, %v5816_v60, %v1429_v3  ;;  %v1275_v60 = vld [vmem:[%s6776_s24 + $0xb4] sm:$0xe] }
 0x176   : > { %5848 = vmatmul.msk.bf16.gmra.mxu1 %vm684_vm3, %v1488_v46  ;;  %v1086_v7 = vpop.f32.mrf.mxu2  ;;  %v1175_v6 = vpop.f32.mrf.mxu3  ;;  %5832 = vmatmul.msk.bf16.gmra.mxu0 %vm684_vm3, %v1488_v46  ;;  %v1433_v46 = vsel %vm6949_vm7, %v1431_v57, %v1432_v53 }
 0x177   : > { %v1087_v0 = vadd.f32 %v1086_v7, %v7104_v33  ;;  %v1176_v54 = vadd.f32 %v1175_v6, %v7100_v32  ;;  %v1471_v32 = vunpack.c.l.b16 %v1430_v34  ;;  %v1472_v7 = vunpack.c.l.b16 %v1433_v46  ;;  %v1276_v6 = vld [vmem:[%s6776_s24 + $0xb8] sm:$0xf] }
 0x178   : > { %v1436_v34 = vrot.slane %v1276_v6, 5  ;;  %v5817_v46 = vrot.slane %v1275_v60, 9 }
 0x179   : > { %v7312_v35 = vadd.f32 %v1581_v36, %v1087_v0  ;;  %v7314_v44 = vadd.f32 %v1670_v27, %v1176_v54  ;;  %v6481_v27 = vld [vmem:[%s6776_s24 + $0xa8] sm:$0xff]  ;;  %v1489_v3 = vpack.c.b16 %v1472_v7, %v1471_v32 }
 0x17b   : > { %8803 = vst [vmem:[#allocation23_spill] sm:$0xff] %v7312_v35  ;;  %v1672_v14 = vpop.f32.mrf.mxu1  ;;  %v1583_v49 = vpop.f32.mrf.mxu0  ;;  %v1437_v35 = vsel %vm6949_vm7, %v5817_v46, %v1436_v34 }
 0x17c   : > { %8804 = vst [vmem:[#allocation24_spill] sm:$0xff] %v7314_v44 }
 0x17e   : > { %v1088_v33 = vpop.f32.mrf.mxu2  ;;  %v1177_v17 = vpop.f32.mrf.mxu3 }
 0x17f   : > { %v1089_v24 = vadd.f32 %v1088_v33, %v7116_v59  ;;  %v1178_v36 = vadd.f32 %v1177_v17, %v7114_v56  ;;  %v1277_v59 = vld [vmem:[%s6776_s24 + $0xbc] sm:$0x1]  ;;  %v6125_v17 = vld [vmem:[%s8773_s1 + $0x14] sm:$0xf] }
 0x180   : > { %3244 = vst [vmem:[#allocation1] ss:$4 sm:$0xff] %v6125_v17 }
 0x181   : > { %v7324_v0 = vadd.f32 %v1583_v49, %v1089_v24  ;;  %v7326_v54 = vadd.f32 %v1672_v14, %v1178_v36  ;;  %v5980_v49 = vld [vmem:[%s6776_s24 + $0xc] sm:$0xf]  ;;  %v5981_v14 = vld [vmem:[%s6776_s24 + $0x10] sm:$0xf]  ;;  %v1438_v24 = vrot.slane %v1436_v34, 4  ;;  %v1439_v36 = vrot.slane %v1277_v59, 5 }
 0x182   : > { %v2254_v6 = vshrl.u32 %v5980_v49, 16  ;;  %v2257_v60 = vshll.u32 %v5980_v49, 16  ;;  %v6482_v59 = vld [vmem:[%s6776_s24 + $0xb4] sm:$0xff] }
 0x183   : > { %8805 = vst [vmem:[#allocation25_spill] sm:$0xff] %v7324_v0  ;;  %v1675_v57 = vpop.f32.mrf.mxu1  ;;  %5784 = vmatmul.msk.bf16.gmra.mxu2 %vm684_vm3, %v6481_v27  ;;  %5800 = vmatmul.msk.bf16.gmra.mxu3 %vm684_vm3, %v6481_v27  ;;  %v1586_v53 = vpop.f32.mrf.mxu0 }
 0x184   : > { %8806 = vst [vmem:[#allocation26_spill] sm:$0xff] %v7326_v54  ;;  %v2263_v54 = vshll.u32 %v5981_v14, 16 }
 0x186   : > { %5849 = vmatmul.msk.bf16.gmra.mxu1 %vm684_vm3, %v1489_v3  ;;  %v1091_v56 = vpop.f32.mrf.mxu2  ;;  %v1180_v33 = vpop.f32.mrf.mxu3  ;;  %5833 = vmatmul.msk.bf16.gmra.mxu0 %vm684_vm3, %v1489_v3  ;;  %v2265_v49 = vrot.slane %v2263_v54, 5 }
 0x187   : > { %v1092_v32 = vadd.f32 %v1091_v56, %v7132_v39  ;;  %v1181_v7 = vadd.f32 %v1180_v33, %v7128_v31  ;;  %v1440_v39 = vsel %vm6949_vm7, %v1438_v24, %v1439_v36  ;;  %v2267_v31 = vshrl.u32 %v5981_v14, 16  ;;  %v5982_v24 = vld [vmem:[%s6776_s24 + $0x14] sm:$0x1] }
 0x188   : > { %v2256_v56 = vrot.slane %v2254_v6, 4  ;;  %v2259_v33 = vrot.slane %v2257_v60, 5 }
 0x189   : > { %v7341_v27 = vadd.f32 %v1586_v53, %v1092_v32  ;;  %v7343_v3 = vadd.f32 %v1675_v57, %v1181_v7  ;;  %v6190_v53 = vld [vmem:[%s8773_s1 + $0x18] sm:$0xf]  ;;  %v1473_v32 = vunpack.c.l.b16 %v1437_v35  ;;  %v1474_v7 = vunpack.c.l.b16 %v1440_v39 }
 0x18a   : > { %v2269_v14 = vrot.slane %v2267_v31, 4  ;;  %v2260_v60 = vor.u32 %v2259_v33, %v2256_v56  ;;  %v2273_v35 = vshll.u32 %v5982_v24, 16 }
 0x18b   : > { %8807 = vst [vmem:[#allocation27_spill] sm:$0xff] %v7341_v27  ;;  %v1677_v0 = vpop.f32.mrf.mxu1  ;;  %v1588_v44 = vpop.f32.mrf.mxu0  ;;  %v3246_v27 = vld.sshfl [vmem:[#allocation1 + $0x8] sm:$0xff pattern:$0x73625140]  ;;  %v1490_v54 = vpack.c.b16 %v1474_v7, %v1473_v32  ;;  %v5983_v32 = vld [vmem:[%s6776_s24 + $0x18] sm:$0xf] }
 0x18c   : > { %8808 = vst [vmem:[#allocation28_spill] sm:$0xff] %v7343_v3  ;;  %v3245_v3 = vld.sshfl [vmem:[#allocation1] sm:$0xff pattern:$0x73625140]  ;;  %v3297_v36 = vsel %vm733_vm0, %v3246_v27, 0  ;;  %v2261_v31 = vrot.slane %v2260_v60, 4 }
 0x18d   : > { %3660 = vst [vmem:[#allocation1] ss:$4 sm:$0xff] %v6190_v53  ;;  %3395 = vmatpush.bf16.msrb.mxu3 %v3297_v36  ;;  %v3295_v27 = vsel %vm733_vm0, %v3245_v3, 0  ;;  %v2275_v53 = vrot.slane %v2273_v35, 5  ;;  %v5984_v3 = vld [vmem:[%s6776_s24 + $0x1c] sm:$0xf] }
 0x18e   : > { %v1093_v57 = vpop.f32.mrf.mxu2  ;;  %v1182_v17 = vpop.f32.mrf.mxu3  ;;  %3306 = vmatpush.bf16.msrb.mxu2 %v3295_v27  ;;  %v2291_v60 = vshrl.u32 %v5984_v3, 16 }
 0x18f   : > { %v1094_v34 = vadd.f32 %v1093_v57, %v7144_v21  ;;  %v1183_v46 = vadd.f32 %v1182_v17, %v7142_v16  ;;  %v2270_v21 = vor.u32 %v2269_v14, %v2265_v49 }
 0x191   : > { %v7357_v4 = vadd.f32 %v1588_v44, %v1094_v34  ;;  %v7359_v6 = vadd.f32 %v1677_v0, %v1183_v46  ;;  %v2271_v57 = vrot.slane %v2270_v21, 4  ;;  %v2278_v34 = vshrl.u32 %v5983_v32, 16 }
 0x192   : > { %v2281_v46 = vshll.u32 %v5983_v32, 16 }
 0x193   : > { %v1680_v39 = vpop.f32.mrf.mxu1  ;;  %5785 = vmatmul.msk.bf16.gmra.mxu2 %vm684_vm3, %v6482_v59  ;;  %5801 = vmatmul.msk.bf16.gmra.mxu3 %vm684_vm3, %v6482_v59  ;;  %v1591_v16 = vpop.f32.mrf.mxu0 }
 0x194   : > { %v3662_v56 = vld.sshfl [vmem:[#allocation1 + $0x8] sm:$0xff pattern:$0x73625140]  ;;  %v3661_v35 = vld.sshfl [vmem:[#allocation1] sm:$0xff pattern:$0x73625140] }
 0x195   : > { %v3713_v17 = vsel %vm733_vm0, %v3662_v56, 0  ;;  %v2283_v56 = vrot.slane %v2281_v46, 5 }
 0x196   : > { %5850 = vmatmul.msk.bf16.gmra.mxu1 %vm684_vm3, %v1490_v54  ;;  %v1096_v44 = vpop.f32.mrf.mxu2  ;;  %v1185_v0 = vpop.f32.mrf.mxu3  ;;  %5834 = vmatmul.msk.bf16.gmra.mxu0 %vm684_vm3, %v1490_v54  ;;  %v2287_v54 = vshll.u32 %v5984_v3, 16 }
 0x197   : > { %v1097_v33 = vadd.f32 %v1096_v44, %v7160_v13  ;;  %v1186_v59 = vadd.f32 %v1185_v0, %v7156_v45  ;;  %3811 = vmatpush.bf16.msrb.mxu1 %v3713_v17  ;;  %v2266_v13 = vsel %vm6792_vm4, %v2261_v31, %v2265_v49  ;;  %v2276_v45 = vsel %vm6792_vm4, %v2271_v57, %v2275_v53  ;;  %v6483_v31 = vld [vmem:[%s6776_s24 + $0xc] sm:$0xff]  ;;  %v5985_v57 = vld [vmem:[%s6776_s24 + $0x20] sm:$0x1] }
 0x198   : > { %v2640_v44 = vunpack.c.l.b16 %v2276_v45  ;;  %v2280_v0 = vrot.slane %v2278_v34, 4  ;;  %v2293_v53 = vrot.slane %v2291_v60, 4 }
 0x199   : > { %v7371_v7 = vadd.f32 %v1591_v16, %v1097_v33  ;;  %v7373_v24 = vadd.f32 %v1680_v39, %v1186_v59  ;;  %v3711_v16 = vsel %vm733_vm0, %v3661_v35, 0  ;;  %v2639_v39 = vunpack.c.l.b16 %v2266_v13 }
 0x19a   : > { %3722 = vmatpush.bf16.msrb.mxu0 %v3711_v16  ;;  %v2289_v59 = vrot.slane %v2287_v54, 5  ;;  %v2284_v35 = vor.u32 %v2283_v56, %v2280_v0 }
 0x19b   : > { %v1682_v14 = vpop.f32.mrf.mxu1  ;;  %v1593_v36 = vpop.f32.mrf.mxu0  ;;  %v2671_v3 = vpack.c.b16 %v2640_v44, %v2639_v39 }
 0x19c   : > { %v2294_v34 = vor.u32 %v2293_v53, %v2289_v59 }
 0x19e   : > { %v1098_v21 = vpop.f32.mrf.mxu2  ;;  %v1187_v27 = vpop.f32.mrf.mxu3  ;;  %v2295_v54 = vrot.slane %v2294_v34, 4 }
 0x19f   : > { %v1099_v33 = vadd.f32 %v1098_v21, %v7172_v55  ;;  %v1188_v49 = vadd.f32 %v1187_v27, %v7170_v2  ;;  %v2297_v2 = vshll.u32 %v5985_v57, 16  ;;  %v5986_v21 = vld [vmem:[%s6776_s24 + $0x24] sm:$0xf]  ;;  %v5987_v27 = vld [vmem:[%s6776_s24 + $0x28] sm:$0xf] }
 0x1a0   : > { %v2302_v44 = vshrl.u32 %v5986_v21, 16  ;;  %v2305_v0 = vshll.u32 %v5986_v21, 16  ;;  %v2315_v53 = vshrl.u32 %v5987_v27, 16  ;;  %v5988_v21 = vld [vmem:[%s6776_s24 + $0x2c] sm:$0x1] }
 0x1a1   : > { %v7384_v17 = vadd.f32 %v1593_v36, %v1099_v33  ;;  %v7386_v32 = vadd.f32 %v1682_v14, %v1188_v49  ;;  %v2285_v14 = vrot.slane %v2284_v35, 4  ;;  %v2299_v60 = vrot.slane %v2297_v2, 5 }
 0x1a2   : > { %v2304_v34 = vrot.slane %v2302_v44, 4  ;;  %v2307_v2 = vrot.slane %v2305_v0, 5 }
 0x1a3   : > { %v1685_v16 = vpop.f32.mrf.mxu1  ;;  %5948 = vmatmul.msk.bf16.vlgmr.msra.gmra.mxu2 %vm684_vm3, %v6483_v31  ;;  %5964 = vmatmul.msk.bf16.vlgmr.msra.gmra.mxu3 %vm684_vm3, %v6483_v31  ;;  %v1596_v55 = vpop.f32.mrf.mxu0  ;;  %v2290_v31 = vsel %vm6792_vm4, %v2285_v14, %v2289_v59 }
 0x1a4   : > { %v2641_v35 = vunpack.c.l.b16 %v2290_v31 }
 0x1a6   : > { %6045 = vmatmul.msk.bf16.vlgmr.msra.gmra.mxu1 %vm684_vm3, %v2671_v3  ;;  %v1101_v46 = vpop.f32.mrf.mxu2  ;;  %v1190_v13 = vpop.f32.mrf.mxu3  ;;  %6029 = vmatmul.msk.bf16.vlgmr.msra.gmra.mxu0 %vm684_vm3, %v2671_v3 }
 0x1a7   : > { %v1102_v36 = vadd.f32 %v1101_v46, %v6969_v19  ;;  %v1191_v45 = vadd.f32 %v1190_v13, %v6971_v20  ;;  %v2300_v19 = vsel %vm6792_vm4, %v2295_v54, %v2299_v60  ;;  %v2311_v20 = vshll.u32 %v5987_v27, 16  ;;  %v6484_v13 = vld [vmem:[%s6776_s24 + $0x18] sm:$0xff] }
 0x1a8   : > { %v2308_v60 = vor.u32 %v2307_v2, %v2304_v34 }
 0x1a9   : > { %v7396_v39 = vadd.f32 %v1596_v55, %v1102_v36  ;;  %v7398_v56 = vadd.f32 %v1685_v16, %v1191_v45  ;;  %v2642_v55 = vunpack.c.l.b16 %v2300_v19  ;;  %v2313_v36 = vrot.slane %v2311_v20, 5 }
 0x1aa   : > { %v2317_v45 = vrot.slane %v2315_v53, 4 }
 0x1ab   : > { %v1687_v33 = vpop.f32.mrf.mxu1  ;;  %v1598_v49 = vpop.f32.mrf.mxu0  ;;  %v2672_v54 = vpack.c.b16 %v2642_v55, %v2641_v35 }
 0x1ac   : > { %v2318_v44 = vor.u32 %v2317_v45, %v2313_v36 }
 0x1ae   : > { %v1103_v57 = vpop.f32.mrf.mxu2  ;;  %v1192_v3 = vpop.f32.mrf.mxu3  ;;  %v2319_v20 = vrot.slane %v2318_v44, 4 }
 0x1af   : > { %v1104_v16 = vadd.f32 %v1103_v57, %v6982_v28  ;;  %v1193_v46 = vadd.f32 %v1192_v3, %v6984_v30  ;;  %v2321_v30 = vshll.u32 %v5988_v21, 16  ;;  %v5989_v57 = vld [vmem:[%s6776_s24 + $0x30] sm:$0xf]  ;;  %v5990_v3 = vld [vmem:[%s6776_s24 + $0x34] sm:$0xf] }
 0x1b0   : > { %v2326_v55 = vshrl.u32 %v5989_v57, 16  ;;  %v2329_v34 = vshll.u32 %v5989_v57, 16  ;;  %v2339_v45 = vshrl.u32 %v5990_v3, 16  ;;  %v5991_v57 = vld [vmem:[%s6776_s24 + $0x38] sm:$0x1] }
 0x1b1   : > { %v7408_v59 = vadd.f32 %v1598_v49, %v1104_v16  ;;  %v7410_v14 = vadd.f32 %v1687_v33, %v1193_v46  ;;  %v2309_v33 = vrot.slane %v2308_v60, 4  ;;  %v2323_v53 = vrot.slane %v2321_v30, 5 }
 0x1b2   : > { %v2328_v44 = vrot.slane %v2326_v55, 4  ;;  %v2331_v30 = vrot.slane %v2329_v34, 5 }
 0x1b3   : > { %v1690_v27 = vpop.f32.mrf.mxu1  ;;  %5949 = vmatmul.msk.bf16.gmra.mxu2 %vm684_vm3, %v6484_v13  ;;  %5965 = vmatmul.msk.bf16.gmra.mxu3 %vm684_vm3, %v6484_v13  ;;  %v1601_v28 = vpop.f32.mrf.mxu0  ;;  %v2314_v13 = vsel %vm6792_vm4, %v2309_v33, %v2313_v36 }
 0x1b4   : > { %v2643_v60 = vunpack.c.l.b16 %v2314_v13 }
 0x1b6   : > { %6046 = vmatmul.msk.bf16.gmra.mxu1 %vm684_vm3, %v2672_v54  ;;  %v1106_v0 = vpop.f32.mrf.mxu2  ;;  %v1195_v31 = vpop.f32.mrf.mxu3  ;;  %6030 = vmatmul.msk.bf16.gmra.mxu0 %vm684_vm3, %v2672_v54 }
 0x1b7   : > { %v1107_v49 = vadd.f32 %v1106_v0, %v6997_v41  ;;  %v1196_v19 = vadd.f32 %v1195_v31, %v6999_v42  ;;  %v2324_v41 = vsel %vm6792_vm4, %v2319_v20, %v2323_v53  ;;  %v2335_v42 = vshll.u32 %v5990_v3, 16  ;;  %v6485_v31 = vld [vmem:[%s6776_s24 + $0x24] sm:$0xff] }
 0x1b8   : > { %v2332_v53 = vor.u32 %v2331_v30, %v2328_v44 }
 0x1b9   : > { %v7420_v35 = vadd.f32 %v1601_v28, %v1107_v49  ;;  %v7422_v2 = vadd.f32 %v1690_v27, %v1196_v19  ;;  %v2644_v28 = vunpack.c.l.b16 %v2324_v41  ;;  %v2337_v49 = vrot.slane %v2335_v42, 5 }
 0x1ba   : > { %v2341_v19 = vrot.slane %v2339_v45, 4 }
 0x1bb   : > { %v1692_v16 = vpop.f32.mrf.mxu1  ;;  %v1603_v46 = vpop.f32.mrf.mxu0  ;;  %v2673_v20 = vpack.c.b16 %v2644_v28, %v2643_v60 }
 0x1bc   : > { %v2342_v55 = vor.u32 %v2341_v19, %v2337_v49 }
 0x1be   : > { %v1108_v21 = vpop.f32.mrf.mxu2  ;;  %v1197_v54 = vpop.f32.mrf.mxu3  ;;  %v2343_v42 = vrot.slane %v2342_v55, 4 }
 0x1bf   : > { %v1109_v27 = vadd.f32 %v1108_v21, %v7010_v50  ;;  %v1198_v0 = vadd.f32 %v1197_v54, %v7012_v51  ;;  %v2345_v51 = vshll.u32 %v5991_v57, 16  ;;  %v5992_v21 = vld [vmem:[%s6776_s24 + $0x3c] sm:$0xf]  ;;  %v5993_v54 = vld [vmem:[%s6776_s24 + $0x40] sm:$0xf] }
 0x1c0   : > { %v2350_v28 = vshrl.u32 %v5992_v21, 16  ;;  %v2353_v44 = vshll.u32 %v5992_v21, 16  ;;  %v2363_v19 = vshrl.u32 %v5993_v54, 16  ;;  %v5994_v21 = vld [vmem:[%s6776_s24 + $0x44] sm:$0x1] }
 0x1c1   : > { %v7432_v36 = vadd.f32 %v1603_v46, %v1109_v27  ;;  %v7434_v33 = vadd.f32 %v1692_v16, %v1198_v0  ;;  %v2333_v16 = vrot.slane %v2332_v53, 4  ;;  %v2347_v45 = vrot.slane %v2345_v51, 5 }
 0x1c2   : > { %v2352_v55 = vrot.slane %v2350_v28, 4  ;;  %v2355_v51 = vrot.slane %v2353_v44, 5 }
 0x1c3   : > { %v1695_v3 = vpop.f32.mrf.mxu1  ;;  %5950 = vmatmul.msk.bf16.gmra.mxu2 %vm684_vm3, %v6485_v31  ;;  %5966 = vmatmul.msk.bf16.gmra.mxu3 %vm684_vm3, %v6485_v31  ;;  %v1606_v50 = vpop.f32.mrf.mxu0  ;;  %v2338_v31 = vsel %vm6792_vm4, %v2333_v16, %v2337_v49 }
 0x1c4   : > { %v2645_v53 = vunpack.c.l.b16 %v2338_v31 }
 0x1c6   : > { %6047 = vmatmul.msk.bf16.gmra.mxu1 %vm684_vm3, %v2673_v20  ;;  %v1111_v34 = vpop.f32.mrf.mxu2  ;;  %v1200_v13 = vpop.f32.mrf.mxu3  ;;  %6031 = vmatmul.msk.bf16.gmra.mxu0 %vm684_vm3, %v2673_v20 }
 0x1c7   : > { %v1112_v46 = vadd.f32 %v1111_v34, %v7025_v62  ;;  %v1201_v41 = vadd.f32 %v1200_v13, %v7027_v63  ;;  %v2348_v62 = vsel %vm6792_vm4, %v2343_v42, %v2347_v45  ;;  %v2359_v63 = vshll.u32 %v5993_v54, 16  ;;  %v6486_v13 = vld [vmem:[%s6776_s24 + $0x30] sm:$0xff] }
 0x1c8   : > { %v2356_v45 = vor.u32 %v2355_v51, %v2352_v55 }
 0x1c9   : > { %v7444_v60 = vadd.f32 %v1606_v50, %v1112_v46  ;;  %v7446_v30 = vadd.f32 %v1695_v3, %v1201_v41  ;;  %v2646_v50 = vunpack.c.l.b16 %v2348_v62  ;;  %v2361_v46 = vrot.slane %v2359_v63, 5  ;;  %v8812_v63 = vld [vmem:[#allocation4_spill] sm:$0xff] }
 0x1ca   : > { %v2365_v41 = vrot.slane %v2363_v19, 4 }
 0x1cb   : > { %v1697_v27 = vpop.f32.mrf.mxu1  ;;  %v1608_v0 = vpop.f32.mrf.mxu0  ;;  %v2674_v42 = vpack.c.b16 %v2646_v50, %v2645_v53  ;;  %v5995_v53 = vld [vmem:[%s6776_s24 + $0x48] sm:$0xf]  ;;  %v5996_v50 = vld [vmem:[%s6776_s24 + $0x4c] sm:$0xf] }
 0x1cc   : > { %v2366_v28 = vor.u32 %v2365_v41, %v2361_v46  ;;  %v2374_v51 = vshrl.u32 %v5995_v53, 16 }
 0x1ce   : > { %v1113_v57 = vpop.f32.mrf.mxu2  ;;  %v1202_v20 = vpop.f32.mrf.mxu3 }
 0x1cf   : > { %v1114_v3 = vadd.f32 %v1113_v57, %v7038_v8  ;;  %v1203_v34 = vadd.f32 %v1202_v20, %v7040_v9  ;;  %v2369_v9 = vshll.u32 %v5994_v21, 16  ;;  %v2367_v57 = vrot.slane %v2366_v28, 4 }
 0x1d0   : > { %v2387_v28 = vshrl.u32 %v5996_v50, 16 }
 0x1d1   : > { %v7456_v49 = vadd.f32 %v1608_v0, %v1114_v3  ;;  %v7458_v16 = vadd.f32 %v1697_v27, %v1203_v34  ;;  %v2357_v27 = vrot.slane %v2356_v45, 4  ;;  %v8811_v0 = vld [vmem:[#allocation3_spill] sm:$0xff]  ;;  %v2371_v20 = vrot.slane %v2369_v9, 5 }
 0x1d2   : > { %v2377_v3 = vshll.u32 %v5995_v53, 16  ;;  %v2383_v45 = vshll.u32 %v5996_v50, 16 }
 0x1d3   : > { %8809 = vst [vmem:[#allocation29_spill] sm:$0xff] %v7456_v49  ;;  %v1700_v54 = vpop.f32.mrf.mxu1  ;;  %5951 = vmatmul.msk.bf16.gmra.mxu2 %vm684_vm3, %v6486_v13  ;;  %5967 = vmatmul.msk.bf16.gmra.mxu3 %vm684_vm3, %v6486_v13  ;;  %v1611_v8 = vpop.f32.mrf.mxu0  ;;  %v2362_v21 = vsel %vm6792_vm4, %v2357_v27, %v2361_v46  ;;  %v5997_v49 = vld [vmem:[%s6776_s24 + $0x50] sm:$0x1] }
 0x1d4   : > { %8810 = vst [vmem:[#allocation30_spill] sm:$0xff] %v7458_v16  ;;  %v2389_v16 = vrot.slane %v2387_v28, 4 }
 0x1d6   : > { %6048 = vmatmul.msk.bf16.gmra.mxu1 %vm684_vm3, %v2674_v42  ;;  %v1116_v44 = vpop.f32.mrf.mxu2  ;;  %v1205_v31 = vpop.f32.mrf.mxu3  ;;  %6032 = vmatmul.msk.bf16.gmra.mxu0 %vm684_vm3, %v2674_v42  ;;  %v2372_v42 = vsel %vm6792_vm4, %v2367_v57, %v2371_v20 }
 0x1d7   : > { %v1117_v62 = vadd.f32 %v1116_v44, %v8811_v0  ;;  %v1206_v19 = vadd.f32 %v1205_v31, %v8812_v63  ;;  %v2648_v31 = vunpack.c.l.b16 %v2372_v42  ;;  %v2376_v0 = vrot.slane %v2374_v51, 4  ;;  %v8815_v63 = vld [vmem:[#allocation5_spill] sm:$0xff] }
 0x1d9   : > { %v7468_v55 = vadd.f32 %v1611_v8, %v1117_v62  ;;  %v7470_v34 = vadd.f32 %v1700_v54, %v1206_v19  ;;  %v2647_v8 = vunpack.c.l.b16 %v2362_v21  ;;  %v2379_v62 = vrot.slane %v2377_v3, 5  ;;  %v8816_v19 = vld [vmem:[#allocation6_spill] sm:$0xff] }
 0x1da   : > { %v2393_v21 = vshll.u32 %v5997_v49, 16 }
 0x1db   : > { %8813 = vst [vmem:[#allocation3_spill] sm:$0xff] %v7468_v55  ;;  %v1702_v13 = vpop.f32.mrf.mxu1  ;;  %v1613_v41 = vpop.f32.mrf.mxu0  ;;  %v2385_v55 = vrot.slane %v2383_v45, 5  ;;  %v2675_v57 = vpack.c.b16 %v2648_v31, %v2647_v8  ;;  %v2380_v20 = vor.u32 %v2379_v62, %v2376_v0  ;;  %v5998_v0 = vld [vmem:[%s6776_s24 + $0x54] sm:$0xf]  ;;  %v5999_v62 = vld [vmem:[%s6776_s24 + $0x58] sm:$0xf] }
 0x1dc   : > { %8814 = vst [vmem:[#allocation4_spill] sm:$0xff] %v7470_v34  ;;  %v6487_v34 = vld [vmem:[%s6776_s24 + $0x3c] sm:$0xff]  ;;  %v2395_v31 = vrot.slane %v2393_v21, 5 }
 0x1dd   : > { %v2390_v3 = vor.u32 %v2389_v16, %v2385_v55  ;;  %v2401_v16 = vshll.u32 %v5998_v0, 16 }
 0x1de   : > { %v1118_v9 = vpop.f32.mrf.mxu2  ;;  %v1207_v44 = vpop.f32.mrf.mxu3 }
 0x1df   : > { %v1119_v54 = vadd.f32 %v1118_v9, %v8815_v63  ;;  %v1208_v53 = vadd.f32 %v1207_v44, %v8816_v19  ;;  %v8820_v9 = vld [vmem:[#allocation8_spill] sm:$0xff]  ;;  %v2391_v8 = vrot.slane %v2390_v3, 4  ;;  %v2411_v3 = vshrl.u32 %v5999_v62, 16 }
 0x1e1   : > { %v7480_v46 = vadd.f32 %v1613_v41, %v1119_v54  ;;  %v7482_v27 = vadd.f32 %v1702_v13, %v1208_v53  ;;  %v2381_v13 = vrot.slane %v2380_v20, 4  ;;  %v8819_v41 = vld [vmem:[#allocation7_spill] sm:$0xff]  ;;  %v2407_v20 = vshll.u32 %v5999_v62, 16 }
 0x1e3   : > { %8817 = vst [vmem:[#allocation5_spill] sm:$0xff] %v7480_v46  ;;  %v1705_v50 = vpop.f32.mrf.mxu1  ;;  %5952 = vmatmul.msk.bf16.gmra.mxu2 %vm684_vm3, %v6487_v34  ;;  %5968 = vmatmul.msk.bf16.gmra.mxu3 %vm684_vm3, %v6487_v34  ;;  %v1616_v51 = vpop.f32.mrf.mxu0  ;;  %v2398_v34 = vshrl.u32 %v5998_v0, 16  ;;  %v2386_v53 = vsel %vm6792_vm4, %v2381_v13, %v2385_v55  ;;  %v6000_v46 = vld [vmem:[%s6776_s24 + $0x5c] sm:$0x1] }
 0x1e4   : > { %8818 = vst [vmem:[#allocation6_spill] sm:$0xff] %v7482_v27  ;;  %v2413_v27 = vrot.slane %v2411_v3, 4 }
 0x1e6   : > { %6049 = vmatmul.msk.bf16.gmra.mxu1 %vm684_vm3, %v2675_v57  ;;  %v1121_v42 = vpop.f32.mrf.mxu2  ;;  %v1210_v45 = vpop.f32.mrf.mxu3  ;;  %6033 = vmatmul.msk.bf16.gmra.mxu0 %vm684_vm3, %v2675_v57  ;;  %v2396_v57 = vsel %vm6792_vm4, %v2391_v8, %v2395_v31 }
 0x1e7   : > { %v1122_v28 = vadd.f32 %v1121_v42, %v8819_v41  ;;  %v1211_v44 = vadd.f32 %v1210_v45, %v8820_v9  ;;  %v2650_v45 = vunpack.c.l.b16 %v2396_v57  ;;  %v2400_v41 = vrot.slane %v2398_v34, 4  ;;  %v8823_v9 = vld [vmem:[#allocation9_spill] sm:$0xff] }
 0x1e9   : > { %v7492_v63 = vadd.f32 %v1616_v51, %v1122_v28  ;;  %v7494_v49 = vadd.f32 %v1705_v50, %v1211_v44  ;;  %v2649_v51 = vunpack.c.l.b16 %v2386_v53  ;;  %v2403_v28 = vrot.slane %v2401_v16, 5  ;;  %v8824_v44 = vld [vmem:[#allocation10_spill] sm:$0xff] }
 0x1ea   : > { %v2417_v53 = vshll.u32 %v6000_v46, 16 }
 0x1eb   : > { %8821 = vst [vmem:[#allocation7_spill] sm:$0xff] %v7492_v63  ;;  %v1707_v54 = vpop.f32.mrf.mxu1  ;;  %v1618_v19 = vpop.f32.mrf.mxu0  ;;  %v2409_v63 = vrot.slane %v2407_v20, 5  ;;  %v2676_v8 = vpack.c.b16 %v2650_v45, %v2649_v51  ;;  %v2404_v31 = vor.u32 %v2403_v28, %v2400_v41  ;;  %v6001_v41 = vld [vmem:[%s6776_s24 + $0x60] sm:$0xf]  ;;  %v6002_v28 = vld [vmem:[%s6776_s24 + $0x64] sm:$0xf] }
 0x1ec   : > { %8822 = vst [vmem:[#allocation8_spill] sm:$0xff] %v7494_v49  ;;  %v6488_v49 = vld [vmem:[%s6776_s24 + $0x48] sm:$0xff]  ;;  %v2419_v45 = vrot.slane %v2417_v53, 5 }
 0x1ed   : > { %v2414_v16 = vor.u32 %v2413_v27, %v2409_v63  ;;  %v2425_v27 = vshll.u32 %v6001_v41, 16 }
 0x1ee   : > { %v1123_v21 = vpop.f32.mrf.mxu2  ;;  %v1212_v42 = vpop.f32.mrf.mxu3 }
 0x1ef   : > { %v1124_v50 = vadd.f32 %v1123_v21, %v8823_v9  ;;  %v1213_v0 = vadd.f32 %v1212_v42, %v8824_v44  ;;  %v8828_v21 = vld [vmem:[#allocation12_spill] sm:$0xff]  ;;  %v2415_v51 = vrot.slane %v2414_v16, 4  ;;  %v2435_v16 = vshrl.u32 %v6002_v28, 16 }
 0x1f1   : > { %v7504_v55 = vadd.f32 %v1618_v19, %v1124_v50  ;;  %v7506_v13 = vadd.f32 %v1707_v54, %v1213_v0  ;;  %v2405_v54 = vrot.slane %v2404_v31, 4  ;;  %v8827_v19 = vld [vmem:[#allocation11_spill] sm:$0xff]  ;;  %v2431_v31 = vshll.u32 %v6002_v28, 16 }
 0x1f3   : > { %8825 = vst [vmem:[#allocation9_spill] sm:$0xff] %v7504_v55  ;;  %v1710_v62 = vpop.f32.mrf.mxu1  ;;  %5953 = vmatmul.msk.bf16.gmra.mxu2 %vm684_vm3, %v6488_v49  ;;  %5969 = vmatmul.msk.bf16.gmra.mxu3 %vm684_vm3, %v6488_v49  ;;  %v1621_v34 = vpop.f32.mrf.mxu0  ;;  %v2422_v49 = vshrl.u32 %v6001_v41, 16  ;;  %v2410_v0 = vsel %vm6792_vm4, %v2405_v54, %v2409_v63  ;;  %v6003_v55 = vld [vmem:[%s6776_s24 + $0x68] sm:$0x1] }
 0x1f4   : > { %8826 = vst [vmem:[#allocation10_spill] sm:$0xff] %v7506_v13  ;;  %v2437_v13 = vrot.slane %v2435_v16, 4 }
 0x1f6   : > { %6050 = vmatmul.msk.bf16.gmra.mxu1 %vm684_vm3, %v2676_v8  ;;  %v1126_v57 = vpop.f32.mrf.mxu2  ;;  %v1215_v20 = vpop.f32.mrf.mxu3  ;;  %6034 = vmatmul.msk.bf16.gmra.mxu0 %vm684_vm3, %v2676_v8  ;;  %v2420_v8 = vsel %vm6792_vm4, %v2415_v51, %v2419_v45 }
 0x1f7   : > { %v1127_v3 = vadd.f32 %v1126_v57, %v8827_v19  ;;  %v1216_v42 = vadd.f32 %v1215_v20, %v8828_v21  ;;  %v2652_v20 = vunpack.c.l.b16 %v2420_v8  ;;  %v2424_v19 = vrot.slane %v2422_v49, 4  ;;  %v8831_v21 = vld [vmem:[#allocation13_spill] sm:$0xff] }
 0x1f9   : > { %v7516_v9 = vadd.f32 %v1621_v34, %v1127_v3  ;;  %v7518_v46 = vadd.f32 %v1710_v62, %v1216_v42  ;;  %v2651_v34 = vunpack.c.l.b16 %v2410_v0  ;;  %v2427_v3 = vrot.slane %v2425_v27, 5  ;;  %v8832_v42 = vld [vmem:[#allocation14_spill] sm:$0xff] }
 0x1fa   : > { %v2441_v0 = vshll.u32 %v6003_v55, 16 }
 0x1fb   : > { %8829 = vst [vmem:[#allocation11_spill] sm:$0xff] %v7516_v9  ;;  %v1712_v50 = vpop.f32.mrf.mxu1  ;;  %v1623_v44 = vpop.f32.mrf.mxu0  ;;  %v2433_v9 = vrot.slane %v2431_v31, 5  ;;  %v2677_v51 = vpack.c.b16 %v2652_v20, %v2651_v34  ;;  %v2428_v45 = vor.u32 %v2427_v3, %v2424_v19  ;;  %v6004_v19 = vld [vmem:[%s6776_s24 + $0x6c] sm:$0xf]  ;;  %v6005_v3 = vld [vmem:[%s6776_s24 + $0x70] sm:$0xf] }
 0x1fc   : > { %8830 = vst [vmem:[#allocation12_spill] sm:$0xff] %v7518_v46  ;;  %v6489_v46 = vld [vmem:[%s6776_s24 + $0x54] sm:$0xff]  ;;  %v2443_v20 = vrot.slane %v2441_v0, 5 }
 0x1fd   : > { %v2438_v27 = vor.u32 %v2437_v13, %v2433_v9  ;;  %v2449_v13 = vshll.u32 %v6004_v19, 16 }
 0x1fe   : > { %v1128_v53 = vpop.f32.mrf.mxu2  ;;  %v1217_v57 = vpop.f32.mrf.mxu3 }
 0x1ff   : > { %v1129_v62 = vadd.f32 %v1128_v53, %v8831_v21  ;;  %v1218_v41 = vadd.f32 %v1217_v57, %v8832_v42  ;;  %v8836_v53 = vld [vmem:[#allocation16_spill] sm:$0xff]  ;;  %v2439_v34 = vrot.slane %v2438_v27, 4  ;;  %v2459_v27 = vshrl.u32 %v6005_v3, 16 }
 0x201   : > { %v7528_v63 = vadd.f32 %v1623_v44, %v1129_v62  ;;  %v7530_v54 = vadd.f32 %v1712_v50, %v1218_v41  ;;  %v2429_v50 = vrot.slane %v2428_v45, 4  ;;  %v8835_v44 = vld [vmem:[#allocation15_spill] sm:$0xff]  ;;  %v2455_v45 = vshll.u32 %v6005_v3, 16 }
 0x203   : > { %8833 = vst [vmem:[#allocation13_spill] sm:$0xff] %v7528_v63  ;;  %v1715_v28 = vpop.f32.mrf.mxu1  ;;  %5954 = vmatmul.msk.bf16.gmra.mxu2 %vm684_vm3, %v6489_v46  ;;  %5970 = vmatmul.msk.bf16.gmra.mxu3 %vm684_vm3, %v6489_v46  ;;  %v1626_v49 = vpop.f32.mrf.mxu0  ;;  %v2446_v46 = vshrl.u32 %v6004_v19, 16  ;;  %v2434_v41 = vsel %vm6792_vm4, %v2429_v50, %v2433_v9  ;;  %v6006_v63 = vld [vmem:[%s6776_s24 + $0x74] sm:$0x1] }
 0x204   : > { %8834 = vst [vmem:[#allocation14_spill] sm:$0xff] %v7530_v54  ;;  %v2461_v54 = vrot.slane %v2459_v27, 4 }
 0x206   : > { %6051 = vmatmul.msk.bf16.gmra.mxu1 %vm684_vm3, %v2677_v51  ;;  %v1131_v8 = vpop.f32.mrf.mxu2  ;;  %v1220_v31 = vpop.f32.mrf.mxu3  ;;  %6035 = vmatmul.msk.bf16.gmra.mxu0 %vm684_vm3, %v2677_v51  ;;  %v2444_v51 = vsel %vm6792_vm4, %v2439_v34, %v2443_v20 }
 0x207   : > { %v1132_v16 = vadd.f32 %v1131_v8, %v8835_v44  ;;  %v1221_v57 = vadd.f32 %v1220_v31, %v8836_v53  ;;  %v2654_v31 = vunpack.c.l.b16 %v2444_v51  ;;  %v2448_v44 = vrot.slane %v2446_v46, 4  ;;  %v8839_v53 = vld [vmem:[#allocation17_spill] sm:$0xff] }
 0x209   : > { %v7540_v21 = vadd.f32 %v1626_v49, %v1132_v16  ;;  %v7542_v55 = vadd.f32 %v1715_v28, %v1221_v57  ;;  %v2653_v49 = vunpack.c.l.b16 %v2434_v41  ;;  %v2451_v16 = vrot.slane %v2449_v13, 5  ;;  %v8840_v57 = vld [vmem:[#allocation18_spill] sm:$0xff] }
 0x20a   : > { %v2465_v41 = vshll.u32 %v6006_v63, 16 }
 0x20b   : > { %8837 = vst [vmem:[#allocation15_spill] sm:$0xff] %v7540_v21  ;;  %v1717_v62 = vpop.f32.mrf.mxu1  ;;  %v1628_v42 = vpop.f32.mrf.mxu0  ;;  %v2457_v21 = vrot.slane %v2455_v45, 5  ;;  %v2678_v34 = vpack.c.b16 %v2654_v31, %v2653_v49  ;;  %v2452_v20 = vor.u32 %v2451_v16, %v2448_v44  ;;  %v6007_v44 = vld [vmem:[%s6776_s24 + $0x78] sm:$0xf]  ;;  %v6008_v16 = vld [vmem:[%s6776_s24 + $0x7c] sm:$0xf] }
 0x20c   : > { %8838 = vst [vmem:[#allocation16_spill] sm:$0xff] %v7542_v55  ;;  %v6490_v55 = vld [vmem:[%s6776_s24 + $0x60] sm:$0xff]  ;;  %v2467_v31 = vrot.slane %v2465_v41, 5 }
 0x20d   : > { %v2462_v13 = vor.u32 %v2461_v54, %v2457_v21  ;;  %v2473_v54 = vshll.u32 %v6007_v44, 16 }
 0x20e   : > { %v1133_v0 = vpop.f32.mrf.mxu2  ;;  %v1222_v8 = vpop.f32.mrf.mxu3 }
 0x20f   : > { %v1134_v28 = vadd.f32 %v1133_v0, %v8839_v53  ;;  %v1223_v19 = vadd.f32 %v1222_v8, %v8840_v57  ;;  %v8844_v0 = vld [vmem:[#allocation20_spill] sm:$0xff]  ;;  %v2463_v49 = vrot.slane %v2462_v13, 4  ;;  %v2483_v13 = vshrl.u32 %v6008_v16, 16 }
 0x211   : > { %v7552_v9 = vadd.f32 %v1628_v42, %v1134_v28  ;;  %v7554_v50 = vadd.f32 %v1717_v62, %v1223_v19  ;;  %v2453_v62 = vrot.slane %v2452_v20, 4  ;;  %v8843_v42 = vld [vmem:[#allocation19_spill] sm:$0xff]  ;;  %v2479_v20 = vshll.u32 %v6008_v16, 16 }
 0x213   : > { %8841 = vst [vmem:[#allocation17_spill] sm:$0xff] %v7552_v9  ;;  %v1720_v3 = vpop.f32.mrf.mxu1  ;;  %5955 = vmatmul.msk.bf16.gmra.mxu2 %vm684_vm3, %v6490_v55  ;;  %5971 = vmatmul.msk.bf16.gmra.mxu3 %vm684_vm3, %v6490_v55  ;;  %v1631_v46 = vpop.f32.mrf.mxu0  ;;  %v2470_v55 = vshrl.u32 %v6007_v44, 16  ;;  %v2458_v19 = vsel %vm6792_vm4, %v2453_v62, %v2457_v21  ;;  %v6009_v9 = vld [vmem:[%s6776_s24 + $0x80] sm:$0x1] }
 0x214   : > { %8842 = vst [vmem:[#allocation18_spill] sm:$0xff] %v7554_v50  ;;  %v2485_v50 = vrot.slane %v2483_v13, 4 }
 0x216   : > { %6052 = vmatmul.msk.bf16.gmra.mxu1 %vm684_vm3, %v2678_v34  ;;  %v1136_v51 = vpop.f32.mrf.mxu2  ;;  %v1225_v45 = vpop.f32.mrf.mxu3  ;;  %6036 = vmatmul.msk.bf16.gmra.mxu0 %vm684_vm3, %v2678_v34  ;;  %v2468_v34 = vsel %vm6792_vm4, %v2463_v49, %v2467_v31 }
 0x217   : > { %v1137_v27 = vadd.f32 %v1136_v51, %v8843_v42  ;;  %v1226_v8 = vadd.f32 %v1225_v45, %v8844_v0  ;;  %v2656_v45 = vunpack.c.l.b16 %v2468_v34  ;;  %v2472_v42 = vrot.slane %v2470_v55, 4  ;;  %v8847_v0 = vld [vmem:[#allocation21_spill] sm:$0xff] }
 0x219   : > { %v7564_v53 = vadd.f32 %v1631_v46, %v1137_v27  ;;  %v7566_v63 = vadd.f32 %v1720_v3, %v1226_v8  ;;  %v2655_v46 = vunpack.c.l.b16 %v2458_v19  ;;  %v2475_v27 = vrot.slane %v2473_v54, 5  ;;  %v8848_v8 = vld [vmem:[#allocation22_spill] sm:$0xff] }
 0x21a   : > { %v2489_v19 = vshll.u32 %v6009_v9, 16 }
 0x21b   : > { %8845 = vst [vmem:[#allocation19_spill] sm:$0xff] %v7564_v53  ;;  %v1722_v28 = vpop.f32.mrf.mxu1  ;;  %v1633_v57 = vpop.f32.mrf.mxu0  ;;  %v2481_v53 = vrot.slane %v2479_v20, 5  ;;  %v2679_v49 = vpack.c.b16 %v2656_v45, %v2655_v46  ;;  %v2476_v31 = vor.u32 %v2475_v27, %v2472_v42  ;;  %v6010_v46 = vld [vmem:[%s6776_s24 + $0x84] sm:$0xf]  ;;  %v6011_v45 = vld [vmem:[%s6776_s24 + $0x88] sm:$0xf] }
 0x21c   : > { %8846 = vst [vmem:[#allocation20_spill] sm:$0xff] %v7566_v63  ;;  %v6491_v63 = vld [vmem:[%s6776_s24 + $0x6c] sm:$0xff] }
 0x21d   : > { %v2486_v54 = vor.u32 %v2485_v50, %v2481_v53  ;;  %v2497_v50 = vshll.u32 %v6010_v46, 16 }
 0x21e   : > { %v1138_v41 = vpop.f32.mrf.mxu2  ;;  %v1227_v51 = vpop.f32.mrf.mxu3 }
 0x21f   : > { %v1139_v3 = vadd.f32 %v1138_v41, %v8847_v0  ;;  %v1228_v44 = vadd.f32 %v1227_v51, %v8848_v8  ;;  %v2487_v41 = vrot.slane %v2486_v54, 4  ;;  %v2491_v51 = vrot.slane %v2489_v19, 5 }
 0x220   : > { %v2507_v8 = vshrl.u32 %v6011_v45, 16  ;;  %v2499_v19 = vrot.slane %v2497_v50, 5 }
 0x221   : > { %v7576_v21 = vadd.f32 %v1633_v57, %v1139_v3  ;;  %v7578_v62 = vadd.f32 %v1722_v28, %v1228_v44  ;;  %v2477_v28 = vrot.slane %v2476_v31, 4 }
 0x223   : > { %v2841_v16 = vpop.f32.mrf.mxu1  ;;  %5956 = vmatmul.msk.bf16.gmra.mxu2 %vm684_vm3, %v6491_v63  ;;  %5972 = vmatmul.msk.bf16.gmra.mxu3 %vm684_vm3, %v6491_v63  ;;  %v2752_v55 = vpop.f32.mrf.mxu0  ;;  %v2494_v63 = vshrl.u32 %v6010_v46, 16  ;;  %v2482_v3 = vsel %vm6792_vm4, %v2477_v28, %v2481_v53  ;;  %v6012_v46 = vld [vmem:[%s6776_s24 + $0x8c] sm:$0x1] }
 0x224   : > { %v2657_v31 = vunpack.c.l.b16 %v2482_v3 }
 0x225   : > { %v2496_v54 = vrot.slane %v2494_v63, 4 }
 0x226   : > { %6053 = vmatmul.msk.bf16.gmra.mxu1 %vm684_vm3, %v2679_v49  ;;  %v1972_v34 = vpop.f32.mrf.mxu2  ;;  %v2061_v20 = vpop.f32.mrf.mxu3  ;;  %6037 = vmatmul.msk.bf16.gmra.mxu0 %vm684_vm3, %v2679_v49 }
 0x227   : > { %v2141_v57 = vadd.f32 %v1972_v34, %v7192_v12  ;;  %v2142_v13 = vadd.f32 %v2061_v20, %v7194_v11  ;;  %v2492_v11 = vsel %vm6792_vm4, %v2487_v41, %v2491_v51  ;;  %v2503_v12 = vshll.u32 %v6011_v45, 16  ;;  %v6492_v20 = vld [vmem:[%s6776_s24 + $0x78] sm:$0xff] }
 0x228   : > { %v2500_v51 = vor.u32 %v2499_v19, %v2496_v54 }
 0x229   : > { %v7588_v42 = vadd.f32 %v2752_v55, %v2141_v57  ;;  %v7590_v9 = vadd.f32 %v2841_v16, %v2142_v13  ;;  %v2658_v55 = vunpack.c.l.b16 %v2492_v11  ;;  %v2505_v57 = vrot.slane %v2503_v12, 5 }
 0x22a   : > { %v2509_v13 = vrot.slane %v2507_v8, 4 }
 0x22b   : > { %v2843_v27 = vpop.f32.mrf.mxu1  ;;  %v2754_v0 = vpop.f32.mrf.mxu0  ;;  %v2680_v41 = vpack.c.b16 %v2658_v55, %v2657_v31 }
 0x22c   : > { %v2510_v63 = vor.u32 %v2509_v13, %v2505_v57 }
 0x22e   : > { %v1974_v44 = vpop.f32.mrf.mxu2  ;;  %v2063_v49 = vpop.f32.mrf.mxu3  ;;  %v2511_v12 = vrot.slane %v2510_v63, 4 }
 0x22f   : > { %v2143_v16 = vadd.f32 %v1974_v44, %v7204_v52  ;;  %v2144_v34 = vadd.f32 %v2063_v49, %v7206_v48  ;;  %v2513_v48 = vshll.u32 %v6012_v46, 16  ;;  %v6013_v44 = vld [vmem:[%s6776_s24 + $0x90] sm:$0xf]  ;;  %v6014_v49 = vld [vmem:[%s6776_s24 + $0x94] sm:$0xf] }
 0x230   : > { %v2518_v55 = vshrl.u32 %v6013_v44, 16  ;;  %v2521_v54 = vshll.u32 %v6013_v44, 16  ;;  %v2531_v13 = vshrl.u32 %v6014_v49, 16  ;;  %v6015_v44 = vld [vmem:[%s6776_s24 + $0x98] sm:$0x1] }
 0x231   : > { %v7600_v53 = vadd.f32 %v2754_v0, %v2143_v16  ;;  %v7602_v28 = vadd.f32 %v2843_v27, %v2144_v34  ;;  %v2501_v27 = vrot.slane %v2500_v51, 4  ;;  %v2515_v8 = vrot.slane %v2513_v48, 5 }
 0x232   : > { %v2520_v63 = vrot.slane %v2518_v55, 4  ;;  %v2523_v48 = vrot.slane %v2521_v54, 5 }
 0x233   : > { %v2846_v45 = vpop.f32.mrf.mxu1  ;;  %5957 = vmatmul.msk.bf16.gmra.mxu2 %vm684_vm3, %v6492_v20  ;;  %5973 = vmatmul.msk.bf16.gmra.mxu3 %vm684_vm3, %v6492_v20  ;;  %v2757_v52 = vpop.f32.mrf.mxu0  ;;  %v2506_v20 = vsel %vm6792_vm4, %v2501_v27, %v2505_v57 }
 0x234   : > { %v2659_v51 = vunpack.c.l.b16 %v2506_v20 }
 0x236   : > { %6054 = vmatmul.msk.bf16.gmra.mxu1 %vm684_vm3, %v2680_v41  ;;  %v1977_v50 = vpop.f32.mrf.mxu2  ;;  %v2066_v3 = vpop.f32.mrf.mxu3  ;;  %6038 = vmatmul.msk.bf16.gmra.mxu0 %vm684_vm3, %v2680_v41 }
 0x237   : > { %v2145_v0 = vadd.f32 %v1977_v50, %v7216_v23  ;;  %v2146_v11 = vadd.f32 %v2066_v3, %v7218_v22  ;;  %v2516_v23 = vsel %vm6792_vm4, %v2511_v12, %v2515_v8  ;;  %v2527_v22 = vshll.u32 %v6014_v49, 16  ;;  %v6493_v3 = vld [vmem:[%s6776_s24 + $0x84] sm:$0xff] }
 0x238   : > { %v2524_v8 = vor.u32 %v2523_v48, %v2520_v63 }
 0x239   : > { %v7612_v31 = vadd.f32 %v2757_v52, %v2145_v0  ;;  %v7614_v19 = vadd.f32 %v2846_v45, %v2146_v11  ;;  %v2660_v52 = vunpack.c.l.b16 %v2516_v23  ;;  %v2529_v0 = vrot.slane %v2527_v22, 5 }
 0x23a   : > { %v2533_v11 = vrot.slane %v2531_v13, 4 }
 0x23b   : > { %v2848_v16 = vpop.f32.mrf.mxu1  ;;  %v2759_v34 = vpop.f32.mrf.mxu0  ;;  %v2681_v12 = vpack.c.b16 %v2660_v52, %v2659_v51 }
 0x23c   : > { %v2534_v55 = vor.u32 %v2533_v11, %v2529_v0 }
 0x23e   : > { %v1979_v46 = vpop.f32.mrf.mxu2  ;;  %v2068_v41 = vpop.f32.mrf.mxu3  ;;  %v2535_v22 = vrot.slane %v2534_v55, 4 }
 0x23f   : > { %v2147_v45 = vadd.f32 %v1979_v46, %v7228_v1  ;;  %v2148_v50 = vadd.f32 %v2068_v41, %v7230_v15  ;;  %v2537_v15 = vshll.u32 %v6015_v44, 16  ;;  %v6016_v46 = vld [vmem:[%s6776_s24 + $0x9c] sm:$0xf]  ;;  %v6017_v41 = vld [vmem:[%s6776_s24 + $0xa0] sm:$0xf] }
 0x240   : > { %v2542_v52 = vshrl.u32 %v6016_v46, 16  ;;  %v2545_v63 = vshll.u32 %v6016_v46, 16  ;;  %v2555_v11 = vshrl.u32 %v6017_v41, 16  ;;  %v6018_v46 = vld [vmem:[%s6776_s24 + $0xa4] sm:$0x1] }
 0x241   : > { %v7624_v57 = vadd.f32 %v2759_v34, %v2147_v45  ;;  %v7626_v27 = vadd.f32 %v2848_v16, %v2148_v50  ;;  %v2525_v16 = vrot.slane %v2524_v8, 4  ;;  %v2539_v13 = vrot.slane %v2537_v15, 5 }
 0x242   : > { %v2544_v55 = vrot.slane %v2542_v52, 4  ;;  %v2547_v15 = vrot.slane %v2545_v63, 5 }
 0x243   : > { %v2851_v49 = vpop.f32.mrf.mxu1  ;;  %5958 = vmatmul.msk.bf16.gmra.mxu2 %vm684_vm3, %v6493_v3  ;;  %5974 = vmatmul.msk.bf16.gmra.mxu3 %vm684_vm3, %v6493_v3  ;;  %v2762_v1 = vpop.f32.mrf.mxu0  ;;  %v2530_v3 = vsel %vm6792_vm4, %v2525_v16, %v2529_v0 }
 0x244   : > { %v2661_v8 = vunpack.c.l.b16 %v2530_v3 }
 0x246   : > { %6055 = vmatmul.msk.bf16.gmra.mxu1 %vm684_vm3, %v2681_v12  ;;  %v1982_v54 = vpop.f32.mrf.mxu2  ;;  %v2071_v20 = vpop.f32.mrf.mxu3  ;;  %6039 = vmatmul.msk.bf16.gmra.mxu0 %vm684_vm3, %v2681_v12 }
 0x247   : > { %v2149_v34 = vadd.f32 %v1982_v54, %v7240_v25  ;;  %v2150_v23 = vadd.f32 %v2071_v20, %v7242_v40  ;;  %v2540_v25 = vsel %vm6792_vm4, %v2535_v22, %v2539_v13  ;;  %v2551_v40 = vshll.u32 %v6017_v41, 16  ;;  %v6494_v20 = vld [vmem:[%s6776_s24 + $0x90] sm:$0xff] }
 0x248   : > { %v2548_v13 = vor.u32 %v2547_v15, %v2544_v55 }
 0x249   : > { %v7636_v51 = vadd.f32 %v2762_v1, %v2149_v34  ;;  %v7638_v48 = vadd.f32 %v2851_v49, %v2150_v23  ;;  %v2662_v1 = vunpack.c.l.b16 %v2540_v25  ;;  %v2553_v34 = vrot.slane %v2551_v40, 5 }
 0x24a   : > { %v2557_v23 = vrot.slane %v2555_v11, 4 }
 0x24b   : > { %v2853_v45 = vpop.f32.mrf.mxu1  ;;  %v2764_v50 = vpop.f32.mrf.mxu0  ;;  %v2682_v22 = vpack.c.b16 %v2662_v1, %v2661_v8 }
 0x24c   : > { %v2558_v52 = vor.u32 %v2557_v23, %v2553_v34 }
 0x24e   : > { %v1984_v44 = vpop.f32.mrf.mxu2  ;;  %v2073_v12 = vpop.f32.mrf.mxu3  ;;  %v2559_v40 = vrot.slane %v2558_v52, 4 }
 0x24f   : > { %v2151_v49 = vadd.f32 %v1984_v44, %v7252_v43  ;;  %v2152_v54 = vadd.f32 %v2073_v12, %v7254_v37  ;;  %v2561_v37 = vshll.u32 %v6018_v46, 16  ;;  %v6019_v44 = vld [vmem:[%s6776_s24 + $0xa8] sm:$0xf]  ;;  %v6020_v12 = vld [vmem:[%s6776_s24 + $0xac] sm:$0xf] }
 0x250   : > { %v2566_v1 = vshrl.u32 %v6019_v44, 16  ;;  %v2569_v55 = vshll.u32 %v6019_v44, 16  ;;  %v2579_v23 = vshrl.u32 %v6020_v12, 16  ;;  %v6021_v44 = vld [vmem:[%s6776_s24 + $0xb0] sm:$0x1] }
 0x251   : > { %v7648_v0 = vadd.f32 %v2764_v50, %v2151_v49  ;;  %v7650_v16 = vadd.f32 %v2853_v45, %v2152_v54  ;;  %v2549_v45 = vrot.slane %v2548_v13, 4  ;;  %v2563_v11 = vrot.slane %v2561_v37, 5 }
 0x252   : > { %v2568_v52 = vrot.slane %v2566_v1, 4  ;;  %v2571_v37 = vrot.slane %v2569_v55, 5 }
 0x253   : > { %v2856_v41 = vpop.f32.mrf.mxu1  ;;  %5959 = vmatmul.msk.bf16.gmra.mxu2 %vm684_vm3, %v6494_v20  ;;  %5975 = vmatmul.msk.bf16.gmra.mxu3 %vm684_vm3, %v6494_v20  ;;  %v2767_v43 = vpop.f32.mrf.mxu0  ;;  %v2554_v20 = vsel %vm6792_vm4, %v2549_v45, %v2553_v34 }
 0x254   : > { %v2663_v13 = vunpack.c.l.b16 %v2554_v20 }
 0x256   : > { %6056 = vmatmul.msk.bf16.gmra.mxu1 %vm684_vm3, %v2682_v22  ;;  %v1987_v63 = vpop.f32.mrf.mxu2  ;;  %v2076_v3 = vpop.f32.mrf.mxu3  ;;  %6040 = vmatmul.msk.bf16.gmra.mxu0 %vm684_vm3, %v2682_v22 }
 0x257   : > { %v2153_v50 = vadd.f32 %v1987_v63, %v7264_v47  ;;  %v2154_v25 = vadd.f32 %v2076_v3, %v7266_v38  ;;  %v2564_v47 = vsel %vm6792_vm4, %v2559_v40, %v2563_v11  ;;  %v2575_v38 = vshll.u32 %v6020_v12, 16  ;;  %v6495_v3 = vld [vmem:[%s6776_s24 + $0x9c] sm:$0xff] }
 0x258   : > { %v2572_v11 = vor.u32 %v2571_v37, %v2568_v52 }
 0x259   : > { %v7660_v8 = vadd.f32 %v2767_v43, %v2153_v50  ;;  %v7662_v15 = vadd.f32 %v2856_v41, %v2154_v25  ;;  %v2664_v43 = vunpack.c.l.b16 %v2564_v47  ;;  %v2577_v50 = vrot.slane %v2575_v38, 5 }
 0x25a   : > { %v2581_v25 = vrot.slane %v2579_v23, 4 }
 0x25b   : > { %v2858_v49 = vpop.f32.mrf.mxu1  ;;  %v2769_v54 = vpop.f32.mrf.mxu0  ;;  %v2683_v40 = vpack.c.b16 %v2664_v43, %v2663_v13 }
 0x25c   : > { %v2582_v1 = vor.u32 %v2581_v25, %v2577_v50 }
 0x25e   : > { %v1989_v46 = vpop.f32.mrf.mxu2  ;;  %v2078_v22 = vpop.f32.mrf.mxu3  ;;  %v2583_v38 = vrot.slane %v2582_v1, 4 }
 0x25f   : > { %v2155_v41 = vadd.f32 %v1989_v46, %v7276_v10  ;;  %v2156_v63 = vadd.f32 %v2078_v22, %v7278_v58  ;;  %v2585_v58 = vshll.u32 %v6021_v44, 16  ;;  %v6022_v46 = vld [vmem:[%s6776_s24 + $0xb4] sm:$0xf]  ;;  %v6023_v22 = vld [vmem:[%s6776_s24 + $0xb8] sm:$0xf] }
 0x260   : > { %v2590_v43 = vshrl.u32 %v6022_v46, 16  ;;  %v2593_v52 = vshll.u32 %v6022_v46, 16  ;;  %v2603_v25 = vshrl.u32 %v6023_v22, 16  ;;  %v6024_v46 = vld [vmem:[%s6776_s24 + $0xbc] sm:$0x1] }
 0x261   : > { %v7672_v34 = vadd.f32 %v2769_v54, %v2155_v41  ;;  %v7674_v45 = vadd.f32 %v2858_v49, %v2156_v63  ;;  %v2573_v49 = vrot.slane %v2572_v11, 4  ;;  %v2587_v23 = vrot.slane %v2585_v58, 5 }
 0x262   : > { %v2592_v1 = vrot.slane %v2590_v43, 4  ;;  %v2595_v58 = vrot.slane %v2593_v52, 5 }
 0x263   : > { %v2861_v12 = vpop.f32.mrf.mxu1  ;;  %5960 = vmatmul.msk.bf16.gmra.mxu2 %vm684_vm3, %v6495_v3  ;;  %5976 = vmatmul.msk.bf16.gmra.mxu3 %vm684_vm3, %v6495_v3  ;;  %v2772_v10 = vpop.f32.mrf.mxu0  ;;  %v2578_v3 = vsel %vm6792_vm4, %v2573_v49, %v2577_v50 }
 0x264   : > { %v2665_v11 = vunpack.c.l.b16 %v2578_v3 }
 0x266   : > { %6057 = vmatmul.msk.bf16.gmra.mxu1 %vm684_vm3, %v2683_v40  ;;  %v1992_v55 = vpop.f32.mrf.mxu2  ;;  %v2081_v20 = vpop.f32.mrf.mxu3  ;;  %6041 = vmatmul.msk.bf16.gmra.mxu0 %vm684_vm3, %v2683_v40 }
 0x267   : > { %v2157_v54 = vadd.f32 %v1992_v55, %v7288_v5  ;;  %v2158_v47 = vadd.f32 %v2081_v20, %v7290_v26  ;;  %v2588_v5 = vsel %vm6792_vm4, %v2583_v38, %v2587_v23  ;;  %v2599_v26 = vshll.u32 %v6023_v22, 16  ;;  %v6496_v20 = vld [vmem:[%s6776_s24 + $0xa8] sm:$0xff] }
 0x268   : > { %v2596_v23 = vor.u32 %v2595_v58, %v2592_v1 }
 0x269   : > { %v7684_v13 = vadd.f32 %v2772_v10, %v2157_v54  ;;  %v7686_v37 = vadd.f32 %v2861_v12, %v2158_v47  ;;  %v2666_v10 = vunpack.c.l.b16 %v2588_v5  ;;  %v2601_v54 = vrot.slane %v2599_v26, 5  ;;  %v8852_v26 = vld [vmem:[#allocation24_spill] sm:$0xff] }
 0x26a   : > { %v2605_v47 = vrot.slane %v2603_v25, 4 }
 0x26b   : > { %v2863_v41 = vpop.f32.mrf.mxu1  ;;  %v2774_v63 = vpop.f32.mrf.mxu0  ;;  %v2684_v38 = vpack.c.b16 %v2666_v10, %v2665_v11  ;;  %v6025_v11 = vld [vmem:[%s6776_s24 + $0xc0] sm:$0xf]  ;;  %v6026_v10 = vld [vmem:[%s6776_s24 + $0xc4] sm:$0xf] }
 0x26c   : > { %v2606_v43 = vor.u32 %v2605_v47, %v2601_v54 }
 0x26e   : > { %v1994_v44 = vpop.f32.mrf.mxu2  ;;  %v2083_v40 = vpop.f32.mrf.mxu3 }
 0x26f   : > { %v2159_v12 = vadd.f32 %v1994_v44, %v7300_v61  ;;  %v2160_v55 = vadd.f32 %v2083_v40, %v7302_v18  ;;  %v2609_v18 = vshll.u32 %v6024_v46, 16  ;;  %v2607_v44 = vrot.slane %v2606_v43, 4 }
 0x270   : > { %v2627_v43 = vshrl.u32 %v6026_v10, 16 }
 0x271   : > { %v7696_v50 = vadd.f32 %v2774_v63, %v2159_v12  ;;  %v7698_v49 = vadd.f32 %v2863_v41, %v2160_v55  ;;  %v2597_v41 = vrot.slane %v2596_v23, 4  ;;  %v8851_v63 = vld [vmem:[#allocation23_spill] sm:$0xff]  ;;  %v2611_v40 = vrot.slane %v2609_v18, 5 }
 0x272   : > { %v2614_v12 = vshrl.u32 %v6025_v11, 16  ;;  %v2617_v55 = vshll.u32 %v6025_v11, 16  ;;  %v2623_v23 = vshll.u32 %v6026_v10, 16 }
 0x273   : > { %8849 = vst [vmem:[#allocation21_spill] sm:$0xff] %v7696_v50  ;;  %v2866_v22 = vpop.f32.mrf.mxu1  ;;  %5961 = vmatmul.msk.bf16.gmra.mxu2 %vm684_vm3, %v6496_v20  ;;  %5977 = vmatmul.msk.bf16.gmra.mxu3 %vm684_vm3, %v6496_v20  ;;  %v2777_v61 = vpop.f32.mrf.mxu0  ;;  %v2602_v46 = vsel %vm6792_vm4, %v2597_v41, %v2601_v54  ;;  %v6027_v50 = vld [vmem:[%s6776_s24 + $0xc8] sm:$0x1] }
 0x274   : > { %8850 = vst [vmem:[#allocation22_spill] sm:$0xff] %v7698_v49  ;;  %v2629_v49 = vrot.slane %v2627_v43, 4  ;;  %v8857_v43 = vld [vmem:[#allocation27_spill] sm:$0xff] }
 0x276   : > { %6058 = vmatmul.msk.bf16.gmra.mxu1 %vm684_vm3, %v2684_v38  ;;  %v1997_v52 = vpop.f32.mrf.mxu2  ;;  %v2086_v3 = vpop.f32.mrf.mxu3  ;;  %6042 = vmatmul.msk.bf16.gmra.mxu0 %vm684_vm3, %v2684_v38  ;;  %v2612_v38 = vsel %vm6792_vm4, %v2607_v44, %v2611_v40 }
 0x277   : > { %v2161_v5 = vadd.f32 %v1997_v52, %v8851_v63  ;;  %v2162_v25 = vadd.f32 %v2086_v3, %v8852_v26  ;;  %v2668_v3 = vunpack.c.l.b16 %v2612_v38  ;;  %v2619_v63 = vrot.slane %v2617_v55, 5 }
 0x279   : > { %v7708_v1 = vadd.f32 %v2777_v61, %v2161_v5  ;;  %v7710_v58 = vadd.f32 %v2866_v22, %v2162_v25  ;;  %v2667_v61 = vunpack.c.l.b16 %v2602_v46  ;;  %v2616_v22 = vrot.slane %v2614_v12, 4  ;;  %v8855_v5 = vld [vmem:[#allocation25_spill] sm:$0xff]  ;;  %v8856_v25 = vld [vmem:[#allocation26_spill] sm:$0xff] }
 0x27a   : > { %v2633_v46 = vshll.u32 %v6027_v50, 16 }
 0x27b   : > { %8853 = vst [vmem:[#allocation23_spill] sm:$0xff] %v7708_v1  ;;  %v2868_v20 = vpop.f32.mrf.mxu1  ;;  %v2779_v47 = vpop.f32.mrf.mxu0  ;;  %v2625_v1 = vrot.slane %v2623_v23, 5  ;;  %v2685_v44 = vpack.c.b16 %v2668_v3, %v2667_v61  ;;  %v2620_v40 = vor.u32 %v2619_v63, %v2616_v22 }
 0x27c   : > { %8854 = vst [vmem:[#allocation24_spill] sm:$0xff] %v7710_v58  ;;  %v6497_v58 = vld [vmem:[%s6776_s24 + $0xb4] sm:$0xff]  ;;  %v2635_v3 = vrot.slane %v2633_v46, 5 }
 0x27d   : > { %v2630_v55 = vor.u32 %v2629_v49, %v2625_v1 }
 0x27e   : > { %v1999_v18 = vpop.f32.mrf.mxu2  ;;  %v2088_v52 = vpop.f32.mrf.mxu3 }
 0x27f   : > { %v2163_v26 = vadd.f32 %v1999_v18, %v8855_v5  ;;  %v2164_v11 = vadd.f32 %v2088_v52, %v8856_v25  ;;  %v8858_v52 = vld [vmem:[#allocation28_spill] sm:$0xff]  ;;  %v6432_v25 = vld [vmem:[%s8773_s1 + $0x20] sm:$0xf] }
 0x281   : > { %v7720_v54 = vadd.f32 %v2779_v47, %v2163_v26  ;;  %v7722_v41 = vadd.f32 %v2868_v20, %v2164_v11  ;;  %v2621_v47 = vrot.slane %v2620_v40, 4  ;;  %v6335_v20 = vld [vmem:[%s8773_s1 + $0x1c] sm:$0xf]  ;;  %v6062_v11 = vld [vmem:[%s6776_s24 + $0x10] sm:$0xf] }
 0x282   : > { %4440 = vst [vmem:[#allocation1] ss:$4 sm:$0xff] %v6335_v20  ;;  %v3083_v20 = vrot.slane %v6062_v11, 5 }
 0x283   : > { %v2871_v10 = vpop.f32.mrf.mxu1  ;;  %5962 = vmatmul.msk.bf16.gmra.mxu2 %vm684_vm3, %v6497_v58  ;;  %5978 = vmatmul.msk.bf16.gmra.mxu3 %vm684_vm3, %v6497_v58  ;;  %v2782_v12 = vpop.f32.mrf.mxu0  ;;  %v2631_v58 = vrot.slane %v2630_v55, 4  ;;  %v2626_v5 = vsel %vm6792_vm4, %v2621_v47, %v2625_v1 }
 0x285   : > { %v2636_v26 = vsel %vm6792_vm4, %v2631_v58, %v2635_v3 }
 0x286   : > { %6059 = vmatmul.msk.bf16.gmra.mxu1 %vm684_vm3, %v2685_v44  ;;  %v2002_v38 = vpop.f32.mrf.mxu2  ;;  %v2091_v23 = vpop.f32.mrf.mxu3  ;;  %6043 = vmatmul.msk.bf16.gmra.mxu0 %vm684_vm3, %v2685_v44 }
 0x287   : > { %v2165_v18 = vadd.f32 %v2002_v38, %v8857_v43  ;;  %v2166_v61 = vadd.f32 %v2091_v23, %v8858_v52  ;;  %v6498_v23 = vld [vmem:[%s6776_s24 + $0xc0] sm:$0xff]  ;;  %v6063_v52 = vld [vmem:[%s6776_s24 + $0x14] sm:$0x1] }
 0x289   : > { %v7733_v50 = vadd.f32 %v2782_v12, %v2165_v18  ;;  %v7735_v49 = vadd.f32 %v2871_v10, %v2166_v61  ;;  %v2669_v12 = vunpack.c.l.b16 %v2626_v5  ;;  %v2670_v10 = vunpack.c.l.b16 %v2636_v26  ;;  %v4441_v55 = vld.sshfl [vmem:[#allocation1] sm:$0xff pattern:$0x73625140]  ;;  %v4442_v46 = vld.sshfl [vmem:[#allocation1 + $0x8] sm:$0xff pattern:$0x73625140] }
 0x28a   : > { %v4493_v47 = vsel %vm733_vm0, %v4442_v46, 0  ;;  %4996 = vst [vmem:[#allocation1] ss:$4 sm:$0xff] %v6432_v25  ;;  %v6061_v18 = vld [vmem:[%s6776_s24 + $0xc] sm:$0xe]  ;;  %v3085_v26 = vrot.slane %v3083_v20, 4 }
 0x28b   : > { %v2873_v22 = vpop.f32.mrf.mxu1  ;;  %v2784_v63 = vpop.f32.mrf.mxu0  ;;  %4591 = vmatpush.bf16.msra.mxu3 %v4493_v47  ;;  %v2686_v58 = vpack.c.b16 %v2670_v10, %v2669_v12  ;;  %v6109_v5 = vrot.slane %v6061_v18, 9  ;;  %v3086_v25 = vrot.slane %v6063_v52, 5 }
 0x28d   : > { %v3087_v46 = vsel %vm6949_vm7, %v3085_v26, %v3086_v25 }
 0x28e   : > { %v2004_v44 = vpop.f32.mrf.mxu2  ;;  %v2093_v40 = vpop.f32.mrf.mxu3 }
 0x28f   : > { %v2167_v38 = vadd.f32 %v2004_v44, %v7357_v4  ;;  %v2168_v1 = vadd.f32 %v2093_v40, %v7359_v6  ;;  %v4491_v6 = vsel %vm733_vm0, %v4441_v55, 0  ;;  %v3084_v55 = vsel %vm6949_vm7, %v6109_v5, %v3083_v20 }
 0x290   : > { %4502 = vmatpush.bf16.msra.mxu2 %v4491_v6 }
 0x291   : > { %v7749_v43 = vadd.f32 %v2784_v63, %v2167_v38  ;;  %v7753_v61 = vadd.f32 %v2873_v22, %v2168_v1  ;;  %v4998_v22 = vld.sshfl [vmem:[#allocation1 + $0x8] sm:$0xff pattern:$0x73625140]  ;;  %v4997_v18 = vld.sshfl [vmem:[#allocation1] sm:$0xff pattern:$0x73625140] }
 0x292   : > { %v5049_v12 = vsel %vm733_vm0, %v4998_v22, 0  ;;  %v5047_v52 = vsel %vm733_vm0, %v4997_v18, 0 }
 0x293   : > { %v2876_v3 = vpop.f32.mrf.mxu1  ;;  %5963 = vmatmul.msk.bf16.gmra.mxu2 %vm684_vm3, %v6498_v23  ;;  %5979 = vmatmul.msk.bf16.gmra.mxu3 %vm684_vm3, %v6498_v23  ;;  %v2787_v4 = vpop.f32.mrf.mxu0 }
 0x294   : > { %5147 = vmatpush.bf16.msra.mxu1 %v5049_v12  ;;  %5058 = vmatpush.bf16.msra.mxu0 %v5047_v52 }
 0x296   : > { %6060 = vmatmul.msk.bf16.gmra.mxu1 %vm684_vm3, %v2686_v58  ;;  %v2007_v63 = vpop.f32.mrf.mxu2  ;;  %v2096_v11 = vpop.f32.mrf.mxu3  ;;  %6044 = vmatmul.msk.bf16.gmra.mxu0 %vm684_vm3, %v2686_v58  ;;  %v6065_v58 = vld [vmem:[%s6776_s24 + $0x1c] sm:$0xf] }
 0x297   : > { %v2169_v44 = vadd.f32 %v2007_v63, %v7371_v7  ;;  %v2170_v40 = vadd.f32 %v2096_v11, %v7373_v24  ;;  %v3195_v7 = vunpack.c.l.b16 %v3084_v55  ;;  %v3196_v24 = vunpack.c.l.b16 %v3087_v46  ;;  %v6064_v63 = vld [vmem:[%s6776_s24 + $0x18] sm:$0xe]  ;;  %v6066_v11 = vld [vmem:[%s6776_s24 + $0x20] sm:$0x1] }
 0x298   : > { %v3090_v26 = vrot.slane %v6065_v58, 5  ;;  %v6110_v55 = vrot.slane %v6064_v63, 9 }
 0x299   : > { %v7767_v38 = vadd.f32 %v2787_v4, %v2169_v44  ;;  %v7769_v1 = vadd.f32 %v2876_v3, %v2170_v40  ;;  %v3227_v3 = vpack.c.b16 %v3196_v24, %v3195_v7  ;;  %v6499_v44 = vld [vmem:[%s6776_s24 + $0x18] sm:$0xff] }
 0x29a   : > { %v3092_v46 = vrot.slane %v3090_v26, 4  ;;  %v3091_v24 = vsel %vm6949_vm7, %v6110_v55, %v3090_v26 }
 0x29b   : > { %v2878_v23 = vpop.f32.mrf.mxu1  ;;  %v2789_v47 = vpop.f32.mrf.mxu0 }
 0x29e   : > { %v2009_v20 = vpop.f32.mrf.mxu2  ;;  %v2098_v6 = vpop.f32.mrf.mxu3 }
 0x29f   : > { %v2171_v5 = vadd.f32 %v2009_v20, %v7384_v17  ;;  %v2172_v4 = vadd.f32 %v2098_v6, %v7386_v32  ;;  %v3093_v17 = vrot.slane %v6066_v11, 5 }
 0x2a1   : > { %v7775_v25 = vadd.f32 %v2789_v47, %v2171_v5  ;;  %v7779_v22 = vadd.f32 %v2878_v23, %v2172_v4  ;;  %v3094_v18 = vsel %vm6949_vm7, %v3092_v46, %v3093_v17  ;;  %v3197_v5 = vunpack.c.l.b16 %v3091_v24  ;;  %v6069_v46 = vld [vmem:[%s6776_s24 + $0x2c] sm:$0x1]  ;;  %v6500_v17 = vld [vmem:[%s6776_s24 + $0x24] sm:$0xff] }
 0x2a2   : > { %v3198_v4 = vunpack.c.l.b16 %v3094_v18 }
 0x2a3   : > { %v2881_v40 = vpop.f32.mrf.mxu1  ;;  %6126 = vmatmul.msk.bf16.vlgmr.msrb.gmra.mxu2 %vm684_vm3, %v3227_v3  ;;  %6142 = vmatmul.msk.bf16.vlgmr.msrb.gmra.mxu3 %vm684_vm3, %v3227_v3  ;;  %v2792_v12 = vpop.f32.mrf.mxu0 }
 0x2a4   : > { %v3228_v11 = vpack.c.b16 %v3198_v4, %v3197_v5 }
 0x2a6   : > { %6271 = vmatmul.msk.bf16.vlgmr.msrb.gmra.mxu1 %vm684_vm3, %v6499_v44  ;;  %v2012_v32 = vpop.f32.mrf.mxu2  ;;  %v2101_v47 = vpop.f32.mrf.mxu3  ;;  %6255 = vmatmul.msk.bf16.vlgmr.msrb.gmra.mxu0 %vm684_vm3, %v6499_v44 }
 0x2a7   : > { %v2173_v23 = vadd.f32 %v2012_v32, %v7396_v39  ;;  %v2174_v7 = vadd.f32 %v2101_v47, %v7398_v56  ;;  %v6068_v39 = vld [vmem:[%s6776_s24 + $0x28] sm:$0xf] }
 0x2a8   : > { %v3097_v44 = vrot.slane %v6068_v39, 5 }
 0x2a9   : > { %v7792_v52 = vadd.f32 %v2792_v12, %v2173_v23  ;;  %v7794_v58 = vadd.f32 %v2881_v40, %v2174_v7  ;;  %v6067_v12 = vld [vmem:[%s6776_s24 + $0x24] sm:$0xe] }
 0x2aa   : > { %v6111_v23 = vrot.slane %v6067_v12, 9  ;;  %v3099_v7 = vrot.slane %v3097_v44, 4 }
 0x2ab   : > { %v2883_v20 = vpop.f32.mrf.mxu1  ;;  %v2794_v6 = vpop.f32.mrf.mxu0 }
 0x2ae   : > { %v2014_v3 = vpop.f32.mrf.mxu2  ;;  %v2103_v56 = vpop.f32.mrf.mxu3 }
 0x2af   : > { %v2175_v63 = vadd.f32 %v2014_v3, %v7408_v59  ;;  %v2176_v26 = vadd.f32 %v2103_v56, %v7410_v14  ;;  %v3100_v59 = vrot.slane %v6069_v46, 5 }
 0x2b1   : > { %v7799_v55 = vadd.f32 %v2794_v6, %v2175_v63  ;;  %v7803_v40 = vadd.f32 %v2883_v20, %v2176_v26  ;;  %v3098_v6 = vsel %vm6949_vm7, %v6111_v23, %v3097_v44  ;;  %v3101_v5 = vsel %vm6949_vm7, %v3099_v7, %v3100_v59  ;;  %v6072_v7 = vld [vmem:[%s6776_s24 + $0x38] sm:$0x1]  ;;  %v6501_v59 = vld [vmem:[%s6776_s24 + $0x30] sm:$0xff] }
 0x2b2   : > { %v3199_v63 = vunpack.c.l.b16 %v3098_v6  ;;  %v3200_v26 = vunpack.c.l.b16 %v3101_v5 }
 0x2b3   : > { %v2886_v32 = vpop.f32.mrf.mxu1  ;;  %6127 = vmatmul.msk.bf16.gmra.mxu2 %vm684_vm3, %v3228_v11  ;;  %6143 = vmatmul.msk.bf16.gmra.mxu3 %vm684_vm3, %v3228_v11  ;;  %v2797_v47 = vpop.f32.mrf.mxu0 }
 0x2b4   : > { %v3229_v46 = vpack.c.b16 %v3200_v26, %v3199_v63 }
 0x2b6   : > { %6272 = vmatmul.msk.bf16.gmra.mxu1 %vm684_vm3, %v6500_v17  ;;  %v2017_v14 = vpop.f32.mrf.mxu2  ;;  %v2106_v24 = vpop.f32.mrf.mxu3  ;;  %6256 = vmatmul.msk.bf16.gmra.mxu0 %vm684_vm3, %v6500_v17 }
 0x2b7   : > { %v2177_v18 = vadd.f32 %v2017_v14, %v7420_v35  ;;  %v2178_v20 = vadd.f32 %v2106_v24, %v7422_v2  ;;  %v6071_v35 = vld [vmem:[%s6776_s24 + $0x34] sm:$0xf] }
 0x2b8   : > { %v3104_v17 = vrot.slane %v6071_v35, 5 }
 0x2b9   : > { %v7816_v4 = vadd.f32 %v2797_v47, %v2177_v18  ;;  %v7818_v39 = vadd.f32 %v2886_v32, %v2178_v20  ;;  %v6070_v47 = vld [vmem:[%s6776_s24 + $0x30] sm:$0xe] }
 0x2ba   : > { %v6112_v18 = vrot.slane %v6070_v47, 9  ;;  %v3106_v20 = vrot.slane %v3104_v17, 4  ;;  %v8861_v47 = vld [vmem:[#allocation29_spill] sm:$0xff] }
 0x2bb   : > { %v2888_v3 = vpop.f32.mrf.mxu1  ;;  %v2799_v56 = vpop.f32.mrf.mxu0 }
 0x2be   : > { %v2019_v11 = vpop.f32.mrf.mxu2  ;;  %v2108_v2 = vpop.f32.mrf.mxu3 }
 0x2bf   : > { %v2179_v12 = vadd.f32 %v2019_v11, %v7432_v36  ;;  %v2180_v44 = vadd.f32 %v2108_v2, %v7434_v33  ;;  %v3107_v36 = vrot.slane %v6072_v7, 5 }
 0x2c1   : > { %v7823_v23 = vadd.f32 %v2799_v56, %v2179_v12  ;;  %v7827_v32 = vadd.f32 %v2888_v3, %v2180_v44  ;;  %v3105_v56 = vsel %vm6949_vm7, %v6112_v18, %v3104_v17  ;;  %v3108_v63 = vsel %vm6949_vm7, %v3106_v20, %v3107_v36  ;;  %v8862_v17 = vld [vmem:[#allocation30_spill] sm:$0xff]  ;;  %v6075_v36 = vld [vmem:[%s6776_s24 + $0x44] sm:$0x1] }
 0x2c2   : > { %v3201_v12 = vunpack.c.l.b16 %v3105_v56  ;;  %v3202_v44 = vunpack.c.l.b16 %v3108_v63 }
 0x2c3   : > { %v2891_v14 = vpop.f32.mrf.mxu1  ;;  %6128 = vmatmul.msk.bf16.gmra.mxu2 %vm684_vm3, %v3229_v46  ;;  %6144 = vmatmul.msk.bf16.gmra.mxu3 %vm684_vm3, %v3229_v46  ;;  %v2802_v24 = vpop.f32.mrf.mxu0 }
 0x2c4   : > { %v3230_v18 = vpack.c.b16 %v3202_v44, %v3201_v12  ;;  %v8865_v44 = vld [vmem:[#allocation3_spill] sm:$0xff] }
 0x2c6   : > { %6273 = vmatmul.msk.bf16.gmra.mxu1 %vm684_vm3, %v6501_v59  ;;  %v2022_v33 = vpop.f32.mrf.mxu2  ;;  %v2111_v6 = vpop.f32.mrf.mxu3  ;;  %6257 = vmatmul.msk.bf16.gmra.mxu0 %vm684_vm3, %v6501_v59 }
 0x2c7   : > { %v2181_v5 = vadd.f32 %v2022_v33, %v7444_v60  ;;  %v2182_v3 = vadd.f32 %v2111_v6, %v7446_v30  ;;  %v6074_v60 = vld [vmem:[%s6776_s24 + $0x40] sm:$0xf] }
 0x2c8   : > { %v3111_v33 = vrot.slane %v6074_v60, 5  ;;  %v6502_v6 = vld [vmem:[%s6776_s24 + $0x3c] sm:$0xff] }
 0x2c9   : > { %v7840_v26 = vadd.f32 %v2802_v24, %v2181_v5  ;;  %v7842_v35 = vadd.f32 %v2891_v14, %v2182_v3  ;;  %v6073_v24 = vld [vmem:[%s6776_s24 + $0x3c] sm:$0xe] }
 0x2ca   : > { %v6113_v56 = vrot.slane %v6073_v24, 9  ;;  %v3113_v63 = vrot.slane %v3111_v33, 4  ;;  %v8866_v60 = vld [vmem:[#allocation4_spill] sm:$0xff] }
 0x2cb   : > { %8860 = vst [vmem:[#allocation25_spill] sm:$0xff] %v7842_v35  ;;  %v2893_v11 = vpop.f32.mrf.mxu1  ;;  %v2804_v2 = vpop.f32.mrf.mxu0 }
 0x2ce   : > { %v2024_v46 = vpop.f32.mrf.mxu2  ;;  %v2113_v30 = vpop.f32.mrf.mxu3 }
 0x2cf   : > { %v2183_v7 = vadd.f32 %v2024_v46, %v8861_v47  ;;  %v2184_v59 = vadd.f32 %v2113_v30, %v8862_v17  ;;  %v3114_v46 = vrot.slane %v6075_v36, 5  ;;  %v3112_v47 = vsel %vm6949_vm7, %v6113_v56, %v3111_v33  ;;  %v8870_v33 = vld [vmem:[#allocation6_spill] sm:$0xff] }
 0x2d0   : > { %v3203_v36 = vunpack.c.l.b16 %v3112_v47 }
 0x2d1   : > { %v7847_v20 = vadd.f32 %v2804_v2, %v2183_v7  ;;  %v7851_v14 = vadd.f32 %v2893_v11, %v2184_v59  ;;  %v3115_v7 = vsel %vm6949_vm7, %v3113_v63, %v3114_v46  ;;  %v6078_v46 = vld [vmem:[%s6776_s24 + $0x50] sm:$0x1] }
 0x2d3   : > { %8863 = vst [vmem:[#allocation26_spill] sm:$0xff] %v7847_v20  ;;  %v2896_v5 = vpop.f32.mrf.mxu1  ;;  %6129 = vmatmul.msk.bf16.gmra.mxu2 %vm684_vm3, %v3230_v18  ;;  %6145 = vmatmul.msk.bf16.gmra.mxu3 %vm684_vm3, %v3230_v18  ;;  %v2807_v3 = vpop.f32.mrf.mxu0 }
 0x2d4   : > { %8864 = vst [vmem:[#allocation27_spill] sm:$0xff] %v7851_v14 }
 0x2d6   : > { %6274 = vmatmul.msk.bf16.gmra.mxu1 %vm684_vm3, %v6502_v6  ;;  %v2027_v12 = vpop.f32.mrf.mxu2  ;;  %v2116_v2 = vpop.f32.mrf.mxu3  ;;  %6258 = vmatmul.msk.bf16.gmra.mxu0 %vm684_vm3, %v6502_v6  ;;  %v3204_v6 = vunpack.c.l.b16 %v3115_v7 }
 0x2d7   : > { %v2185_v11 = vadd.f32 %v2027_v12, %v8865_v44  ;;  %v2186_v30 = vadd.f32 %v2116_v2, %v8866_v60  ;;  %v6077_v12 = vld [vmem:[%s6776_s24 + $0x4c] sm:$0xf]  ;;  %v8869_v60 = vld [vmem:[#allocation5_spill] sm:$0xff] }
 0x2d8   : > { %v3231_v20 = vpack.c.b16 %v3204_v6, %v3203_v36  ;;  %v3118_v35 = vrot.slane %v6077_v12, 5  ;;  %v8874_v6 = vld [vmem:[#allocation8_spill] sm:$0xff] }
 0x2d9   : > { %v7864_v17 = vadd.f32 %v2807_v3, %v2185_v11  ;;  %v7866_v59 = vadd.f32 %v2896_v5, %v2186_v30  ;;  %v6076_v3 = vld [vmem:[%s6776_s24 + $0x48] sm:$0xe] }
 0x2da   : > { %v6503_v11 = vld [vmem:[%s6776_s24 + $0x48] sm:$0xff]  ;;  %v6114_v7 = vrot.slane %v6076_v3, 9 }
 0x2db   : > { %8867 = vst [vmem:[#allocation28_spill] sm:$0xff] %v7864_v17  ;;  %v2898_v18 = vpop.f32.mrf.mxu1  ;;  %v2809_v24 = vpop.f32.mrf.mxu0 }
 0x2dc   : > { %8868 = vst [vmem:[#allocation2_spill] sm:$0xff] %v7866_v59  ;;  %v3120_v59 = vrot.slane %v3118_v35, 4 }
 0x2de   : > { %v2029_v44 = vpop.f32.mrf.mxu2  ;;  %v2118_v2 = vpop.f32.mrf.mxu3 }
 0x2df   : > { %v2187_v14 = vadd.f32 %v2029_v44, %v8869_v60  ;;  %v2188_v56 = vadd.f32 %v2118_v2, %v8870_v33  ;;  %v3121_v44 = vrot.slane %v6078_v46, 5  ;;  %v3119_v2 = vsel %vm6949_vm7, %v6114_v7, %v3118_v35  ;;  %v8878_v35 = vld [vmem:[#allocation10_spill] sm:$0xff] }
 0x2e0   : > { %v3205_v46 = vunpack.c.l.b16 %v3119_v2 }
 0x2e1   : > { %v7871_v63 = vadd.f32 %v2809_v24, %v2187_v14  ;;  %v7875_v5 = vadd.f32 %v2898_v18, %v2188_v56  ;;  %v8873_v24 = vld [vmem:[#allocation7_spill] sm:$0xff] }
 0x2e3   : > { %8871 = vst [vmem:[#allocation29_spill] sm:$0xff] %v7871_v63  ;;  %v2901_v30 = vpop.f32.mrf.mxu1  ;;  %6130 = vmatmul.msk.bf16.gmra.mxu2 %vm684_vm3, %v3231_v20  ;;  %6146 = vmatmul.msk.bf16.gmra.mxu3 %vm684_vm3, %v3231_v20  ;;  %v2812_v47 = vpop.f32.mrf.mxu0  ;;  %v3122_v20 = vsel %vm6949_vm7, %v3120_v59, %v3121_v44  ;;  %v6081_v44 = vld [vmem:[%s6776_s24 + $0x5c] sm:$0x1] }
 0x2e4   : > { %8872 = vst [vmem:[#allocation30_spill] sm:$0xff] %v7875_v5 }
 0x2e6   : > { %6275 = vmatmul.msk.bf16.gmra.mxu1 %vm684_vm3, %v6503_v11  ;;  %v2032_v36 = vpop.f32.mrf.mxu2  ;;  %v2121_v14 = vpop.f32.mrf.mxu3  ;;  %6259 = vmatmul.msk.bf16.gmra.mxu0 %vm684_vm3, %v6503_v11  ;;  %v3206_v11 = vunpack.c.l.b16 %v3122_v20 }
 0x2e7   : > { %v2189_v18 = vadd.f32 %v2032_v36, %v8873_v24  ;;  %v2190_v12 = vadd.f32 %v2121_v14, %v8874_v6  ;;  %v6080_v36 = vld [vmem:[%s6776_s24 + $0x58] sm:$0xf]  ;;  %v8877_v6 = vld [vmem:[#allocation9_spill] sm:$0xff] }
 0x2e8   : > { %v3232_v63 = vpack.c.b16 %v3206_v11, %v3205_v46  ;;  %v3125_v17 = vrot.slane %v6080_v36, 5  ;;  %v8882_v11 = vld [vmem:[#allocation12_spill] sm:$0xff] }
 0x2e9   : > { %v7888_v60 = vadd.f32 %v2812_v47, %v2189_v18  ;;  %v7890_v33 = vadd.f32 %v2901_v30, %v2190_v12  ;;  %v6079_v47 = vld [vmem:[%s6776_s24 + $0x54] sm:$0xe] }
 0x2ea   : > { %v6504_v18 = vld [vmem:[%s6776_s24 + $0x54] sm:$0xff]  ;;  %v6115_v20 = vrot.slane %v6079_v47, 9 }
 0x2eb   : > { %8875 = vst [vmem:[#allocation3_spill] sm:$0xff] %v7888_v60  ;;  %v2903_v56 = vpop.f32.mrf.mxu1  ;;  %v2814_v3 = vpop.f32.mrf.mxu0 }
 0x2ec   : > { %8876 = vst [vmem:[#allocation4_spill] sm:$0xff] %v7890_v33  ;;  %v3127_v33 = vrot.slane %v3125_v17, 4 }
 0x2ee   : > { %v2034_v24 = vpop.f32.mrf.mxu2  ;;  %v2123_v14 = vpop.f32.mrf.mxu3 }
 0x2ef   : > { %v2191_v5 = vadd.f32 %v2034_v24, %v8877_v6  ;;  %v2192_v7 = vadd.f32 %v2123_v14, %v8878_v35  ;;  %v3128_v24 = vrot.slane %v6081_v44, 5  ;;  %v3126_v14 = vsel %vm6949_vm7, %v6115_v20, %v3125_v17  ;;  %v8886_v17 = vld [vmem:[#allocation14_spill] sm:$0xff] }
 0x2f0   : > { %v3207_v44 = vunpack.c.l.b16 %v3126_v14 }
 0x2f1   : > { %v7895_v59 = vadd.f32 %v2814_v3, %v2191_v5  ;;  %v7899_v30 = vadd.f32 %v2903_v56, %v2192_v7  ;;  %v8881_v3 = vld [vmem:[#allocation11_spill] sm:$0xff] }
 0x2f3   : > { %8879 = vst [vmem:[#allocation5_spill] sm:$0xff] %v7895_v59  ;;  %v2906_v12 = vpop.f32.mrf.mxu1  ;;  %6131 = vmatmul.msk.bf16.gmra.mxu2 %vm684_vm3, %v3232_v63  ;;  %6147 = vmatmul.msk.bf16.gmra.mxu3 %vm684_vm3, %v3232_v63  ;;  %v2817_v2 = vpop.f32.mrf.mxu0  ;;  %v3129_v63 = vsel %vm6949_vm7, %v3127_v33, %v3128_v24  ;;  %v6084_v24 = vld [vmem:[%s6776_s24 + $0x68] sm:$0x1] }
 0x2f4   : > { %8880 = vst [vmem:[#allocation6_spill] sm:$0xff] %v7899_v30 }
 0x2f6   : > { %6276 = vmatmul.msk.bf16.gmra.mxu1 %vm684_vm3, %v6504_v18  ;;  %v2037_v46 = vpop.f32.mrf.mxu2  ;;  %v2126_v5 = vpop.f32.mrf.mxu3  ;;  %6260 = vmatmul.msk.bf16.gmra.mxu0 %vm684_vm3, %v6504_v18  ;;  %v3208_v18 = vunpack.c.l.b16 %v3129_v63 }
 0x2f7   : > { %v2193_v56 = vadd.f32 %v2037_v46, %v8881_v3  ;;  %v2194_v36 = vadd.f32 %v2126_v5, %v8882_v11  ;;  %v6083_v46 = vld [vmem:[%s6776_s24 + $0x64] sm:$0xf] }
 0x2f8   : > { %v8885_v11 = vld [vmem:[#allocation13_spill] sm:$0xff]  ;;  %v3233_v59 = vpack.c.b16 %v3208_v18, %v3207_v44  ;;  %v3132_v60 = vrot.slane %v6083_v46, 5  ;;  %v8890_v18 = vld [vmem:[#allocation16_spill] sm:$0xff] }
 0x2f9   : > { %v7912_v6 = vadd.f32 %v2817_v2, %v2193_v56  ;;  %v7914_v35 = vadd.f32 %v2906_v12, %v2194_v36  ;;  %v6082_v2 = vld [vmem:[%s6776_s24 + $0x60] sm:$0xe] }
 0x2fa   : > { %v6505_v56 = vld [vmem:[%s6776_s24 + $0x60] sm:$0xff]  ;;  %v6116_v63 = vrot.slane %v6082_v2, 9 }
 0x2fb   : > { %8883 = vst [vmem:[#allocation7_spill] sm:$0xff] %v7912_v6  ;;  %v2908_v7 = vpop.f32.mrf.mxu1  ;;  %v2819_v47 = vpop.f32.mrf.mxu0 }
 0x2fc   : > { %8884 = vst [vmem:[#allocation8_spill] sm:$0xff] %v7914_v35  ;;  %v3134_v35 = vrot.slane %v3132_v60, 4 }
 0x2fe   : > { %v2039_v3 = vpop.f32.mrf.mxu2  ;;  %v2128_v5 = vpop.f32.mrf.mxu3 }
 0x2ff   : > { %v2195_v30 = vadd.f32 %v2039_v3, %v8885_v11  ;;  %v2196_v20 = vadd.f32 %v2128_v5, %v8886_v17  ;;  %v3135_v3 = vrot.slane %v6084_v24, 5  ;;  %v3133_v5 = vsel %vm6949_vm7, %v6116_v63, %v3132_v60  ;;  %v8893_v60 = vld [vmem:[#allocation18_spill] sm:$0xff] }
 0x300   : > { %v3209_v24 = vunpack.c.l.b16 %v3133_v5 }
 0x301   : > { %v7919_v33 = vadd.f32 %v2819_v47, %v2195_v30  ;;  %v7923_v12 = vadd.f32 %v2908_v7, %v2196_v20  ;;  %v8889_v47 = vld [vmem:[#allocation15_spill] sm:$0xff] }
 0x303   : > { %8887 = vst [vmem:[#allocation9_spill] sm:$0xff] %v7919_v33  ;;  %v2911_v36 = vpop.f32.mrf.mxu1  ;;  %6132 = vmatmul.msk.bf16.gmra.mxu2 %vm684_vm3, %v3233_v59  ;;  %6148 = vmatmul.msk.bf16.gmra.mxu3 %vm684_vm3, %v3233_v59  ;;  %v2822_v14 = vpop.f32.mrf.mxu0  ;;  %v3136_v59 = vsel %vm6949_vm7, %v3134_v35, %v3135_v3  ;;  %v6087_v3 = vld [vmem:[%s6776_s24 + $0x74] sm:$0x1] }
 0x304   : > { %8888 = vst [vmem:[#allocation10_spill] sm:$0xff] %v7923_v12 }
 0x306   : > { %6277 = vmatmul.msk.bf16.gmra.mxu1 %vm684_vm3, %v6505_v56  ;;  %v2042_v44 = vpop.f32.mrf.mxu2  ;;  %v2131_v30 = vpop.f32.mrf.mxu3  ;;  %6261 = vmatmul.msk.bf16.gmra.mxu0 %vm684_vm3, %v6505_v56  ;;  %v3210_v56 = vunpack.c.l.b16 %v3136_v59 }
 0x307   : > { %v2197_v7 = vadd.f32 %v2042_v44, %v8889_v47  ;;  %v2198_v46 = vadd.f32 %v2131_v30, %v8890_v18  ;;  %v6086_v44 = vld [vmem:[%s6776_s24 + $0x70] sm:$0xf]  ;;  %v8892_v18 = vld [vmem:[#allocation17_spill] sm:$0xff] }
 0x308   : > { %v3234_v33 = vpack.c.b16 %v3210_v56, %v3209_v24  ;;  %v3139_v6 = vrot.slane %v6086_v44, 5  ;;  %v8896_v56 = vld [vmem:[#allocation20_spill] sm:$0xff] }
 0x309   : > { %v7936_v11 = vadd.f32 %v2822_v14, %v2197_v7  ;;  %v7938_v17 = vadd.f32 %v2911_v36, %v2198_v46  ;;  %v6085_v14 = vld [vmem:[%s6776_s24 + $0x6c] sm:$0xe] }
 0x30a   : > { %v6506_v7 = vld [vmem:[%s6776_s24 + $0x6c] sm:$0xff]  ;;  %v6117_v59 = vrot.slane %v6085_v14, 9 }
 0x30b   : > { %8891 = vst [vmem:[#allocation11_spill] sm:$0xff] %v7938_v17  ;;  %v2913_v20 = vpop.f32.mrf.mxu1  ;;  %v2824_v2 = vpop.f32.mrf.mxu0  ;;  %v3141_v17 = vrot.slane %v3139_v6, 4 }
 0x30e   : > { %v2044_v47 = vpop.f32.mrf.mxu2  ;;  %v2133_v30 = vpop.f32.mrf.mxu3 }
 0x30f   : > { %v2199_v12 = vadd.f32 %v2044_v47, %v8892_v18  ;;  %v2200_v63 = vadd.f32 %v2133_v30, %v8893_v60  ;;  %v3142_v47 = vrot.slane %v6087_v3, 5  ;;  %v3140_v30 = vsel %vm6949_vm7, %v6117_v59, %v3139_v6 }
 0x310   : > { %v3211_v3 = vunpack.c.l.b16 %v3140_v30 }
 0x311   : > { %v7943_v35 = vadd.f32 %v2824_v2, %v2199_v12  ;;  %v7947_v36 = vadd.f32 %v2913_v20, %v2200_v63  ;;  %v8895_v2 = vld [vmem:[#allocation19_spill] sm:$0xff] }
 0x313   : > { %8894 = vst [vmem:[#allocation12_spill] sm:$0xff] %v7947_v36  ;;  %v2916_v46 = vpop.f32.mrf.mxu1  ;;  %6133 = vmatmul.msk.bf16.gmra.mxu2 %vm684_vm3, %v3234_v33  ;;  %6149 = vmatmul.msk.bf16.gmra.mxu3 %vm684_vm3, %v3234_v33  ;;  %v2827_v5 = vpop.f32.mrf.mxu0  ;;  %v3143_v33 = vsel %vm6949_vm7, %v3141_v17, %v3142_v47  ;;  %v6090_v47 = vld [vmem:[%s6776_s24 + $0x80] sm:$0x1] }
 0x316   : > { %6278 = vmatmul.msk.bf16.gmra.mxu1 %vm684_vm3, %v6506_v7  ;;  %v2047_v24 = vpop.f32.mrf.mxu2  ;;  %v2136_v12 = vpop.f32.mrf.mxu3  ;;  %6262 = vmatmul.msk.bf16.gmra.mxu0 %vm684_vm3, %v6506_v7  ;;  %v3212_v7 = vunpack.c.l.b16 %v3143_v33 }
 0x317   : > { %v2201_v20 = vadd.f32 %v2047_v24, %v8895_v2  ;;  %v2202_v44 = vadd.f32 %v2136_v12, %v8896_v56  ;;  %v6089_v24 = vld [vmem:[%s6776_s24 + $0x7c] sm:$0xf] }
 0x318   : > { %v3235_v59 = vpack.c.b16 %v3212_v7, %v3211_v3  ;;  %v3146_v36 = vrot.slane %v6089_v24, 5 }
 0x319   : > { %v7960_v18 = vadd.f32 %v2827_v5, %v2201_v20  ;;  %v7962_v60 = vadd.f32 %v2916_v46, %v2202_v44  ;;  %v6088_v5 = vld [vmem:[%s6776_s24 + $0x78] sm:$0xe] }
 0x31a   : > { %v6507_v20 = vld [vmem:[%s6776_s24 + $0x78] sm:$0xff]  ;;  %v6118_v33 = vrot.slane %v6088_v5, 9 }
 0x31b   : > { %8897 = vst [vmem:[#allocation13_spill] sm:$0xff] %v7962_v60  ;;  %v2918_v63 = vpop.f32.mrf.mxu1  ;;  %v2829_v14 = vpop.f32.mrf.mxu0  ;;  %v3148_v60 = vrot.slane %v3146_v36, 4 }
 0x31c   : > { %v3147_v7 = vsel %vm6949_vm7, %v6118_v33, %v3146_v36 }
 0x31e   : > { %v2049_v2 = vpop.f32.mrf.mxu2  ;;  %v2138_v12 = vpop.f32.mrf.mxu3 }
 0x31f   : > { %v2203_v56 = vadd.f32 %v2049_v2, %v7576_v21  ;;  %v2204_v6 = vadd.f32 %v2138_v12, %v7578_v62  ;;  %v3149_v21 = vrot.slane %v6090_v47, 5 }
 0x321   : > { %v7967_v17 = vadd.f32 %v2829_v14, %v2203_v56  ;;  %v7971_v46 = vadd.f32 %v2918_v63, %v2204_v6  ;;  %v3150_v24 = vsel %vm6949_vm7, %v3148_v60, %v3149_v21  ;;  %v6093_v21 = vld [vmem:[%s6776_s24 + $0x8c] sm:$0x1] }
 0x322   : > { %v3214_v5 = vunpack.c.l.b16 %v3150_v24 }
 0x323   : > { %v3813_v44 = vpop.f32.mrf.mxu1  ;;  %6134 = vmatmul.msk.bf16.gmra.mxu2 %vm684_vm3, %v3235_v59  ;;  %6150 = vmatmul.msk.bf16.gmra.mxu3 %vm684_vm3, %v3235_v59  ;;  %v3724_v30 = vpop.f32.mrf.mxu0  ;;  %v3213_v59 = vunpack.c.l.b16 %v3147_v7 }
 0x325   : > { %v3236_v33 = vpack.c.b16 %v3214_v5, %v3213_v59 }
 0x326   : > { %6279 = vmatmul.msk.bf16.gmra.mxu1 %vm684_vm3, %v6507_v20  ;;  %v3308_v62 = vpop.f32.mrf.mxu2  ;;  %v3397_v14 = vpop.f32.mrf.mxu3  ;;  %6263 = vmatmul.msk.bf16.gmra.mxu0 %vm684_vm3, %v6507_v20 }
 0x327   : > { %v3477_v63 = vadd.f32 %v3308_v62, %v7588_v42  ;;  %v3478_v3 = vadd.f32 %v3397_v14, %v7590_v9  ;;  %v6092_v42 = vld [vmem:[%s6776_s24 + $0x88] sm:$0xf] }
 0x328   : > { %v3153_v62 = vrot.slane %v6092_v42, 5  ;;  %v6508_v14 = vld [vmem:[%s6776_s24 + $0x84] sm:$0xff] }
 0x329   : > { %v7984_v2 = vadd.f32 %v3724_v30, %v3477_v63  ;;  %v7986_v12 = vadd.f32 %v3813_v44, %v3478_v3  ;;  %v6091_v30 = vld [vmem:[%s6776_s24 + $0x84] sm:$0xe] }
 0x32a   : > { %v6119_v7 = vrot.slane %v6091_v30, 9  ;;  %v3155_v24 = vrot.slane %v3153_v62, 4 }
 0x32b   : > { %v3815_v56 = vpop.f32.mrf.mxu1  ;;  %v3726_v6 = vpop.f32.mrf.mxu0 }
 0x32c   : > { %v3154_v5 = vsel %vm6949_vm7, %v6119_v7, %v3153_v62 }
 0x32e   : > { %v3310_v47 = vpop.f32.mrf.mxu2  ;;  %v3399_v9 = vpop.f32.mrf.mxu3 }
 0x32f   : > { %v3479_v20 = vadd.f32 %v3310_v47, %v7600_v53  ;;  %v3480_v36 = vadd.f32 %v3399_v9, %v7602_v28  ;;  %v3156_v53 = vrot.slane %v6093_v21, 5 }
 0x331   : > { %v7991_v60 = vadd.f32 %v3726_v6, %v3479_v20  ;;  %v7995_v44 = vadd.f32 %v3815_v56, %v3480_v36  ;;  %v3157_v42 = vsel %vm6949_vm7, %v3155_v24, %v3156_v53  ;;  %v6096_v53 = vld [vmem:[%s6776_s24 + $0x98] sm:$0x1] }
 0x332   : > { %v3216_v30 = vunpack.c.l.b16 %v3157_v42 }
 0x333   : > { %v3818_v63 = vpop.f32.mrf.mxu1  ;;  %6135 = vmatmul.msk.bf16.gmra.mxu2 %vm684_vm3, %v3236_v33  ;;  %6151 = vmatmul.msk.bf16.gmra.mxu3 %vm684_vm3, %v3236_v33  ;;  %v3729_v3 = vpop.f32.mrf.mxu0  ;;  %v3215_v33 = vunpack.c.l.b16 %v3154_v5 }
 0x335   : > { %v3237_v7 = vpack.c.b16 %v3216_v30, %v3215_v33 }
 0x336   : > { %6280 = vmatmul.msk.bf16.gmra.mxu1 %vm684_vm3, %v6508_v14  ;;  %v3313_v28 = vpop.f32.mrf.mxu2  ;;  %v3402_v6 = vpop.f32.mrf.mxu3  ;;  %6264 = vmatmul.msk.bf16.gmra.mxu0 %vm684_vm3, %v6508_v14 }
 0x337   : > { %v3481_v56 = vadd.f32 %v3313_v28, %v7612_v31  ;;  %v3482_v59 = vadd.f32 %v3402_v6, %v7614_v19  ;;  %v6095_v31 = vld [vmem:[%s6776_s24 + $0x94] sm:$0xf] }
 0x338   : > { %v3160_v28 = vrot.slane %v6095_v31, 5  ;;  %v6509_v6 = vld [vmem:[%s6776_s24 + $0x90] sm:$0xff] }
 0x339   : > { %v8008_v47 = vadd.f32 %v3729_v3, %v3481_v56  ;;  %v8010_v9 = vadd.f32 %v3818_v63, %v3482_v59  ;;  %v6094_v3 = vld [vmem:[%s6776_s24 + $0x90] sm:$0xe] }
 0x33a   : > { %v6120_v5 = vrot.slane %v6094_v3, 9  ;;  %v3162_v42 = vrot.slane %v3160_v28, 4 }
 0x33b   : > { %v3820_v20 = vpop.f32.mrf.mxu1  ;;  %v3731_v36 = vpop.f32.mrf.mxu0 }
 0x33c   : > { %v3161_v30 = vsel %vm6949_vm7, %v6120_v5, %v3160_v28 }
 0x33e   : > { %v3315_v21 = vpop.f32.mrf.mxu2  ;;  %v3404_v19 = vpop.f32.mrf.mxu3 }
 0x33f   : > { %v3483_v14 = vadd.f32 %v3315_v21, %v7624_v57  ;;  %v3484_v62 = vadd.f32 %v3404_v19, %v7626_v27  ;;  %v3163_v57 = vrot.slane %v6096_v53, 5 }
 0x341   : > { %v8015_v24 = vadd.f32 %v3731_v36, %v3483_v14  ;;  %v8019_v63 = vadd.f32 %v3820_v20, %v3484_v62  ;;  %v3164_v31 = vsel %vm6949_vm7, %v3162_v42, %v3163_v57  ;;  %v6099_v57 = vld [vmem:[%s6776_s24 + $0xa4] sm:$0x1] }
 0x342   : > { %v3218_v3 = vunpack.c.l.b16 %v3164_v31 }
 0x343   : > { %v3823_v56 = vpop.f32.mrf.mxu1  ;;  %6136 = vmatmul.msk.bf16.gmra.mxu2 %vm684_vm3, %v3237_v7  ;;  %6152 = vmatmul.msk.bf16.gmra.mxu3 %vm684_vm3, %v3237_v7  ;;  %v3734_v59 = vpop.f32.mrf.mxu0  ;;  %v3217_v7 = vunpack.c.l.b16 %v3161_v30 }
 0x345   : > { %v3238_v5 = vpack.c.b16 %v3218_v3, %v3217_v7 }
 0x346   : > { %6281 = vmatmul.msk.bf16.gmra.mxu1 %vm684_vm3, %v6509_v6  ;;  %v3318_v27 = vpop.f32.mrf.mxu2  ;;  %v3407_v36 = vpop.f32.mrf.mxu3  ;;  %6265 = vmatmul.msk.bf16.gmra.mxu0 %vm684_vm3, %v6509_v6 }
 0x347   : > { %v3485_v20 = vadd.f32 %v3318_v27, %v7636_v51  ;;  %v3486_v33 = vadd.f32 %v3407_v36, %v7638_v48  ;;  %v6098_v51 = vld [vmem:[%s6776_s24 + $0xa0] sm:$0xf] }
 0x348   : > { %v3167_v27 = vrot.slane %v6098_v51, 5  ;;  %v6510_v36 = vld [vmem:[%s6776_s24 + $0x9c] sm:$0xff] }
 0x349   : > { %v8032_v21 = vadd.f32 %v3734_v59, %v3485_v20  ;;  %v8034_v19 = vadd.f32 %v3823_v56, %v3486_v33  ;;  %v6097_v59 = vld [vmem:[%s6776_s24 + $0x9c] sm:$0xe] }
 0x34a   : > { %v6121_v30 = vrot.slane %v6097_v59, 9  ;;  %v3169_v31 = vrot.slane %v3167_v27, 4 }
 0x34b   : > { %v3825_v14 = vpop.f32.mrf.mxu1  ;;  %v3736_v62 = vpop.f32.mrf.mxu0 }
 0x34c   : > { %v3168_v3 = vsel %vm6949_vm7, %v6121_v30, %v3167_v27 }
 0x34e   : > { %v3320_v53 = vpop.f32.mrf.mxu2  ;;  %v3409_v48 = vpop.f32.mrf.mxu3 }
 0x34f   : > { %v3487_v6 = vadd.f32 %v3320_v53, %v7648_v0  ;;  %v3488_v28 = vadd.f32 %v3409_v48, %v7650_v16  ;;  %v3170_v0 = vrot.slane %v6099_v57, 5 }
 0x351   : > { %v8039_v42 = vadd.f32 %v3736_v62, %v3487_v6  ;;  %v8043_v56 = vadd.f32 %v3825_v14, %v3488_v28  ;;  %v3171_v51 = vsel %vm6949_vm7, %v3169_v31, %v3170_v0  ;;  %v6102_v0 = vld [vmem:[%s6776_s24 + $0xb0] sm:$0x1] }
 0x352   : > { %v3220_v59 = vunpack.c.l.b16 %v3171_v51 }
 0x353   : > { %v3828_v20 = vpop.f32.mrf.mxu1  ;;  %6137 = vmatmul.msk.bf16.gmra.mxu2 %vm684_vm3, %v3238_v5  ;;  %6153 = vmatmul.msk.bf16.gmra.mxu3 %vm684_vm3, %v3238_v5  ;;  %v3739_v33 = vpop.f32.mrf.mxu0  ;;  %v3219_v5 = vunpack.c.l.b16 %v3168_v3 }
 0x355   : > { %v3239_v30 = vpack.c.b16 %v3220_v59, %v3219_v5 }
 0x356   : > { %6282 = vmatmul.msk.bf16.gmra.mxu1 %vm684_vm3, %v6510_v36  ;;  %v3323_v16 = vpop.f32.mrf.mxu2  ;;  %v3412_v62 = vpop.f32.mrf.mxu3  ;;  %6266 = vmatmul.msk.bf16.gmra.mxu0 %vm684_vm3, %v6510_v36 }
 0x357   : > { %v3489_v14 = vadd.f32 %v3323_v16, %v7660_v8  ;;  %v3490_v7 = vadd.f32 %v3412_v62, %v7662_v15  ;;  %v6101_v8 = vld [vmem:[%s6776_s24 + $0xac] sm:$0xf] }
 0x358   : > { %v3174_v16 = vrot.slane %v6101_v8, 5  ;;  %v6511_v62 = vld [vmem:[%s6776_s24 + $0xa8] sm:$0xff] }
 0x359   : > { %v8056_v53 = vadd.f32 %v3739_v33, %v3489_v14  ;;  %v8058_v48 = vadd.f32 %v3828_v20, %v3490_v7  ;;  %v6100_v33 = vld [vmem:[%s6776_s24 + $0xa8] sm:$0xe] }
 0x35a   : > { %v6122_v3 = vrot.slane %v6100_v33, 9  ;;  %v3176_v51 = vrot.slane %v3174_v16, 4 }
 0x35b   : > { %v3830_v6 = vpop.f32.mrf.mxu1  ;;  %v3741_v28 = vpop.f32.mrf.mxu0 }
 0x35c   : > { %v3175_v59 = vsel %vm6949_vm7, %v6122_v3, %v3174_v16  ;;  %v8901_v16 = vld [vmem:[#allocation22_spill] sm:$0xff] }
 0x35e   : > { %v3325_v57 = vpop.f32.mrf.mxu2  ;;  %v3414_v15 = vpop.f32.mrf.mxu3 }
 0x35f   : > { %v3491_v36 = vadd.f32 %v3325_v57, %v7672_v34  ;;  %v3492_v27 = vadd.f32 %v3414_v15, %v7674_v45  ;;  %v3177_v34 = vrot.slane %v6102_v0, 5 }
 0x361   : > { %v8063_v31 = vadd.f32 %v3741_v28, %v3491_v36  ;;  %v8067_v20 = vadd.f32 %v3830_v6, %v3492_v27  ;;  %v3178_v8 = vsel %vm6949_vm7, %v3176_v51, %v3177_v34  ;;  %v6105_v34 = vld [vmem:[%s6776_s24 + $0xbc] sm:$0x1] }
 0x362   : > { %v3222_v33 = vunpack.c.l.b16 %v3178_v8 }
 0x363   : > { %8898 = vst [vmem:[#allocation14_spill] sm:$0xff] %v8063_v31  ;;  %v3833_v14 = vpop.f32.mrf.mxu1  ;;  %6138 = vmatmul.msk.bf16.gmra.mxu2 %vm684_vm3, %v3239_v30  ;;  %6154 = vmatmul.msk.bf16.gmra.mxu3 %vm684_vm3, %v3239_v30  ;;  %v3744_v7 = vpop.f32.mrf.mxu0  ;;  %v3221_v30 = vunpack.c.l.b16 %v3175_v59 }
 0x366   : > { %6283 = vmatmul.msk.bf16.gmra.mxu1 %vm684_vm3, %v6511_v62  ;;  %v3328_v45 = vpop.f32.mrf.mxu2  ;;  %v3417_v28 = vpop.f32.mrf.mxu3  ;;  %6267 = vmatmul.msk.bf16.gmra.mxu0 %vm684_vm3, %v6511_v62  ;;  %v8900_v62 = vld [vmem:[#allocation21_spill] sm:$0xff] }
 0x367   : > { %v3493_v6 = vadd.f32 %v3328_v45, %v7684_v13  ;;  %v3494_v5 = vadd.f32 %v3417_v28, %v7686_v37  ;;  %v6104_v13 = vld [vmem:[%s6776_s24 + $0xb8] sm:$0xf]  ;;  %v3240_v28 = vpack.c.b16 %v3222_v33, %v3221_v30  ;;  %v8903_v33 = vld [vmem:[#allocation23_spill] sm:$0xff] }
 0x368   : > { %v3181_v31 = vrot.slane %v6104_v13, 5  ;;  %v8904_v13 = vld [vmem:[#allocation24_spill] sm:$0xff] }
 0x369   : > { %v8080_v57 = vadd.f32 %v3744_v7, %v3493_v6  ;;  %v8082_v15 = vadd.f32 %v3833_v14, %v3494_v5  ;;  %v6103_v7 = vld [vmem:[%s6776_s24 + $0xb4] sm:$0xe] }
 0x36a   : > { %v6512_v6 = vld [vmem:[%s6776_s24 + $0xb4] sm:$0xff]  ;;  %v6123_v8 = vrot.slane %v6103_v7, 9 }
 0x36b   : > { %8899 = vst [vmem:[#allocation15_spill] sm:$0xff] %v8080_v57  ;;  %v3835_v36 = vpop.f32.mrf.mxu1  ;;  %v3746_v27 = vpop.f32.mrf.mxu0  ;;  %v3183_v57 = vrot.slane %v3181_v31, 4 }
 0x36e   : > { %v3330_v0 = vpop.f32.mrf.mxu2  ;;  %v3419_v37 = vpop.f32.mrf.mxu3 }
 0x36f   : > { %v3495_v45 = vadd.f32 %v3330_v0, %v8900_v62  ;;  %v3496_v3 = vadd.f32 %v3419_v37, %v8901_v16  ;;  %v3184_v0 = vrot.slane %v6105_v34, 5  ;;  %v3182_v62 = vsel %vm6949_vm7, %v6123_v8, %v3181_v31 }
 0x370   : > { %v3223_v34 = vunpack.c.l.b16 %v3182_v62 }
 0x371   : > { %v8087_v51 = vadd.f32 %v3746_v27, %v3495_v45  ;;  %v8091_v14 = vadd.f32 %v3835_v36, %v3496_v3  ;;  %v3185_v45 = vsel %vm6949_vm7, %v3183_v57, %v3184_v0  ;;  %v6108_v0 = vld [vmem:[%s6776_s24 + $0xc8] sm:$0x1] }
 0x373   : > { %8902 = vst [vmem:[#allocation16_spill] sm:$0xff] %v8087_v51  ;;  %v3838_v5 = vpop.f32.mrf.mxu1  ;;  %6139 = vmatmul.msk.bf16.gmra.mxu2 %vm684_vm3, %v3240_v28  ;;  %6155 = vmatmul.msk.bf16.gmra.mxu3 %vm684_vm3, %v3240_v28  ;;  %v3749_v59 = vpop.f32.mrf.mxu0 }
 0x376   : > { %6284 = vmatmul.msk.bf16.gmra.mxu1 %vm684_vm3, %v6512_v6  ;;  %v3333_v30 = vpop.f32.mrf.mxu2  ;;  %v3422_v27 = vpop.f32.mrf.mxu3  ;;  %6268 = vmatmul.msk.bf16.gmra.mxu0 %vm684_vm3, %v6512_v6  ;;  %v3224_v6 = vunpack.c.l.b16 %v3185_v45 }
 0x377   : > { %v3497_v36 = vadd.f32 %v3333_v30, %v8903_v33  ;;  %v3498_v37 = vadd.f32 %v3422_v27, %v8904_v13  ;;  %v6107_v30 = vld [vmem:[%s6776_s24 + $0xc4] sm:$0xf] }
 0x378   : > { %v3241_v8 = vpack.c.b16 %v3224_v6, %v3223_v34  ;;  %v3188_v57 = vrot.slane %v6107_v30, 5 }
 0x379   : > { %v8104_v16 = vadd.f32 %v3749_v59, %v3497_v36  ;;  %v8106_v3 = vadd.f32 %v3838_v5, %v3498_v37  ;;  %v6106_v59 = vld [vmem:[%s6776_s24 + $0xc0] sm:$0xe] }
 0x37a   : > { %v6513_v37 = vld [vmem:[%s6776_s24 + $0xc0] sm:$0xff] }
 0x37b   : > { %8905 = vst [vmem:[#allocation17_spill] sm:$0xff] %v8104_v16  ;;  %v3840_v28 = vpop.f32.mrf.mxu1  ;;  %v3751_v7 = vpop.f32.mrf.mxu0  ;;  %v3191_v16 = vrot.slane %v6108_v0, 5 }
 0x37e   : > { %v3335_v33 = vpop.f32.mrf.mxu2  ;;  %v3424_v27 = vpop.f32.mrf.mxu3 }
 0x37f   : > { %v3499_v13 = vadd.f32 %v3335_v33, %v7720_v54  ;;  %v3500_v31 = vadd.f32 %v3424_v27, %v7722_v41  ;;  %v6124_v54 = vrot.slane %v6106_v59, 9  ;;  %v3190_v33 = vrot.slane %v3188_v57, 4  ;;  %v6287_v41 = vld [vmem:[%s6776_s24 + $0x18] sm:$0xf]  ;;  %v6288_v27 = vld [vmem:[%s6776_s24 + $0x1c] sm:$0xf] }
 0x380   : > { %v4015_v59 = vshll.u32 %v6288_v27, 16  ;;  %v4019_v0 = vshrl.u32 %v6288_v27, 16 }
 0x381   : > { %v8113_v5 = vadd.f32 %v3751_v7, %v3499_v13  ;;  %v8115_v36 = vadd.f32 %v3840_v28, %v3500_v31  ;;  %v3189_v30 = vsel %vm6949_vm7, %v6124_v54, %v3188_v57  ;;  %v3192_v13 = vsel %vm6949_vm7, %v3190_v33, %v3191_v16  ;;  %v6289_v33 = vld [vmem:[%s6776_s24 + $0x20] sm:$0x1] }
 0x382   : > { %v4006_v31 = vshrl.u32 %v6287_v41, 16  ;;  %v4017_v54 = vrot.slane %v4015_v59, 5  ;;  %v4021_v16 = vrot.slane %v4019_v0, 4  ;;  %v6514_v59 = vld [vmem:[%s6776_s24 + $0xcc] sm:$0xff]  ;;  %v6368_v0 = vld [vmem:[%s6776_s24 + $0x18] sm:$0xe] }
 0x383   : > { %8906 = vst [vmem:[#allocation18_spill] sm:$0xff] %v8113_v5  ;;  %v3843_v62 = vpop.f32.mrf.mxu1  ;;  %6140 = vmatmul.msk.bf16.gmra.mxu2 %vm684_vm3, %v3241_v8  ;;  %6156 = vmatmul.msk.bf16.gmra.mxu3 %vm684_vm3, %v3241_v8  ;;  %v3754_v45 = vpop.f32.mrf.mxu0  ;;  %v4009_v8 = vshll.u32 %v6287_v41, 16 }
 0x384   : > { %8907 = vst [vmem:[#allocation19_spill] sm:$0xff] %v8115_v36 }
 0x385   : > { %v4011_v57 = vrot.slane %v4009_v8, 5 }
 0x386   : > { %6285 = vmatmul.msk.bf16.gmra.mxu1 %vm684_vm3, %v6513_v37  ;;  %v3338_v34 = vpop.f32.mrf.mxu2  ;;  %v3427_v6 = vpop.f32.mrf.mxu3  ;;  %6269 = vmatmul.msk.bf16.gmra.mxu0 %vm684_vm3, %v6513_v37 }
 0x387   : > { %v3501_v28 = vadd.f32 %v3338_v34, %v7733_v50  ;;  %v3502_v7 = vadd.f32 %v3427_v6, %v7735_v49  ;;  %v3225_v50 = vunpack.c.l.b16 %v3189_v30  ;;  %v3226_v49 = vunpack.c.l.b16 %v3192_v13  ;;  %v6369_v13 = vld [vmem:[%s6776_s24 + $0x1c] sm:$0xf] }
 0x388   : > { %v4008_v34 = vrot.slane %v4006_v31, 4  ;;  %v4025_v30 = vshll.u32 %v6289_v33, 16  ;;  %v6416_v33 = vrot.slane %v6368_v0, 9 }
 0x389   : > { %v8130_v5 = vadd.f32 %v3754_v45, %v3501_v28  ;;  %v8132_v36 = vadd.f32 %v3843_v62, %v3502_v7  ;;  %v3242_v27 = vpack.c.b16 %v3226_v49, %v3225_v50  ;;  %v4022_v7 = vor.u32 %v4021_v16, %v4017_v54  ;;  %v6291_v50 = vld [vmem:[%s6776_s24 + $0x28] sm:$0xf]  ;;  %v6370_v16 = vld [vmem:[%s6776_s24 + $0x20] sm:$0x1] }
 0x38a   : > { %v4012_v28 = vor.u32 %v4011_v57, %v4008_v34  ;;  %v4027_v57 = vrot.slane %v4025_v30, 5 }
 0x38b   : > { %8908 = vst [vmem:[#allocation20_spill] sm:$0xff] %v8130_v5  ;;  %v3845_v37 = vpop.f32.mrf.mxu1  ;;  %v3756_v51 = vpop.f32.mrf.mxu0  ;;  %v6290_v5 = vld [vmem:[%s6776_s24 + $0x24] sm:$0xf]  ;;  %v4023_v34 = vrot.slane %v4022_v7, 4 }
 0x38c   : > { %8909 = vst [vmem:[#allocation21_spill] sm:$0xff] %v8132_v36  ;;  %v4013_v49 = vrot.slane %v4012_v28, 4  ;;  %v4838_v28 = vrot.slane %v6370_v16, 5 }
 0x38d   : > { %v4028_v30 = vsel %vm6792_vm4, %v4023_v34, %v4027_v57 }
 0x38e   : > { %v3340_v41 = vpop.f32.mrf.mxu2  ;;  %v3429_v6 = vpop.f32.mrf.mxu3  ;;  %v4018_v7 = vsel %vm6792_vm4, %v4013_v49, %v4017_v54  ;;  %v4392_v54 = vunpack.c.l.b16 %v4028_v30 }
 0x38f   : > { %v3503_v45 = vadd.f32 %v3340_v41, %v7749_v43  ;;  %v3504_v62 = vadd.f32 %v3429_v6, %v7753_v61  ;;  %v4835_v61 = vrot.slane %v6369_v13, 5  ;;  %v4033_v6 = vshll.u32 %v6290_v5, 16 }
 0x391   : > { %v8138_v31 = vadd.f32 %v3756_v51, %v3503_v45  ;;  %v8140_v8 = vadd.f32 %v3845_v37, %v3504_v62  ;;  %v4030_v51 = vshrl.u32 %v6290_v5, 16  ;;  %v4039_v45 = vshll.u32 %v6291_v50, 16 }
 0x392   : > { %v4043_v62 = vshrl.u32 %v6291_v50, 16  ;;  %v4836_v5 = vsel %vm6949_vm7, %v6416_v33, %v4835_v61  ;;  %v4035_v50 = vrot.slane %v4033_v6, 5 }
 0x393   : > { %8910 = vst [vmem:[#allocation22_spill] sm:$0xff] %v8138_v31  ;;  %v3848_v36 = vpop.f32.mrf.mxu1  ;;  %6141 = vmatmul.msk.bf16.gmra.mxu2 %vm684_vm3, %v3242_v27  ;;  %6157 = vmatmul.msk.bf16.gmra.mxu3 %vm684_vm3, %v3242_v27  ;;  %v3759_v43 = vpop.f32.mrf.mxu0  ;;  %v4837_v31 = vrot.slane %v4835_v61, 4  ;;  %v4947_v34 = vunpack.c.l.b16 %v4836_v5 }
 0x394   : > { %8911 = vst [vmem:[#allocation23_spill] sm:$0xff] %v8140_v8  ;;  %v4041_v8 = vrot.slane %v4039_v45, 5  ;;  %v6372_v45 = vld [vmem:[%s6776_s24 + $0x28] sm:$0xf] }
 0x395   : > { %v4839_v49 = vsel %vm6949_vm7, %v4837_v31, %v4838_v28  ;;  %v6371_v31 = vld [vmem:[%s6776_s24 + $0x24] sm:$0xe]  ;;  %v4842_v28 = vrot.slane %v6372_v45, 5 }
 0x396   : > { %6286 = vmatmul.msk.bf16.gmra.mxu1 %vm684_vm3, %v6514_v59  ;;  %v3343_v37 = vpop.f32.mrf.mxu2  ;;  %v3432_v41 = vpop.f32.mrf.mxu3  ;;  %6270 = vmatmul.msk.bf16.gmra.mxu0 %vm684_vm3, %v6514_v59  ;;  %v4032_v59 = vrot.slane %v4030_v51, 4  ;;  %v4948_v61 = vunpack.c.l.b16 %v4839_v49 }
 0x397   : > { %v3505_v27 = vadd.f32 %v3343_v37, %v7767_v38  ;;  %v3506_v13 = vadd.f32 %v3432_v41, %v7769_v1  ;;  %v4045_v38 = vrot.slane %v4043_v62, 4  ;;  %v4391_v41 = vunpack.c.l.b16 %v4018_v7 }
 0x398   : > { %v4036_v33 = vor.u32 %v4035_v50, %v4032_v59  ;;  %v4979_v5 = vpack.c.b16 %v4948_v61, %v4947_v34  ;;  %v6373_v50 = vld [vmem:[%s6776_s24 + $0x2c] sm:$0x1] }
 0x399   : > { %v8157_v0 = vadd.f32 %v3759_v43, %v3505_v27  ;;  %v8161_v1 = vadd.f32 %v3848_v36, %v3506_v13  ;;  %v6292_v43 = vld [vmem:[%s6776_s24 + $0x2c] sm:$0x1]  ;;  %v4046_v51 = vor.u32 %v4045_v38, %v4041_v8  ;;  %v4423_v13 = vpack.c.b16 %v4392_v54, %v4391_v41 }
 0x39a   : > { %v4049_v6 = vshll.u32 %v6292_v43, 16  ;;  %v4037_v49 = vrot.slane %v4036_v33, 4  ;;  %v6294_v43 = vld [vmem:[%s6776_s24 + $0x34] sm:$0xf]  ;;  %v6417_v41 = vrot.slane %v6371_v31, 9  ;;  %v4845_v54 = vrot.slane %v6373_v50, 5 }
 0x39b   : > { %8912 = vst [vmem:[#allocation24_spill] sm:$0xff] %v8157_v0  ;;  %v3850_v37 = vpop.f32.mrf.mxu1  ;;  %v3761_v16 = vpop.f32.mrf.mxu0  ;;  %v4047_v0 = vrot.slane %v4046_v51, 4  ;;  %v4063_v45 = vshll.u32 %v6294_v43, 16 }
 0x39c   : > { %v4051_v59 = vrot.slane %v4049_v6, 5  ;;  %v4042_v34 = vsel %vm6792_vm4, %v4037_v49, %v4041_v8 }
 0x39e   : > { %v3345_v57 = vpop.f32.mrf.mxu2  ;;  %v3434_v27 = vpop.f32.mrf.mxu3 }
 0x39f   : > { %v3507_v36 = vadd.f32 %v3345_v57, %v7775_v25  ;;  %v3508_v62 = vadd.f32 %v3434_v27, %v7779_v22  ;;  %v6293_v22 = vld [vmem:[%s6776_s24 + $0x30] sm:$0xf]  ;;  %v4052_v27 = vsel %vm6792_vm4, %v4047_v0, %v4051_v59  ;;  %v4843_v0 = vsel %vm6949_vm7, %v6417_v41, %v4842_v28  ;;  %v6375_v41 = vld [vmem:[%s6776_s24 + $0x34] sm:$0xf] }
 0x3a0   : > { %v4054_v61 = vshrl.u32 %v6293_v22, 16  ;;  %v4057_v33 = vshll.u32 %v6293_v22, 16  ;;  %v4394_v31 = vunpack.c.l.b16 %v4052_v27 }
 0x3a1   : > { %v8169_v7 = vadd.f32 %v3761_v16, %v3507_v36  ;;  %v8172_v30 = vadd.f32 %v3850_v37, %v3508_v62  ;;  %v4844_v16 = vrot.slane %v4842_v28, 4  ;;  %v4067_v36 = vshrl.u32 %v6294_v43, 16 }
 0x3a2   : > { %v4059_v50 = vrot.slane %v4057_v33, 5 }
 0x3a3   : > { %8913 = vst [vmem:[#allocation31_spill] sm:$0xff] %v8169_v7  ;;  %v3853_v38 = vpop.f32.mrf.mxu1  ;;  %6336 = vmatmul.msk.bf16.vlgmr.msra.gmra.mxu2 %vm684_vm3, %v4423_v13  ;;  %6352 = vmatmul.msk.bf16.vlgmr.msra.gmra.mxu3 %vm684_vm3, %v4423_v13  ;;  %v3764_v25 = vpop.f32.mrf.mxu0  ;;  %v4393_v13 = vunpack.c.l.b16 %v4042_v34  ;;  %v4069_v59 = vrot.slane %v4067_v36, 4 }
 0x3a6   : > { %6449 = vmatmul.msk.bf16.vlgmr.msra.gmra.mxu1 %vm684_vm3, %v4979_v5  ;;  %v3348_v37 = vpop.f32.mrf.mxu2  ;;  %v3437_v57 = vpop.f32.mrf.mxu3  ;;  %6433 = vmatmul.msk.bf16.vlgmr.msra.gmra.mxu0 %vm684_vm3, %v4979_v5  ;;  %v4056_v5 = vrot.slane %v4054_v61, 4 }
 0x3a7   : > { %v3509_v51 = vadd.f32 %v3348_v37, %v7792_v52  ;;  %v3510_v6 = vadd.f32 %v3437_v57, %v7794_v58  ;;  %v4846_v52 = vsel %vm6949_vm7, %v4844_v16, %v4845_v54  ;;  %v4065_v58 = vrot.slane %v4063_v45, 5 }
 0x3a8   : > { %v4424_v37 = vpack.c.b16 %v4394_v31, %v4393_v13  ;;  %v4949_v57 = vunpack.c.l.b16 %v4843_v0  ;;  %v4950_v34 = vunpack.c.l.b16 %v4846_v52  ;;  %v4849_v45 = vrot.slane %v6375_v41, 5  ;;  %v6297_v0 = vld [vmem:[%s6776_s24 + $0x40] sm:$0xf] }
 0x3a9   : > { %v8187_v62 = vadd.f32 %v3764_v25, %v3509_v51  ;;  %v8189_v7 = vadd.f32 %v3853_v38, %v3510_v6  ;;  %v6295_v25 = vld [vmem:[%s6776_s24 + $0x38] sm:$0x1]  ;;  %v4060_v38 = vor.u32 %v4059_v50, %v4056_v5  ;;  %v4070_v33 = vor.u32 %v4069_v59, %v4065_v58  ;;  %v6374_v6 = vld [vmem:[%s6776_s24 + $0x30] sm:$0xe]  ;;  %v6296_v50 = vld [vmem:[%s6776_s24 + $0x3c] sm:$0xf] }
 0x3aa   : > { %v4073_v28 = vshll.u32 %v6295_v25, 16  ;;  %v4980_v51 = vpack.c.b16 %v4950_v34, %v4949_v57  ;;  %v6376_v5 = vld [vmem:[%s6776_s24 + $0x38] sm:$0x1]  ;;  %v6418_v52 = vrot.slane %v6374_v6, 9  ;;  %v4851_v59 = vrot.slane %v4849_v45, 4 }
 0x3ab   : > { %v3855_v8 = vpop.f32.mrf.mxu1  ;;  %v3766_v49 = vpop.f32.mrf.mxu0  ;;  %v4071_v13 = vrot.slane %v4070_v33, 4  ;;  %v4852_v25 = vrot.slane %v6376_v5, 5  ;;  %v4078_v34 = vshrl.u32 %v6296_v50, 16 }
 0x3ac   : > { %v4075_v31 = vrot.slane %v4073_v28, 5 }
 0x3ae   : > { %v3350_v22 = vpop.f32.mrf.mxu2  ;;  %v3439_v43 = vpop.f32.mrf.mxu3  ;;  %v4076_v57 = vsel %vm6792_vm4, %v4071_v13, %v4075_v31 }
 0x3af   : > { %v3511_v27 = vadd.f32 %v3350_v22, %v7799_v55  ;;  %v3512_v61 = vadd.f32 %v3439_v43, %v7803_v40  ;;  %v4061_v40 = vrot.slane %v4060_v38, 4  ;;  %v4081_v38 = vshll.u32 %v6296_v50, 16 }
 0x3b0   : > { %v4396_v6 = vunpack.c.l.b16 %v4076_v57 }
 0x3b1   : > { %v8199_v16 = vadd.f32 %v3766_v49, %v3511_v27  ;;  %v8201_v54 = vadd.f32 %v3855_v8, %v3512_v61  ;;  %v4087_v27 = vshll.u32 %v6297_v0, 16  ;;  %v4091_v61 = vshrl.u32 %v6297_v0, 16 }
 0x3b2   : > { %v4083_v13 = vrot.slane %v4081_v38, 5  ;;  %v6377_v38 = vld [vmem:[%s6776_s24 + $0x3c] sm:$0xe] }
 0x3b3   : > { %v3858_v36 = vpop.f32.mrf.mxu1  ;;  %6337 = vmatmul.msk.bf16.gmra.mxu2 %vm684_vm3, %v4424_v37  ;;  %6353 = vmatmul.msk.bf16.gmra.mxu3 %vm684_vm3, %v4424_v37  ;;  %v3769_v55 = vpop.f32.mrf.mxu0  ;;  %v4066_v37 = vsel %vm6792_vm4, %v4061_v40, %v4065_v58  ;;  %v4853_v58 = vsel %vm6949_vm7, %v4851_v59, %v4852_v25  ;;  %v4080_v40 = vrot.slane %v4078_v34, 4  ;;  %v4089_v31 = vrot.slane %v4087_v27, 5  ;;  %v6299_v27 = vld [vmem:[%s6776_s24 + $0x48] sm:$0xf] }
 0x3b4   : > { %v4093_v5 = vrot.slane %v4091_v61, 4 }
 0x3b6   : > { %6450 = vmatmul.msk.bf16.gmra.mxu1 %vm684_vm3, %v4980_v51  ;;  %v3353_v49 = vpop.f32.mrf.mxu2  ;;  %v3442_v8 = vpop.f32.mrf.mxu3  ;;  %6434 = vmatmul.msk.bf16.gmra.mxu0 %vm684_vm3, %v4980_v51  ;;  %v4094_v59 = vor.u32 %v4093_v5, %v4089_v31 }
 0x3b7   : > { %v3513_v22 = vadd.f32 %v3353_v49, %v7816_v4  ;;  %v3514_v43 = vadd.f32 %v3442_v8, %v7818_v39  ;;  %v4395_v4 = vunpack.c.l.b16 %v4066_v37  ;;  %v4850_v39 = vsel %vm6949_vm7, %v6418_v52, %v4849_v45 }
 0x3b8   : > { %v4951_v0 = vunpack.c.l.b16 %v4850_v39  ;;  %v4952_v49 = vunpack.c.l.b16 %v4853_v58  ;;  %v4084_v52 = vor.u32 %v4083_v13, %v4080_v40  ;;  %v4095_v39 = vrot.slane %v4094_v59, 4  ;;  %v6379_v40 = vld [vmem:[%s6776_s24 + $0x44] sm:$0x1] }
 0x3b9   : > { %v8217_v33 = vadd.f32 %v3769_v55, %v3513_v22  ;;  %v8219_v28 = vadd.f32 %v3858_v36, %v3514_v43  ;;  %v6298_v55 = vld [vmem:[%s6776_s24 + $0x44] sm:$0x1]  ;;  %v4425_v45 = vpack.c.b16 %v4396_v6, %v4395_v4  ;;  %v6378_v43 = vld [vmem:[%s6776_s24 + $0x40] sm:$0xf]  ;;  %v6300_v4 = vld [vmem:[%s6776_s24 + $0x4c] sm:$0xf] }
 0x3ba   : > { %v4097_v25 = vshll.u32 %v6298_v55, 16  ;;  %v4981_v34 = vpack.c.b16 %v4952_v49, %v4951_v0  ;;  %v4085_v6 = vrot.slane %v4084_v52, 4  ;;  %v6419_v13 = vrot.slane %v6377_v38, 9  ;;  %v8915_v49 = vld [vmem:[#allocation25_spill] sm:$0xff] }
 0x3bb   : > { %v3860_v41 = vpop.f32.mrf.mxu1  ;;  %v3771_v51 = vpop.f32.mrf.mxu0  ;;  %v4105_v55 = vshll.u32 %v6299_v27, 16 }
 0x3bc   : > { %v4099_v58 = vrot.slane %v4097_v25, 5  ;;  %v4090_v52 = vsel %vm6792_vm4, %v4085_v6, %v4089_v31 }
 0x3bd   : > { %v4107_v38 = vrot.slane %v4105_v55, 5 }
 0x3be   : > { %v3355_v36 = vpop.f32.mrf.mxu2  ;;  %v3444_v50 = vpop.f32.mrf.mxu3  ;;  %v4100_v59 = vsel %vm6792_vm4, %v4095_v39, %v4099_v58 }
 0x3bf   : > { %v3515_v8 = vadd.f32 %v3355_v36, %v7823_v23  ;;  %v3516_v22 = vadd.f32 %v3444_v50, %v7827_v32  ;;  %v4856_v32 = vrot.slane %v6378_v43, 5  ;;  %v4111_v36 = vshll.u32 %v6300_v4, 16 }
 0x3c0   : > { %v4115_v50 = vshrl.u32 %v6300_v4, 16  ;;  %v4398_v31 = vunpack.c.l.b16 %v4100_v59 }
 0x3c1   : > { %v8229_v37 = vadd.f32 %v3771_v51, %v3515_v8  ;;  %v8231_v57 = vadd.f32 %v3860_v41, %v3516_v22  ;;  %v4102_v51 = vshrl.u32 %v6299_v27, 16  ;;  %v4858_v22 = vrot.slane %v4856_v32, 4 }
 0x3c2   : > { %v4857_v43 = vsel %vm6949_vm7, %v6419_v13, %v4856_v32  ;;  %v4113_v27 = vrot.slane %v4111_v36, 5  ;;  %v6381_v36 = vld [vmem:[%s6776_s24 + $0x4c] sm:$0xf] }
 0x3c3   : > { %8914 = vst [vmem:[#allocation32_spill] sm:$0xff] %v8229_v37  ;;  %v3863_v61 = vpop.f32.mrf.mxu1  ;;  %6338 = vmatmul.msk.bf16.gmra.mxu2 %vm684_vm3, %v4425_v45  ;;  %6354 = vmatmul.msk.bf16.gmra.mxu3 %vm684_vm3, %v4425_v45  ;;  %v3774_v23 = vpop.f32.mrf.mxu0  ;;  %v4859_v45 = vrot.slane %v6379_v40, 5  ;;  %v4953_v39 = vunpack.c.l.b16 %v4857_v43 }
 0x3c5   : > { %v4860_v6 = vsel %vm6949_vm7, %v4858_v22, %v4859_v45  ;;  %v6380_v22 = vld [vmem:[%s6776_s24 + $0x48] sm:$0xe]  ;;  %v4863_v45 = vrot.slane %v6381_v36, 5 }
 0x3c6   : > { %6451 = vmatmul.msk.bf16.gmra.mxu1 %vm684_vm3, %v4981_v34  ;;  %v3358_v41 = vpop.f32.mrf.mxu2  ;;  %v3447_v5 = vpop.f32.mrf.mxu3  ;;  %6435 = vmatmul.msk.bf16.gmra.mxu0 %vm684_vm3, %v4981_v34  ;;  %v4104_v34 = vrot.slane %v4102_v51, 4  ;;  %v4954_v32 = vunpack.c.l.b16 %v4860_v6 }
 0x3c7   : > { %v3517_v0 = vadd.f32 %v3358_v41, %v7840_v26  ;;  %v3518_v8 = vadd.f32 %v3447_v5, %v8915_v49  ;;  %v4117_v26 = vrot.slane %v4115_v50, 4  ;;  %v4397_v5 = vunpack.c.l.b16 %v4090_v52  ;;  %v8919_v49 = vld [vmem:[#allocation27_spill] sm:$0xff] }
 0x3c8   : > { %v4108_v13 = vor.u32 %v4107_v38, %v4104_v34  ;;  %v6382_v38 = vld [vmem:[%s6776_s24 + $0x50] sm:$0x1] }
 0x3c9   : > { %v8247_v25 = vadd.f32 %v3774_v23, %v3517_v0  ;;  %v8251_v4 = vadd.f32 %v3863_v61, %v3518_v8  ;;  %v6301_v23 = vld [vmem:[%s6776_s24 + $0x50] sm:$0x1]  ;;  %v4118_v51 = vor.u32 %v4117_v26, %v4113_v27  ;;  %v8918_v61 = vld [vmem:[#allocation26_spill] sm:$0xff]  ;;  %v4426_v52 = vpack.c.b16 %v4398_v31, %v4397_v5 }
 0x3ca   : > { %v4121_v55 = vshll.u32 %v6301_v23, 16  ;;  %v4109_v6 = vrot.slane %v4108_v13, 4  ;;  %v6420_v5 = vrot.slane %v6380_v22, 9  ;;  %v4866_v31 = vrot.slane %v6382_v38, 5 }
 0x3cb   : > { %8916 = vst [vmem:[#allocation25_spill] sm:$0xff] %v8247_v25  ;;  %v3865_v41 = vpop.f32.mrf.mxu1  ;;  %v3776_v40 = vpop.f32.mrf.mxu0  ;;  %v4982_v25 = vpack.c.b16 %v4954_v32, %v4953_v39  ;;  %v4119_v37 = vrot.slane %v4118_v51, 4 }
 0x3cc   : > { %8917 = vst [vmem:[#allocation33_spill] sm:$0xff] %v8251_v4  ;;  %v4123_v34 = vrot.slane %v4121_v55, 5  ;;  %v4114_v39 = vsel %vm6792_vm4, %v4109_v6, %v4113_v27  ;;  %v8922_v55 = vld [vmem:[#allocation28_spill] sm:$0xff] }
 0x3cd   : > { %v4399_v38 = vunpack.c.l.b16 %v4114_v39 }
 0x3ce   : > { %v3360_v58 = vpop.f32.mrf.mxu2  ;;  %v3449_v0 = vpop.f32.mrf.mxu3  ;;  %v4124_v32 = vsel %vm6792_vm4, %v4119_v37, %v4123_v34  ;;  %v4864_v37 = vsel %vm6949_vm7, %v6420_v5, %v4863_v45  ;;  %v6384_v5 = vld [vmem:[%s6776_s24 + $0x58] sm:$0xf] }
 0x3cf   : > { %v3519_v50 = vadd.f32 %v3360_v58, %v8918_v61  ;;  %v3520_v8 = vadd.f32 %v3449_v0, %v8919_v49  ;;  %v6302_v58 = vld [vmem:[%s6776_s24 + $0x54] sm:$0xf]  ;;  %v6303_v0 = vld [vmem:[%s6776_s24 + $0x58] sm:$0xf] }
 0x3d0   : > { %v4126_v13 = vshrl.u32 %v6302_v58, 16  ;;  %v4129_v51 = vshll.u32 %v6302_v58, 16 }
 0x3d1   : > { %v8259_v59 = vadd.f32 %v3776_v40, %v3519_v50  ;;  %v8262_v43 = vadd.f32 %v3865_v41, %v3520_v8  ;;  %v4865_v40 = vrot.slane %v4863_v45, 4  ;;  %v8923_v50 = vld [vmem:[#allocation2_spill] sm:$0xff]  ;;  %v4135_v8 = vshll.u32 %v6303_v0, 16 }
 0x3d3   : > { %8920 = vst [vmem:[#allocation26_spill] sm:$0xff] %v8259_v59  ;;  %v3868_v26 = vpop.f32.mrf.mxu1  ;;  %6339 = vmatmul.msk.bf16.gmra.mxu2 %vm684_vm3, %v4426_v52  ;;  %6355 = vmatmul.msk.bf16.gmra.mxu3 %vm684_vm3, %v4426_v52  ;;  %v3779_v23 = vpop.f32.mrf.mxu0  ;;  %v4139_v52 = vshrl.u32 %v6303_v0, 16  ;;  %v4400_v59 = vunpack.c.l.b16 %v4124_v32  ;;  %v4867_v34 = vsel %vm6949_vm7, %v4865_v40, %v4866_v31  ;;  %v4137_v58 = vrot.slane %v4135_v8, 5 }
 0x3d4   : > { %8921 = vst [vmem:[#allocation27_spill] sm:$0xff] %v8262_v43  ;;  %v4131_v43 = vrot.slane %v4129_v51, 5  ;;  %v4955_v32 = vunpack.c.l.b16 %v4864_v37  ;;  %v8925_v51 = vld [vmem:[#allocation29_spill] sm:$0xff] }
 0x3d5   : > { %v4427_v39 = vpack.c.b16 %v4400_v59, %v4399_v38  ;;  %v4870_v59 = vrot.slane %v6384_v5, 5 }
 0x3d6   : > { %6452 = vmatmul.msk.bf16.gmra.mxu1 %vm684_vm3, %v4982_v25  ;;  %v3363_v41 = vpop.f32.mrf.mxu2  ;;  %v3452_v36 = vpop.f32.mrf.mxu3  ;;  %6436 = vmatmul.msk.bf16.gmra.mxu0 %vm684_vm3, %v4982_v25  ;;  %v4128_v25 = vrot.slane %v4126_v13, 4  ;;  %v4956_v13 = vunpack.c.l.b16 %v4867_v34 }
 0x3d7   : > { %v3521_v61 = vadd.f32 %v3363_v41, %v8922_v55  ;;  %v3522_v49 = vadd.f32 %v3452_v36, %v8923_v50  ;;  %v4141_v41 = vrot.slane %v4139_v52, 4  ;;  %v6383_v52 = vld [vmem:[%s6776_s24 + $0x54] sm:$0xe] }
 0x3d8   : > { %v4983_v8 = vpack.c.b16 %v4956_v13, %v4955_v32  ;;  %v4872_v32 = vrot.slane %v4870_v59, 4 }
 0x3d9   : > { %v8277_v22 = vadd.f32 %v3779_v23, %v3521_v61  ;;  %v8279_v4 = vadd.f32 %v3868_v26, %v3522_v49  ;;  %v6304_v23 = vld [vmem:[%s6776_s24 + $0x5c] sm:$0x1]  ;;  %v4132_v26 = vor.u32 %v4131_v43, %v4128_v25  ;;  %v8926_v61 = vld [vmem:[#allocation30_spill] sm:$0xff]  ;;  %v4142_v49 = vor.u32 %v4141_v41, %v4137_v58 }
 0x3da   : > { %v4145_v45 = vshll.u32 %v6304_v23, 16  ;;  %v6385_v41 = vld [vmem:[%s6776_s24 + $0x5c] sm:$0x1]  ;;  %v6305_v23 = vld [vmem:[%s6776_s24 + $0x60] sm:$0xf] }
 0x3db   : > { %8924 = vst [vmem:[#allocation28_spill] sm:$0xff] %v8277_v22  ;;  %v3870_v27 = vpop.f32.mrf.mxu1  ;;  %v3781_v6 = vpop.f32.mrf.mxu0  ;;  %v4133_v25 = vrot.slane %v4132_v26, 4  ;;  %v4143_v37 = vrot.slane %v4142_v49, 4  ;;  %v4873_v13 = vrot.slane %v6385_v41, 5  ;;  %v4150_v49 = vshrl.u32 %v6305_v23, 16 }
 0x3dc   : > { %v4147_v34 = vrot.slane %v4145_v45, 5  ;;  %v4153_v45 = vshll.u32 %v6305_v23, 16 }
 0x3dd   : > { %v4138_v26 = vsel %vm6792_vm4, %v4133_v25, %v4137_v58  ;;  %v4874_v58 = vsel %vm6949_vm7, %v4872_v32, %v4873_v13  ;;  %v4152_v25 = vrot.slane %v4150_v49, 4  ;;  %v6387_v49 = vld [vmem:[%s6776_s24 + $0x64] sm:$0xf] }
 0x3de   : > { %v3365_v0 = vpop.f32.mrf.mxu2  ;;  %v3454_v36 = vpop.f32.mrf.mxu3 }
 0x3df   : > { %v3523_v55 = vadd.f32 %v3365_v0, %v8925_v51  ;;  %v3524_v50 = vadd.f32 %v3454_v36, %v8926_v61  ;;  %v6306_v0 = vld [vmem:[%s6776_s24 + $0x64] sm:$0xf]  ;;  %v6421_v36 = vrot.slane %v6383_v52, 9  ;;  %v8929_v51 = vld [vmem:[#allocation3_spill] sm:$0xff]  ;;  %v8930_v61 = vld [vmem:[#allocation4_spill] sm:$0xff] }
 0x3e0   : > { %v4159_v5 = vshll.u32 %v6306_v0, 16 }
 0x3e1   : > { %v8289_v40 = vadd.f32 %v3781_v6, %v3523_v55  ;;  %v8291_v31 = vadd.f32 %v3870_v27, %v3524_v50  ;;  %v4148_v50 = vsel %vm6792_vm4, %v4143_v37, %v4147_v34  ;;  %v4155_v37 = vrot.slane %v4153_v45, 5 }
 0x3e2   : > { %v4161_v34 = vrot.slane %v4159_v5, 5 }
 0x3e3   : > { %8927 = vst [vmem:[#allocation2_spill] sm:$0xff] %v8289_v40  ;;  %v3873_v38 = vpop.f32.mrf.mxu1  ;;  %6340 = vmatmul.msk.bf16.gmra.mxu2 %vm684_vm3, %v4427_v39  ;;  %6356 = vmatmul.msk.bf16.gmra.mxu3 %vm684_vm3, %v4427_v39  ;;  %v3784_v43 = vpop.f32.mrf.mxu0  ;;  %v4163_v40 = vshrl.u32 %v6306_v0, 16 }
 0x3e4   : > { %8928 = vst [vmem:[#allocation29_spill] sm:$0xff] %v8291_v31  ;;  %v6308_v31 = vld [vmem:[%s6776_s24 + $0x6c] sm:$0xf] }
 0x3e5   : > { %v4165_v23 = vrot.slane %v4163_v40, 4 }
 0x3e6   : > { %6453 = vmatmul.msk.bf16.gmra.mxu1 %vm684_vm3, %v4983_v8  ;;  %v3368_v6 = vpop.f32.mrf.mxu2  ;;  %v3457_v27 = vpop.f32.mrf.mxu3  ;;  %6437 = vmatmul.msk.bf16.gmra.mxu0 %vm684_vm3, %v4983_v8 }
 0x3e7   : > { %v3525_v55 = vadd.f32 %v3368_v6, %v8929_v51  ;;  %v3526_v39 = vadd.f32 %v3457_v27, %v8930_v61  ;;  %v4401_v6 = vunpack.c.l.b16 %v4138_v26  ;;  %v4402_v51 = vunpack.c.l.b16 %v4148_v50  ;;  %v8934_v50 = vld [vmem:[#allocation6_spill] sm:$0xff] }
 0x3e8   : > { %v4871_v27 = vsel %vm6949_vm7, %v6421_v36, %v4870_v59  ;;  %v4958_v61 = vunpack.c.l.b16 %v4874_v58  ;;  %v4156_v36 = vor.u32 %v4155_v37, %v4152_v25  ;;  %v4166_v32 = vor.u32 %v4165_v23, %v4161_v34  ;;  %v6388_v23 = vld [vmem:[%s6776_s24 + $0x68] sm:$0x1] }
 0x3e9   : > { %v8307_v22 = vadd.f32 %v3784_v43, %v3525_v55  ;;  %v8309_v8 = vadd.f32 %v3873_v38, %v3526_v39  ;;  %v6307_v43 = vld [vmem:[%s6776_s24 + $0x68] sm:$0x1]  ;;  %v4957_v55 = vunpack.c.l.b16 %v4871_v27  ;;  %v8933_v39 = vld [vmem:[#allocation5_spill] sm:$0xff]  ;;  %v4428_v59 = vpack.c.b16 %v4402_v51, %v4401_v6  ;;  %v6309_v6 = vld [vmem:[%s6776_s24 + $0x70] sm:$0xf] }
 0x3ea   : > { %v4169_v13 = vshll.u32 %v6307_v43, 16  ;;  %v4157_v51 = vrot.slane %v4156_v36, 4  ;;  %v4167_v25 = vrot.slane %v4166_v32, 4  ;;  %v4880_v36 = vrot.slane %v6388_v23, 5 }
 0x3eb   : > { %8931 = vst [vmem:[#allocation30_spill] sm:$0xff] %v8307_v22  ;;  %v3875_v52 = vpop.f32.mrf.mxu1  ;;  %v3786_v41 = vpop.f32.mrf.mxu0  ;;  %v4984_v5 = vpack.c.b16 %v4958_v61, %v4957_v55  ;;  %v4183_v55 = vshll.u32 %v6309_v6, 16  ;;  %v4187_v61 = vshrl.u32 %v6309_v6, 16 }
 0x3ec   : > { %8932 = vst [vmem:[#allocation3_spill] sm:$0xff] %v8309_v8  ;;  %v6386_v8 = vld [vmem:[%s6776_s24 + $0x60] sm:$0xe]  ;;  %v4171_v37 = vrot.slane %v4169_v13, 5 }
 0x3ed   : > { %v6422_v43 = vrot.slane %v6386_v8, 9  ;;  %v4162_v8 = vsel %vm6792_vm4, %v4157_v51, %v4161_v34 }
 0x3ee   : > { %v3370_v38 = vpop.f32.mrf.mxu2  ;;  %v3459_v0 = vpop.f32.mrf.mxu3  ;;  %v4172_v32 = vsel %vm6792_vm4, %v4167_v25, %v4171_v37 }
 0x3ef   : > { %v3527_v26 = vadd.f32 %v3370_v38, %v8933_v39  ;;  %v3528_v22 = vadd.f32 %v3459_v0, %v8934_v50  ;;  %v4877_v38 = vrot.slane %v6387_v49, 5  ;;  %v4177_v0 = vshll.u32 %v6308_v31, 16  ;;  %v8937_v39 = vld [vmem:[#allocation7_spill] sm:$0xff]  ;;  %v8938_v50 = vld [vmem:[#allocation8_spill] sm:$0xff] }
 0x3f0   : > { %v4404_v34 = vunpack.c.l.b16 %v4172_v32 }
 0x3f1   : > { %v8319_v45 = vadd.f32 %v3786_v41, %v3527_v26  ;;  %v8321_v40 = vadd.f32 %v3875_v52, %v3528_v22  ;;  %v4174_v41 = vshrl.u32 %v6308_v31, 16  ;;  %v4879_v49 = vrot.slane %v4877_v38, 4 }
 0x3f2   : > { %v4878_v31 = vsel %vm6949_vm7, %v6422_v43, %v4877_v38  ;;  %v4179_v6 = vrot.slane %v4177_v0, 5 }
 0x3f3   : > { %8935 = vst [vmem:[#allocation4_spill] sm:$0xff] %v8319_v45  ;;  %v3878_v27 = vpop.f32.mrf.mxu1  ;;  %6341 = vmatmul.msk.bf16.gmra.mxu2 %vm684_vm3, %v4428_v59  ;;  %6357 = vmatmul.msk.bf16.gmra.mxu3 %vm684_vm3, %v4428_v59  ;;  %v3789_v58 = vpop.f32.mrf.mxu0  ;;  %v4185_v45 = vrot.slane %v4183_v55, 5  ;;  %v4881_v51 = vsel %vm6949_vm7, %v4879_v49, %v4880_v36  ;;  %v4959_v25 = vunpack.c.l.b16 %v4878_v31  ;;  %v6390_v55 = vld [vmem:[%s6776_s24 + $0x70] sm:$0xf]  ;;  %v6389_v49 = vld [vmem:[%s6776_s24 + $0x6c] sm:$0xe] }
 0x3f4   : > { %8936 = vst [vmem:[#allocation5_spill] sm:$0xff] %v8321_v40  ;;  %v4960_v38 = vunpack.c.l.b16 %v4881_v51  ;;  %v4884_v36 = vrot.slane %v6390_v55, 5 }
 0x3f6   : > { %6454 = vmatmul.msk.bf16.gmra.mxu1 %vm684_vm3, %v4984_v5  ;;  %v3373_v22 = vpop.f32.mrf.mxu2  ;;  %v3462_v52 = vpop.f32.mrf.mxu3  ;;  %6438 = vmatmul.msk.bf16.gmra.mxu0 %vm684_vm3, %v4984_v5  ;;  %v4176_v5 = vrot.slane %v4174_v41, 4 }
 0x3f7   : > { %v3529_v26 = vadd.f32 %v3373_v22, %v8937_v39  ;;  %v3530_v59 = vadd.f32 %v3462_v52, %v8938_v50  ;;  %v4189_v22 = vrot.slane %v4187_v61, 4  ;;  %v4403_v50 = vunpack.c.l.b16 %v4162_v8 }
 0x3f8   : > { %v4180_v43 = vor.u32 %v4179_v6, %v4176_v5  ;;  %v6391_v6 = vld [vmem:[%s6776_s24 + $0x74] sm:$0x1] }
 0x3f9   : > { %v8337_v13 = vadd.f32 %v3789_v58, %v3529_v26  ;;  %v8341_v52 = vadd.f32 %v3878_v27, %v3530_v59  ;;  %v6310_v58 = vld [vmem:[%s6776_s24 + $0x74] sm:$0x1]  ;;  %v4190_v41 = vor.u32 %v4189_v22, %v4185_v45  ;;  %v8941_v27 = vld [vmem:[#allocation9_spill] sm:$0xff]  ;;  %v8942_v59 = vld [vmem:[#allocation10_spill] sm:$0xff]  ;;  %v4429_v32 = vpack.c.b16 %v4404_v34, %v4403_v50 }
 0x3fa   : > { %v4193_v0 = vshll.u32 %v6310_v58, 16  ;;  %v4181_v51 = vrot.slane %v4180_v43, 4  ;;  %v6423_v50 = vrot.slane %v6389_v49, 9  ;;  %v4887_v34 = vrot.slane %v6391_v6, 5 }
 0x3fb   : > { %8939 = vst [vmem:[#allocation6_spill] sm:$0xff] %v8337_v13  ;;  %v3880_v39 = vpop.f32.mrf.mxu1  ;;  %v3791_v23 = vpop.f32.mrf.mxu0  ;;  %v4191_v40 = vrot.slane %v4190_v41, 4 }
 0x3fc   : > { %8940 = vst [vmem:[#allocation7_spill] sm:$0xff] %v8341_v52  ;;  %v4985_v52 = vpack.c.b16 %v4960_v38, %v4959_v25  ;;  %v4195_v5 = vrot.slane %v4193_v0, 5  ;;  %v4186_v25 = vsel %vm6792_vm4, %v4181_v51, %v4185_v45 }
 0x3fd   : > { %v4405_v49 = vunpack.c.l.b16 %v4186_v25 }
 0x3fe   : > { %v3375_v37 = vpop.f32.mrf.mxu2  ;;  %v3464_v26 = vpop.f32.mrf.mxu3  ;;  %v4196_v38 = vsel %vm6792_vm4, %v4191_v40, %v4195_v5  ;;  %v4885_v40 = vsel %vm6949_vm7, %v6423_v50, %v4884_v36  ;;  %v6393_v50 = vld [vmem:[%s6776_s24 + $0x7c] sm:$0xf] }
 0x3ff   : > { %v3531_v61 = vadd.f32 %v3375_v37, %v8941_v27  ;;  %v3532_v8 = vadd.f32 %v3464_v26, %v8942_v59  ;;  %v6311_v37 = vld [vmem:[%s6776_s24 + $0x78] sm:$0xf]  ;;  %v6312_v26 = vld [vmem:[%s6776_s24 + $0x7c] sm:$0xf]  ;;  %v8945_v27 = vld [vmem:[#allocation11_spill] sm:$0xff]  ;;  %v4406_v6 = vunpack.c.l.b16 %v4196_v38  ;;  %v4961_v25 = vunpack.c.l.b16 %v4885_v40 }
 0x400   : > { %v4198_v43 = vshrl.u32 %v6311_v37, 16  ;;  %v4201_v41 = vshll.u32 %v6311_v37, 16  ;;  %v4207_v59 = vshll.u32 %v6312_v26, 16  ;;  %v6394_v40 = vld [vmem:[%s6776_s24 + $0x80] sm:$0x1] }
 0x401   : > { %v8349_v13 = vadd.f32 %v3791_v23, %v3531_v61  ;;  %v8352_v31 = vadd.f32 %v3880_v39, %v3532_v8  ;;  %v4886_v23 = vrot.slane %v4884_v36, 4  ;;  %v4211_v8 = vshrl.u32 %v6312_v26, 16 }
 0x402   : > { %v4209_v5 = vrot.slane %v4207_v59, 5  ;;  %v6392_v59 = vld [vmem:[%s6776_s24 + $0x78] sm:$0xe] }
 0x403   : > { %8943 = vst [vmem:[#allocation8_spill] sm:$0xff] %v8349_v13  ;;  %v3883_v22 = vpop.f32.mrf.mxu1  ;;  %6342 = vmatmul.msk.bf16.gmra.mxu2 %vm684_vm3, %v4429_v32  ;;  %6358 = vmatmul.msk.bf16.gmra.mxu3 %vm684_vm3, %v4429_v32  ;;  %v3794_v58 = vpop.f32.mrf.mxu0  ;;  %v4203_v13 = vrot.slane %v4201_v41, 5  ;;  %v4213_v37 = vrot.slane %v4211_v8, 4  ;;  %v8946_v41 = vld [vmem:[#allocation12_spill] sm:$0xff]  ;;  %v4891_v8 = vrot.slane %v6393_v50, 5 }
 0x404   : > { %8944 = vst [vmem:[#allocation9_spill] sm:$0xff] %v8352_v31 }
 0x406   : > { %6455 = vmatmul.msk.bf16.gmra.mxu1 %vm684_vm3, %v4985_v52  ;;  %v3378_v39 = vpop.f32.mrf.mxu2  ;;  %v3467_v55 = vpop.f32.mrf.mxu3  ;;  %6439 = vmatmul.msk.bf16.gmra.mxu0 %vm684_vm3, %v4985_v52  ;;  %v4200_v52 = vrot.slane %v4198_v43, 4 }
 0x407   : > { %v3533_v0 = vadd.f32 %v3378_v39, %v7936_v11  ;;  %v3534_v61 = vadd.f32 %v3467_v55, %v8945_v27  ;;  %v4888_v11 = vsel %vm6949_vm7, %v4886_v23, %v4887_v34  ;;  %v4430_v55 = vpack.c.b16 %v4406_v6, %v4405_v49 }
 0x408   : > { %v4962_v38 = vunpack.c.l.b16 %v4888_v11  ;;  %v4214_v27 = vor.u32 %v4213_v37, %v4209_v5  ;;  %v6314_v11 = vld [vmem:[%s6776_s24 + $0x84] sm:$0xf]  ;;  %v6315_v37 = vld [vmem:[%s6776_s24 + $0x88] sm:$0xf] }
 0x409   : > { %v8367_v32 = vadd.f32 %v3794_v58, %v3533_v0  ;;  %v8369_v31 = vadd.f32 %v3883_v22, %v3534_v61  ;;  %v6313_v58 = vld [vmem:[%s6776_s24 + $0x80] sm:$0x1]  ;;  %v4204_v22 = vor.u32 %v4203_v13, %v4200_v52 }
 0x40a   : > { %v4217_v36 = vshll.u32 %v6313_v58, 16  ;;  %v4986_v61 = vpack.c.b16 %v4962_v38, %v4961_v25  ;;  %v4215_v6 = vrot.slane %v4214_v27, 4  ;;  %v6424_v58 = vrot.slane %v6392_v59, 9  ;;  %v8948_v38 = vld [vmem:[#allocation13_spill] sm:$0xff] }
 0x40b   : > { %v3885_v45 = vpop.f32.mrf.mxu1  ;;  %v3796_v51 = vpop.f32.mrf.mxu0  ;;  %v4205_v13 = vrot.slane %v4204_v22, 4  ;;  %v4231_v27 = vshll.u32 %v6315_v37, 16 }
 0x40c   : > { %v4219_v52 = vrot.slane %v4217_v36, 5  ;;  %v4235_v36 = vshrl.u32 %v6315_v37, 16  ;;  %v6316_v37 = vld [vmem:[%s6776_s24 + $0x8c] sm:$0x1] }
 0x40d   : > { %v4210_v22 = vsel %vm6792_vm4, %v4205_v13, %v4209_v5 }
 0x40e   : > { %v3380_v26 = vpop.f32.mrf.mxu2  ;;  %v3469_v39 = vpop.f32.mrf.mxu3 }
 0x40f   : > { %v3535_v43 = vadd.f32 %v3380_v26, %v7943_v35  ;;  %v3536_v0 = vadd.f32 %v3469_v39, %v8946_v41  ;;  %v4893_v26 = vrot.slane %v4891_v8, 4  ;;  %v4894_v39 = vrot.slane %v6394_v40, 5 }
 0x410   : > { %v4222_v41 = vshrl.u32 %v6314_v11, 16 }
 0x411   : > { %v8379_v23 = vadd.f32 %v3796_v51, %v3535_v43  ;;  %v8381_v34 = vadd.f32 %v3885_v45, %v3536_v0  ;;  %v4220_v43 = vsel %vm6792_vm4, %v4215_v6, %v4219_v52  ;;  %v4225_v0 = vshll.u32 %v6314_v11, 16 }
 0x412   : > { %v4895_v5 = vsel %vm6949_vm7, %v4893_v26, %v4894_v39  ;;  %v4224_v13 = vrot.slane %v4222_v41, 4  ;;  %v4233_v52 = vrot.slane %v4231_v27, 5  ;;  %v4237_v11 = vrot.slane %v4235_v36, 4  ;;  %v8416_v36 = vld [vmem:[%s8774_s2] sm:$0x3] }
 0x413   : > { %8947 = vst [vmem:[#allocation10_spill] sm:$0xff] %v8379_v23  ;;  %v3888_v49 = vpop.f32.mrf.mxu1  ;;  %6343 = vmatmul.msk.bf16.gmra.mxu2 %vm684_vm3, %v4430_v55  ;;  %6359 = vmatmul.msk.bf16.gmra.mxu3 %vm684_vm3, %v4430_v55  ;;  %v3799_v35 = vpop.f32.mrf.mxu0  ;;  %v4227_v6 = vrot.slane %v4225_v0, 5  ;;  %v4241_v39 = vshll.u32 %v6316_v37, 16 }
 0x414   : > { %v4238_v26 = vor.u32 %v4237_v11, %v4233_v52 }
 0x416   : > { %6456 = vmatmul.msk.bf16.gmra.mxu1 %vm684_vm3, %v4986_v61  ;;  %v3383_v51 = vpop.f32.mrf.mxu2  ;;  %v3472_v45 = vpop.f32.mrf.mxu3  ;;  %6440 = vmatmul.msk.bf16.gmra.mxu0 %vm684_vm3, %v4986_v61 }
 0x417   : > { %v3537_v25 = vadd.f32 %v3383_v51, %v7960_v18  ;;  %v3538_v55 = vadd.f32 %v3472_v45, %v8948_v38  ;;  %v4407_v18 = vunpack.c.l.b16 %v4210_v22  ;;  %v4408_v51 = vunpack.c.l.b16 %v4220_v43  ;;  %v6396_v43 = vld [vmem:[%s6776_s24 + $0x88] sm:$0xf] }
 0x418   : > { %v4892_v45 = vsel %vm6949_vm7, %v6424_v58, %v4891_v8  ;;  %v4964_v38 = vunpack.c.l.b16 %v4895_v5  ;;  %v4228_v58 = vor.u32 %v4227_v6, %v4224_v13  ;;  %v4243_v13 = vrot.slane %v4241_v39, 5  ;;  %v6397_v6 = vld [vmem:[%s6776_s24 + $0x8c] sm:$0x1] }
 0x419   : > { %v8397_v50 = vadd.f32 %v3799_v35, %v3537_v25  ;;  %v8399_v61 = vadd.f32 %v3888_v49, %v3538_v55  ;;  %v4963_v25 = vunpack.c.l.b16 %v4892_v45  ;;  %v4431_v8 = vpack.c.b16 %v4408_v51, %v4407_v18  ;;  %v6317_v45 = vld [vmem:[%s6776_s24 + $0x90] sm:$0xf] }
 0x41a   : > { %v4898_v51 = vrot.slane %v6396_v43, 5  ;;  %v4229_v5 = vrot.slane %v4228_v58, 4 }
 0x41b   : > { %8949 = vst [vmem:[#allocation11_spill] sm:$0xff] %v8397_v50  ;;  %v3890_v59 = vpop.f32.mrf.mxu1  ;;  %v3801_v40 = vpop.f32.mrf.mxu0  ;;  %v4987_v27 = vpack.c.b16 %v4964_v38, %v4963_v25  ;;  %v4249_v25 = vshll.u32 %v6317_v45, 16 }
 0x41c   : > { %v4900_v58 = vrot.slane %v4898_v51, 4  ;;  %v4234_v39 = vsel %vm6792_vm4, %v4229_v5, %v4233_v52 }
 0x41e   : > { %v3385_v35 = vpop.f32.mrf.mxu2  ;;  %v3474_v49 = vpop.f32.mrf.mxu3 }
 0x41f   : > { %v3539_v55 = vadd.f32 %v3385_v35, %v7967_v17  ;;  %v3540_v22 = vadd.f32 %v3474_v49, %v7971_v46  ;;  %v6395_v17 = vld [vmem:[%s6776_s24 + $0x84] sm:$0xe]  ;;  %v4246_v49 = vshrl.u32 %v6317_v45, 16 }
 0x420   : > { %v6425_v11 = vrot.slane %v6395_v17, 9 }
 0x421   : > { %v8409_v41 = vadd.f32 %v3801_v40, %v3539_v55  ;;  %v8411_v0 = vadd.f32 %v3890_v59, %v3540_v22  ;;  %v6318_v40 = vld [vmem:[%s6776_s24 + $0x94] sm:$0xf]  ;;  %v4239_v59 = vrot.slane %v4238_v26, 4  ;;  %v4901_v26 = vrot.slane %v6397_v6, 5 }
 0x422   : > { %v4255_v38 = vshll.u32 %v6318_v40, 16  ;;  %v4259_v55 = vshrl.u32 %v6318_v40, 16  ;;  %v4248_v45 = vrot.slane %v4246_v49, 4  ;;  %v4251_v40 = vrot.slane %v4249_v25, 5 }
 0x423   : > { %8950 = vst [vmem:[#allocation12_spill] sm:$0xff] %v8409_v41  ;;  %v5149_v46 = vpop.f32.mrf.mxu1  ;;  %6344 = vmatmul.msk.bf16.gmra.mxu2 %vm684_vm3, %v4431_v8  ;;  %6360 = vmatmul.msk.bf16.gmra.mxu3 %vm684_vm3, %v4431_v8  ;;  %v8421_v18 = vpop.f32.mrf.mxu0  ;;  %v8430_v8 = vperm.slane %v8416_v36, 1  ;;  %v4244_v43 = vsel %vm6792_vm4, %v4239_v59, %v4243_v13  ;;  %v4902_v5 = vsel %vm6949_vm7, %v4900_v58, %v4901_v26 }
 0x424   : > { %8951 = vst [vmem:[#allocation13_spill] sm:$0xff] %v8411_v0  ;;  %v8438_v41 = vrot.slane %v4255_v38, 5  ;;  %v4409_v0 = vunpack.c.l.b16 %v4234_v39  ;;  %v4410_v52 = vunpack.c.l.b16 %v4244_v43  ;;  %v4966_v49 = vunpack.c.l.b16 %v4902_v5 }
 0x425   : > { %v4252_v25 = vor.u32 %v4251_v40, %v4248_v45  ;;  %v6400_v40 = vld [vmem:[%s6776_s24 + $0x98] sm:$0x1] }
 0x426   : > { %6457 = vmatmul.msk.bf16.gmra.mxu1 %vm684_vm3, %v4987_v27  ;;  %v4504_v37 = vpop.f32.mrf.mxu2  ;;  %v4593_v35 = vpop.f32.mrf.mxu3  ;;  %6441 = vmatmul.msk.bf16.gmra.mxu0 %vm684_vm3, %v4987_v27  ;;  %v4899_v27 = vsel %vm6949_vm7, %v6425_v11, %v4898_v51  ;;  %v4432_v43 = vpack.c.b16 %v4410_v52, %v4409_v0  ;;  %v8460_v0 = vperm.slane %v8416_v36, 0 }
 0x427   : > { %v4674_v22 = vadd.f32 %v4593_v35, %v7986_v12  ;;  %v4261_v12 = vrot.slane %v4259_v55, 4  ;;  %v4965_v51 = vunpack.c.l.b16 %v4899_v27  ;;  %v4673_v58 = vadd.f32 %v4504_v37, %v7984_v2  ;;  %v6320_v2 = vld [vmem:[%s6776_s24 + $0x9c] sm:$0xf]  ;;  %v6321_v37 = vld [vmem:[%s6776_s24 + $0xa0] sm:$0xf] }
 0x428   : > { %v4253_v5 = vrot.slane %v4252_v25, 4 }
 0x429   : > { %v5230_v17 = vadd.f32 %v5149_v46, %v4674_v22  ;;  %v6319_v46 = vld [vmem:[%s6776_s24 + $0x98] sm:$0x1]  ;;  %v4262_v38 = vor.u32 %v4261_v12, %v8438_v41  ;;  %v6399_v22 = vld [vmem:[%s6776_s24 + $0x94] sm:$0xf] }
 0x42a   : > { %v4265_v55 = vshll.u32 %v6319_v46, 16  ;;  %v4905_v27 = vrot.slane %v6399_v22, 5  ;;  %v4258_v36 = vsel %vm6792_vm4, %v4253_v5, %v8438_v41  ;;  %v4270_v22 = vshrl.u32 %v6320_v2, 16 }
 0x42b   : > { %v5300_v35 = vadd.f32 %v8430_v8, %v5230_v17  ;;  %v5151_v50 = vpop.f32.mrf.mxu1  ;;  %v8441_v6 = vpop.f32.mrf.mxu0  ;;  %v6398_v17 = vld [vmem:[%s6776_s24 + $0x90] sm:$0xe]  ;;  %v4263_v23 = vrot.slane %v4262_v38, 4 }
 0x42c   : > { %v4267_v45 = vrot.slane %v4265_v55, 5 }
 0x42d   : > { %v5363_v59 = vmul.f32 0.5, %v5300_v35  ;;  %v4988_v35 = vpack.c.b16 %v4966_v49, %v4965_v51  ;;  %v6426_v51 = vrot.slane %v6398_v17, 9  ;;  %v4908_v49 = vrot.slane %v6400_v40, 5 }
 0x42e   : > { %v4506_v13 = vpop.f32.mrf.mxu2  ;;  %v4595_v11 = vpop.f32.mrf.mxu3 }
 0x42f   : > { %6637 = vtanh.f32 %v5363_v59  ;;  %v4676_v39 = vadd.f32 %v4595_v11, %v7995_v44  ;;  %v4907_v11 = vrot.slane %v4905_v27, 4  ;;  %v4675_v40 = vadd.f32 %v4506_v13, %v7991_v60 }
 0x430   : > { %v4272_v60 = vrot.slane %v4270_v22, 4 }
 0x431   : > { %v5232_v26 = vadd.f32 %v5151_v50, %v4676_v39  ;;  %v5229_v50 = vadd.f32 %v8421_v18, %v4673_v58  ;;  %v4268_v18 = vsel %vm6792_vm4, %v4263_v23, %v4267_v45  ;;  %v4279_v58 = vshll.u32 %v6321_v37, 16 }
 0x432   : > { %v4412_v23 = vunpack.c.l.b16 %v4268_v18  ;;  %v4906_v45 = vsel %vm6949_vm7, %v6426_v51, %v4905_v27 }
 0x433   : > { %v5302_v12 = vadd.f32 %v8430_v8, %v5232_v26  ;;  %v5154_v46 = vpop.f32.mrf.mxu1  ;;  %6345 = vmatmul.msk.bf16.gmra.mxu2 %vm684_vm3, %v4432_v43  ;;  %6361 = vmatmul.msk.bf16.gmra.mxu3 %vm684_vm3, %v4432_v43  ;;  %v8455_v44 = vpop.f32.mrf.mxu0  ;;  %v4273_v43 = vshll.u32 %v6320_v2, 16  ;;  %v5299_v26 = vadd.f32 %v8460_v0, %v5229_v50  ;;  %v4909_v50 = vsel %vm6949_vm7, %v4907_v11, %v4908_v49 }
 0x434   : > { %v4967_v11 = vunpack.c.l.b16 %v4906_v45  ;;  %v4968_v49 = vunpack.c.l.b16 %v4909_v50  ;;  %v6401_v45 = vld [vmem:[%s6776_s24 + $0x9c] sm:$0xe]  ;;  %v6323_v50 = vld [vmem:[%s6776_s24 + $0xa8] sm:$0xf] }
 0x435   : > { %v6638_v52 = vpop.eup %6637  ;;  %v5364_v59 = vmul.f32 0.5, %v5302_v12  ;;  %v4411_v12 = vunpack.c.l.b16 %v4258_v36  ;;  %v4275_v13 = vrot.slane %v4273_v43, 5 }
 0x436   : > { %v5427_v25 = vmul.f32 0.5, %v6638_v52  ;;  %6458 = vmatmul.msk.bf16.gmra.mxu1 %vm684_vm3, %v4988_v35  ;;  %v4509_v38 = vpop.f32.mrf.mxu2  ;;  %v4598_v55 = vpop.f32.mrf.mxu3  ;;  %6442 = vmatmul.msk.bf16.gmra.mxu0 %vm684_vm3, %v4988_v35  ;;  %v4283_v35 = vshrl.u32 %v6321_v37, 16  ;;  %v6322_v37 = vld [vmem:[%s6776_s24 + $0xa4] sm:$0x1] }
 0x437   : > { %6639 = vtanh.f32 %v5364_v59  ;;  %v4678_v39 = vadd.f32 %v4598_v55, %v8010_v9  ;;  %v8489_v59 = vrot.slane %v4279_v58, 5  ;;  %v4289_v43 = vshll.u32 %v6322_v37, 16 }
 0x438   : > { %v5459_v17 = vadd.f32 0.5, %v5427_v25  ;;  %v4285_v27 = vrot.slane %v4283_v35, 4 }
 0x439   : > { %v5234_v41 = vadd.f32 %v5154_v46, %v4678_v39  ;;  %v5231_v46 = vadd.f32 %v8441_v6, %v4675_v40  ;;  %v4433_v39 = vpack.c.b16 %v4412_v23, %v4411_v12  ;;  %v4276_v6 = vor.u32 %v4275_v13, %v4272_v60 }
 0x43a   : > { %v5491_v5 = vmul.f32 %v5459_v17, %v5299_v26  ;;  %v6402_v26 = vld [vmem:[%s6776_s24 + $0xa0] sm:$0xf]  ;;  %v4677_v40 = vadd.f32 %v4509_v38, %v8008_v47  ;;  %v4286_v35 = vor.u32 %v4285_v27, %v8489_v59  ;;  %v4989_v23 = vpack.c.b16 %v4968_v49, %v4967_v11 }
 0x43b   : > { %v5304_v9 = vadd.f32 %v8430_v8, %v5234_v41  ;;  %v5156_v2 = vpop.f32.mrf.mxu1  ;;  %v8479_v52 = vpop.f32.mrf.mxu0  ;;  %v5301_v58 = vadd.f32 %v8460_v0, %v5231_v46  ;;  %v4277_v38 = vrot.slane %v4276_v6, 4  ;;  %v4291_v27 = vrot.slane %v4289_v43, 5 }
 0x43c   : > { %v5233_v46 = vadd.f32 %v8455_v44, %v4677_v40  ;;  %v4287_v37 = vrot.slane %v4286_v35, 4  ;;  %v4294_v11 = vshrl.u32 %v6323_v50, 16  ;;  %v4297_v49 = vshll.u32 %v6323_v50, 16 }
 0x43d   : > { %v6640_v51 = vpop.eup %6639  ;;  %v5365_v25 = vmul.f32 0.5, %v5304_v9  ;;  %v4912_v9 = vrot.slane %v6402_v26, 5  ;;  %v4282_v43 = vsel %vm6792_vm4, %v4277_v38, %v8489_v59 }
 0x43e   : > { %v5428_v55 = vmul.f32 0.5, %v6640_v51  ;;  %v4511_v36 = vpop.f32.mrf.mxu2  ;;  %v4600_v18 = vpop.f32.mrf.mxu3  ;;  %v6403_v51 = vld [vmem:[%s6776_s24 + $0xa4] sm:$0x1]  ;;  %v5303_v40 = vadd.f32 %v8460_v0, %v5233_v46  ;;  %v4299_v50 = vrot.slane %v4297_v49, 5 }
 0x43f   : > { %6641 = vtanh.f32 %v5365_v25  ;;  %v4680_v22 = vadd.f32 %v4600_v18, %v8019_v63  ;;  %v6427_v18 = vrot.slane %v6401_v45, 9  ;;  %v4914_v6 = vrot.slane %v4912_v9, 4 }
 0x440   : > { %v5460_v17 = vadd.f32 0.5, %v5428_v55  ;;  %v4296_v45 = vrot.slane %v4294_v11, 4 }
 0x441   : > { %v5236_v41 = vadd.f32 %v5156_v2, %v4680_v22  ;;  %v6324_v2 = vld [vmem:[%s6776_s24 + $0xac] sm:$0xf] }
 0x442   : > { %v5492_v12 = vmul.f32 %v5460_v17, %v5301_v58  ;;  %v4307_v58 = vshrl.u32 %v6324_v2, 16  ;;  %v4915_v17 = vrot.slane %v6403_v51, 5 }
 0x443   : > { %v5306_v63 = vadd.f32 %v8430_v8, %v5236_v41  ;;  %v5159_v60 = vpop.f32.mrf.mxu1  ;;  %6346 = vmatmul.msk.bf16.gmra.mxu2 %vm684_vm3, %v4433_v39  ;;  %6362 = vmatmul.msk.bf16.gmra.mxu3 %vm684_vm3, %v4433_v39  ;;  %v8507_v47 = vpop.f32.mrf.mxu0  ;;  %v4679_v41 = vadd.f32 %v4511_v36, %v8015_v24  ;;  %v4413_v24 = vunpack.c.l.b16 %v4282_v43 }
 0x444   : > { %v6518_v13 = vpack.c.bf16 %v5492_v12, %v5491_v5  ;;  %v4303_v5 = vshll.u32 %v6324_v2, 16  ;;  %v4292_v12 = vsel %vm6792_vm4, %v4287_v37, %v4291_v27  ;;  %v4309_v59 = vrot.slane %v4307_v58, 4  ;;  %v6325_v37 = vld [vmem:[%s6776_s24 + $0xb0] sm:$0x1]  ;;  %v6405_v58 = vld [vmem:[%s6776_s24 + $0xac] sm:$0xf] }
 0x445   : > { %v6642_v25 = vpop.eup %6641  ;;  %v5366_v55 = vmul.f32 0.5, %v5306_v63  ;;  %v4414_v36 = vunpack.c.l.b16 %v4292_v12  ;;  %v5235_v27 = vadd.f32 %v8479_v52, %v4679_v41  ;;  %v4919_v41 = vrot.slane %v6405_v58, 5 }
 0x446   : > { %6519 = vst [vmem:[%s8502_s21] sm:$0xff] %v6518_v13   ;;  %v5429_v22 = vmul.f32 0.5, %v6642_v25  ;;  %6459 = vmatmul.msk.bf16.gmra.mxu1 %vm684_vm3, %v4989_v23  ;;  %v4514_v39 = vpop.f32.mrf.mxu2  ;;  %v4603_v26 = vpop.f32.mrf.mxu3  ;;  %6443 = vmatmul.msk.bf16.gmra.mxu0 %vm684_vm3, %v4989_v23  ;;  %v8525_v2 = vrot.slane %v4303_v5, 5  ;;  %v4313_v5 = vshll.u32 %v6325_v37, 16 }
 0x447   : > { %6643 = vtanh.f32 %v5366_v55  ;;  %v4682_v44 = vadd.f32 %v4603_v26, %v8034_v19  ;;  %v4913_v19 = vsel %vm6949_vm7, %v6427_v18, %v4912_v9  ;;  %v4300_v55 = vor.u32 %v4299_v50, %v4296_v45 }
 0x448   : > { %v5461_v35 = vadd.f32 0.5, %v5429_v22  ;;  %v4969_v9 = vunpack.c.l.b16 %v4913_v19  ;;  %v4310_v26 = vor.u32 %v4309_v59, %v8525_v2  ;;  %v5305_v43 = vadd.f32 %v8460_v0, %v5235_v27  ;;  %v6404_v19 = vld [vmem:[%s6776_s24 + $0xa8] sm:$0xe] }
 0x449   : > { %v5238_v23 = vadd.f32 %v5159_v60, %v4682_v44  ;;  %v4916_v60 = vsel %vm6949_vm7, %v4914_v6, %v4915_v17  ;;  %v4434_v6 = vpack.c.b16 %v4414_v36, %v4413_v24  ;;  %v4681_v17 = vadd.f32 %v4514_v39, %v8032_v21  ;;  %v6326_v21 = vld [vmem:[%s6776_s24 + $0xb4] sm:$0xf]  ;;  %v6406_v24 = vld [vmem:[%s6776_s24 + $0xb0] sm:$0x1]  ;;  %v6327_v36 = vld [vmem:[%s6776_s24 + $0xb8] sm:$0xf] }
 0x44a   : > { %v5493_v63 = vmul.f32 %v5461_v35, %v5303_v40  ;;  %v4970_v22 = vunpack.c.l.b16 %v4916_v60  ;;  %v4301_v35 = vrot.slane %v4300_v55, 4  ;;  %v4311_v45 = vrot.slane %v4310_v26, 4 }
 0x44b   : > { %v5308_v38 = vadd.f32 %v8430_v8, %v5238_v23  ;;  %v5161_v13 = vpop.f32.mrf.mxu1  ;;  %v8528_v46 = vpop.f32.mrf.mxu0  ;;  %v4315_v50 = vrot.slane %v4313_v5, 5  ;;  %v4922_v26 = vrot.slane %v6406_v24, 5 }
 0x44c   : > { %v4990_v23 = vpack.c.b16 %v4970_v22, %v4969_v9  ;;  %v4306_v27 = vsel %vm6792_vm4, %v4301_v35, %v8525_v2  ;;  %v4327_v2 = vshll.u32 %v6327_v36, 16 }
 0x44d   : > { %v6644_v51 = vpop.eup %6643  ;;  %v5367_v25 = vmul.f32 0.5, %v5308_v38 }
 0x44e   : > { %v5430_v18 = vmul.f32 0.5, %v6644_v51  ;;  %v4516_v11 = vpop.f32.mrf.mxu2  ;;  %v4605_v49 = vpop.f32.mrf.mxu3  ;;  %v6428_v51 = vrot.slane %v6404_v19, 9 }
 0x44f   : > { %6645 = vtanh.f32 %v5367_v25  ;;  %v4684_v44 = vadd.f32 %v4605_v49, %v8043_v56  ;;  %v4921_v25 = vrot.slane %v4919_v41, 4  ;;  %v4321_v49 = vshll.u32 %v6326_v21, 16 }
 0x450   : > { %v5462_v52 = vadd.f32 0.5, %v5430_v18 }
 0x451   : > { %v5240_v40 = vadd.f32 %v5161_v13, %v4684_v44  ;;  %v5237_v13 = vadd.f32 %v8507_v47, %v4681_v17  ;;  %v4316_v47 = vsel %vm6792_vm4, %v4311_v45, %v4315_v50  ;;  %v4683_v44 = vadd.f32 %v4516_v11, %v8039_v42  ;;  %v6328_v11 = vld [vmem:[%s6776_s24 + $0xbc] sm:$0x1] }
 0x452   : > { %v5494_v12 = vmul.f32 %v5462_v52, %v5305_v43  ;;  %v4415_v17 = vunpack.c.l.b16 %v4306_v27  ;;  %v4323_v35 = vrot.slane %v4321_v49, 5  ;;  %v4920_v50 = vsel %vm6949_vm7, %v6428_v51, %v4919_v41 }
 0x453   : > { %v5310_v56 = vadd.f32 %v8430_v8, %v5240_v40  ;;  %v5164_v59 = vpop.f32.mrf.mxu1  ;;  %6347 = vmatmul.msk.bf16.gmra.mxu2 %vm684_vm3, %v4434_v6  ;;  %6363 = vmatmul.msk.bf16.gmra.mxu3 %vm684_vm3, %v4434_v6  ;;  %v8543_v38 = vpop.f32.mrf.mxu0  ;;  %v5307_v5 = vadd.f32 %v8460_v0, %v5237_v13  ;;  %v4331_v6 = vshrl.u32 %v6327_v36, 16  ;;  %v4923_v19 = vsel %vm6949_vm7, %v4921_v25, %v4922_v26 }
 0x454   : > { %v6523_v39 = vpack.c.bf16 %v5494_v12, %v5493_v63  ;;  %v4318_v63 = vshrl.u32 %v6326_v21, 16  ;;  %v5239_v42 = vadd.f32 %v8528_v46, %v4683_v44  ;;  %v4337_v46 = vshll.u32 %v6328_v11, 16 }
 0x455   : > { %v6646_v60 = vpop.eup %6645  ;;  %v5368_v37 = vmul.f32 0.5, %v5310_v56  ;;  %v8569_v56 = vrot.slane %v4327_v2, 5 }
 0x456   : > { %6595 = vst [vmem:[%s8502_s21 + $0x8] sm:$0xff] %v6523_v39   ;;  %v5431_v9 = vmul.f32 0.5, %v6646_v60  ;;  %6460 = vmatmul.msk.bf16.gmra.mxu1 %vm684_vm3, %v4990_v23  ;;  %v4519_v55 = vpop.f32.mrf.mxu2  ;;  %v4608_v18 = vpop.f32.mrf.mxu3  ;;  %6444 = vmatmul.msk.bf16.gmra.mxu0 %vm684_vm3, %v4990_v23  ;;  %v4320_v40 = vrot.slane %v4318_v63, 4  ;;  %v4971_v60 = vunpack.c.l.b16 %v4920_v50  ;;  %v5309_v25 = vadd.f32 %v8460_v0, %v5239_v42  ;;  %v6408_v63 = vld [vmem:[%s6776_s24 + $0xb8] sm:$0xf] }
 0x457   : > { %6647 = vtanh.f32 %v5368_v37  ;;  %v4686_v22 = vadd.f32 %v4608_v18, %v8058_v48  ;;  %v4416_v48 = vunpack.c.l.b16 %v4316_v47  ;;  %v4972_v37 = vunpack.c.l.b16 %v4923_v19 }
 0x458   : > { %v5463_v58 = vadd.f32 0.5, %v5431_v9  ;;  %v4324_v41 = vor.u32 %v4323_v35, %v4320_v40  ;;  %v4685_v18 = vadd.f32 %v4519_v55, %v8056_v53  ;;  %v4926_v53 = vrot.slane %v6408_v63, 5  ;;  %v6330_v55 = vld [vmem:[%s6776_s24 + $0xc4] sm:$0xf] }
 0x459   : > { %v5242_v43 = vadd.f32 %v5164_v59, %v4686_v22  ;;  %v4333_v59 = vrot.slane %v4331_v6, 4  ;;  %v4435_v51 = vpack.c.b16 %v4416_v48, %v4415_v17  ;;  %v4991_v26 = vpack.c.b16 %v4972_v37, %v4971_v60 }
 0x45a   : > { %v5495_v52 = vmul.f32 %v5463_v58, %v5307_v5  ;;  %v4325_v2 = vrot.slane %v4324_v41, 4  ;;  %v6407_v5 = vld [vmem:[%s6776_s24 + $0xb4] sm:$0xe]  ;;  %v6329_v58 = vld [vmem:[%s6776_s24 + $0xc0] sm:$0xf]  ;;  %v5241_v17 = vadd.f32 %v8543_v38, %v4685_v18  ;;  %v4339_v35 = vrot.slane %v4337_v46, 5 }
 0x45b   : > { %v5312_v12 = vadd.f32 %v8430_v8, %v5242_v43  ;;  %v5166_v23 = vpop.f32.mrf.mxu1  ;;  %v8561_v45 = vpop.f32.mrf.mxu0  ;;  %v4334_v47 = vor.u32 %v4333_v59, %v8569_v56  ;;  %v6429_v50 = vrot.slane %v6407_v5, 9  ;;  %v4342_v19 = vshrl.u32 %v6329_v58, 16 }
 0x45c   : > { %v4345_v42 = vshll.u32 %v6329_v58, 16  ;;  %v4330_v38 = vsel %vm6792_vm4, %v4325_v2, %v8569_v56  ;;  %v5311_v37 = vadd.f32 %v8460_v0, %v5241_v17  ;;  %v6331_v58 = vld [vmem:[%s6776_s24 + $0xc8] sm:$0x1] }
 0x45d   : > { %v6648_v21 = vpop.eup %6647  ;;  %v5369_v39 = vmul.f32 0.5, %v5312_v12  ;;  %v4335_v40 = vrot.slane %v4334_v47, 4  ;;  %v6409_v12 = vld [vmem:[%s6776_s24 + $0xbc] sm:$0x1]  ;;  %v4927_v47 = vsel %vm6949_vm7, %v6429_v50, %v4926_v53  ;;  %v6411_v50 = vld [vmem:[%s6776_s24 + $0xc4] sm:$0xf] }
 0x45e   : > { %v5432_v13 = vmul.f32 0.5, %v6648_v21  ;;  %v4521_v24 = vpop.f32.mrf.mxu2  ;;  %v4610_v36 = vpop.f32.mrf.mxu3  ;;  %v4929_v60 = vrot.slane %v6409_v12, 5  ;;  %v4347_v18 = vrot.slane %v4345_v42, 5 }
 0x45f   : > { %6649 = vtanh.f32 %v5369_v39  ;;  %v4688_v27 = vadd.f32 %v4610_v36, %v8067_v20  ;;  %v4355_v39 = vshrl.u32 %v6330_v55, 16  ;;  %v4928_v36 = vrot.slane %v4926_v53, 4 }
 0x460   : > { %v5464_v9 = vadd.f32 0.5, %v5432_v13  ;;  %v4340_v46 = vsel %vm6792_vm4, %v4335_v40, %v4339_v35  ;;  %v4973_v53 = vunpack.c.l.b16 %v4927_v47  ;;  %v6333_v47 = vld [vmem:[%s6776_s24 + $0xd0] sm:$0xf] }
 0x461   : > { %v5244_v49 = vadd.f32 %v5166_v23, %v4688_v27  ;;  %v8952_v27 = vld [vmem:[#allocation14_spill] sm:$0xff]  ;;  %v4418_v2 = vunpack.c.l.b16 %v4340_v46  ;;  %v4930_v5 = vsel %vm6949_vm7, %v4928_v36, %v4929_v60 }
 0x462   : > { %v5496_v22 = vmul.f32 %v5464_v9, %v5309_v25  ;;  %v4344_v9 = vrot.slane %v4342_v19, 4  ;;  %v4974_v12 = vunpack.c.l.b16 %v4930_v5 }
 0x463   : > { %v5314_v20 = vadd.f32 %v8430_v8, %v5244_v49  ;;  %v5169_v44 = vpop.f32.mrf.mxu1  ;;  %6348 = vmatmul.msk.bf16.gmra.mxu2 %vm684_vm3, %v4435_v51  ;;  %6364 = vmatmul.msk.bf16.gmra.mxu3 %vm684_vm3, %v4435_v51  ;;  %v8581_v6 = vpop.f32.mrf.mxu0  ;;  %v4687_v51 = vadd.f32 %v4521_v24, %v8952_v27  ;;  %v4417_v24 = vunpack.c.l.b16 %v4330_v38  ;;  %v6410_v27 = vld [vmem:[%s6776_s24 + $0xc0] sm:$0xe] }
 0x464   : > { %v6528_v43 = vpack.c.bf16 %v5496_v22, %v5495_v52  ;;  %v4351_v52 = vshll.u32 %v6330_v55, 16  ;;  %v4992_v60 = vpack.c.b16 %v4974_v12, %v4973_v53 }
 0x465   : > { %v6650_v23 = vpop.eup %6649  ;;  %v5370_v48 = vmul.f32 0.5, %v5314_v20  ;;  %v5243_v20 = vadd.f32 %v8561_v45, %v4687_v51  ;;  %v4436_v42 = vpack.c.b16 %v4418_v2, %v4417_v24  ;;  %v6430_v24 = vrot.slane %v6410_v27, 9 }
 0x466   : > { %6596 = vst [vmem:[%s8502_s21 + $0x10] sm:$0xff] %v6528_v43   ;;  %v5433_v11 = vmul.f32 0.5, %v6650_v23  ;;  %6461 = vmatmul.msk.bf16.gmra.mxu1 %vm684_vm3, %v4991_v26  ;;  %v4524_v59 = vpop.f32.mrf.mxu2  ;;  %v4613_v21 = vpop.f32.mrf.mxu3  ;;  %6445 = vmatmul.msk.bf16.gmra.mxu0 %vm684_vm3, %v4991_v26  ;;  %v8599_v63 = vrot.slane %v4351_v52, 5  ;;  %v4348_v43 = vor.u32 %v4347_v18, %v4344_v9  ;;  %v6412_v18 = vld [vmem:[%s6776_s24 + $0xc8] sm:$0x1] }
 0x467   : > { %6651 = vtanh.f32 %v5370_v48  ;;  %v4690_v13 = vadd.f32 %v4613_v21, %v8082_v15  ;;  %v4357_v15 = vrot.slane %v4355_v39, 4  ;;  %v4361_v48 = vshll.u32 %v6331_v58, 16  ;;  %v8953_v21 = vld [vmem:[#allocation15_spill] sm:$0xff] }
 0x468   : > { %v5465_v41 = vadd.f32 0.5, %v5433_v11  ;;  %v5313_v11 = vadd.f32 %v8460_v0, %v5243_v20  ;;  %v4689_v38 = vadd.f32 %v4524_v59, %v8953_v21  ;;  %v4349_v39 = vrot.slane %v4348_v43, 4  ;;  %v6332_v59 = vld [vmem:[%s6776_s24 + $0xcc] sm:$0xf] }
 0x469   : > { %v5246_v25 = vadd.f32 %v5169_v44, %v4690_v13  ;;  %v4358_v23 = vor.u32 %v4357_v15, %v8599_v63  ;;  %v4933_v13 = vrot.slane %v6411_v50, 5  ;;  %v4936_v53 = vrot.slane %v6412_v18, 5 }
 0x46a   : > { %v5497_v56 = vmul.f32 %v5465_v41, %v5311_v37  ;;  %v4363_v41 = vrot.slane %v4361_v48, 5  ;;  %v5245_v9 = vadd.f32 %v8581_v6, %v4689_v38 }
 0x46b   : > { %v5316_v49 = vadd.f32 %v8430_v8, %v5246_v25  ;;  %v5171_v22 = vpop.f32.mrf.mxu1  ;;  %v8602_v26 = vpop.f32.mrf.mxu0  ;;  %v4359_v37 = vrot.slane %v4358_v23, 4  ;;  %v4935_v2 = vrot.slane %v4933_v13, 4  ;;  %v4379_v23 = vshrl.u32 %v6333_v47, 16 }
 0x46c   : > { %v5315_v43 = vadd.f32 %v8460_v0, %v5245_v9 }
 0x46d   : > { %v6652_v44 = vpop.eup %6651  ;;  %v5371_v55 = vmul.f32 0.5, %v5316_v49  ;;  %v4364_v6 = vsel %vm6792_vm4, %v4359_v37, %v4363_v41  ;;  %v4381_v37 = vrot.slane %v4379_v23, 4 }
 0x46e   : > { %v5434_v17 = vmul.f32 0.5, %v6652_v44  ;;  %v4526_v40 = vpop.f32.mrf.mxu2  ;;  %v4615_v35 = vpop.f32.mrf.mxu3  ;;  %v4369_v44 = vshll.u32 %v6332_v59, 16 }
 0x46f   : > { %6653 = vtanh.f32 %v5371_v55  ;;  %v4692_v19 = vadd.f32 %v4615_v35, %v8091_v14  ;;  %v8954_v35 = vld [vmem:[#allocation16_spill] sm:$0xff] }
 0x470   : > { %v5466_v45 = vadd.f32 0.5, %v5434_v17  ;;  %v4691_v12 = vadd.f32 %v4526_v40, %v8954_v35 }
 0x471   : > { %v5248_v52 = vadd.f32 %v5171_v22, %v4692_v19  ;;  %v4354_v22 = vsel %vm6792_vm4, %v4349_v39, %v8599_v63  ;;  %v4375_v63 = vshll.u32 %v6333_v47, 16  ;;  %v4937_v39 = vsel %vm6949_vm7, %v4935_v2, %v4936_v53  ;;  %v8955_v47 = vld [vmem:[#allocation19_spill] sm:$0xff] }
 0x472   : > { %v5498_v36 = vmul.f32 %v5466_v45, %v5313_v11  ;;  %v4419_v19 = vunpack.c.l.b16 %v4354_v22  ;;  %v4371_v11 = vrot.slane %v4369_v44, 5  ;;  %v5247_v40 = vadd.f32 %v8602_v26, %v4691_v12 }
 0x473   : > { %v5318_v14 = vadd.f32 %v8430_v8, %v5248_v52  ;;  %v5174_v51 = vpop.f32.mrf.mxu1  ;;  %6349 = vmatmul.msk.bf16.gmra.mxu2 %vm684_vm3, %v4436_v42  ;;  %6365 = vmatmul.msk.bf16.gmra.mxu3 %vm684_vm3, %v4436_v42  ;;  %v8617_v46 = vpop.f32.mrf.mxu0  ;;  %v4934_v52 = vsel %vm6949_vm7, %v6430_v24, %v4933_v13  ;;  %v4976_v9 = vunpack.c.l.b16 %v4937_v39  ;;  %v8956_v24 = vld [vmem:[#allocation17_spill] sm:$0xff] }
 0x474   : > { %v6533_v25 = vpack.c.bf16 %v5498_v36, %v5497_v56  ;;  %v4366_v56 = vshrl.u32 %v6332_v59, 16  ;;  %v6334_v36 = vld [vmem:[%s6776_s24 + $0xd4] sm:$0x1]  ;;  %v5317_v26 = vadd.f32 %v8460_v0, %v5247_v40 }
 0x475   : > { %v6654_v15 = vpop.eup %6653  ;;  %v5372_v49 = vmul.f32 0.5, %v5318_v14 }
 0x476   : > { %6597 = vst [vmem:[%s8502_s21 + $0x18] sm:$0xff] %v6533_v25   ;;  %v5435_v5 = vmul.f32 0.5, %v6654_v15  ;;  %6462 = vmatmul.msk.bf16.gmra.mxu1 %vm684_vm3, %v4992_v60  ;;  %v4529_v58 = vpop.f32.mrf.mxu2  ;;  %v4618_v20 = vpop.f32.mrf.mxu3  ;;  %6446 = vmatmul.msk.bf16.gmra.mxu0 %vm684_vm3, %v4992_v60  ;;  %v4368_v42 = vrot.slane %v4366_v56, 4  ;;  %v4377_v60 = vrot.slane %v4375_v63, 5  ;;  %v4975_v25 = vunpack.c.l.b16 %v4934_v52 }
 0x477   : > { %6655 = vtanh.f32 %v5372_v49  ;;  %v4694_v55 = vadd.f32 %v4618_v20, %v8106_v3  ;;  %v4420_v3 = vunpack.c.l.b16 %v4364_v6  ;;  %v4385_v49 = vshll.u32 %v6334_v36, 16  ;;  %v6414_v20 = vld [vmem:[%s6776_s24 + $0xd0] sm:$0xf] }
 0x478   : > { %v5467_v17 = vadd.f32 0.5, %v5435_v5  ;;  %v4372_v18 = vor.u32 %v4371_v11, %v4368_v42  ;;  %v4693_v2 = vadd.f32 %v4529_v58, %v8956_v24  ;;  %v4382_v5 = vor.u32 %v4381_v37, %v4377_v60 }
 0x479   : > { %v5250_v48 = vadd.f32 %v5174_v51, %v4694_v55  ;;  %v4437_v15 = vpack.c.b16 %v4420_v3, %v4419_v19  ;;  %v4993_v44 = vpack.c.b16 %v4976_v9, %v4975_v25  ;;  %v4940_v35 = vrot.slane %v6414_v20, 5  ;;  %v6415_v19 = vld [vmem:[%s6776_s24 + $0xd4] sm:$0x1] }
 0x47a   : > { %v5499_v50 = vmul.f32 %v5467_v17, %v5315_v43  ;;  %v4373_v55 = vrot.slane %v4372_v18, 4  ;;  %v6413_v17 = vld [vmem:[%s6776_s24 + $0xcc] sm:$0xe]  ;;  %v5249_v58 = vadd.f32 %v8617_v46, %v4693_v2  ;;  %v4383_v23 = vrot.slane %v4382_v5, 4 }
 0x47b   : > { %v5320_v45 = vadd.f32 %v8430_v8, %v5250_v48  ;;  %v5176_v21 = vpop.f32.mrf.mxu1  ;;  %v8635_v38 = vpop.f32.mrf.mxu0  ;;  %v4387_v48 = vrot.slane %v4385_v49, 5  ;;  %v6431_v39 = vrot.slane %v6413_v17, 9  ;;  %v4942_v40 = vrot.slane %v4940_v35, 4  ;;  %v8960_v17 = vld [vmem:[#allocation20_spill] sm:$0xff] }
 0x47c   : > { %v4378_v52 = vsel %vm6792_vm4, %v4373_v55, %v4377_v60  ;;  %v4943_v36 = vrot.slane %v6415_v19, 5  ;;  %v5319_v37 = vadd.f32 %v8460_v0, %v5249_v58 }
 0x47d   : > { %v6656_v41 = vpop.eup %6655  ;;  %v5373_v27 = vmul.f32 0.5, %v5320_v45  ;;  %v4421_v18 = vunpack.c.l.b16 %v4378_v52  ;;  %v4941_v49 = vsel %vm6949_vm7, %v6431_v39, %v4940_v35 }
 0x47e   : > { %v5436_v14 = vmul.f32 0.5, %v6656_v41  ;;  %v4531_v51 = vpop.f32.mrf.mxu2  ;;  %v4620_v59 = vpop.f32.mrf.mxu3  ;;  %v4977_v20 = vunpack.c.l.b16 %v4941_v49 }
 0x47f   : > { %6657 = vtanh.f32 %v5373_v27  ;;  %v4696_v13 = vadd.f32 %v4620_v59, %v8955_v47  ;;  %v8958_v27 = vld [vmem:[#allocation18_spill] sm:$0xff]  ;;  %v4388_v59 = vsel %vm6792_vm4, %v4383_v23, %v4387_v48 }
 0x480   : > { %v5468_v22 = vadd.f32 0.5, %v5436_v14  ;;  %v4695_v14 = vadd.f32 %v4531_v51, %v8958_v27 }
 0x481   : > { %v5252_v6 = vadd.f32 %v5176_v21, %v4696_v13 }
 0x482   : > { %v5500_v56 = vmul.f32 %v5468_v22, %v5317_v26  ;;  %v4944_v26 = vsel %vm6949_vm7, %v4942_v40, %v4943_v36  ;;  %v5251_v22 = vadd.f32 %v8635_v38, %v4695_v14  ;;  %v8961_v40 = vld [vmem:[#allocation22_spill] sm:$0xff] }
 0x483   : > { %v5322_v53 = vadd.f32 %v8430_v8, %v5252_v6  ;;  %v5179_v63 = vpop.f32.mrf.mxu1  ;;  %6350 = vmatmul.msk.bf16.gmra.mxu2 %vm684_vm3, %v4437_v15  ;;  %6366 = vmatmul.msk.bf16.gmra.mxu3 %vm684_vm3, %v4437_v15  ;;  %v5090_v43 = vpop.f32.mrf.mxu0  ;;  %v4422_v15 = vunpack.c.l.b16 %v4388_v59  ;;  %v4978_v6 = vunpack.c.l.b16 %v4944_v26  ;;  %v8962_v26 = vld [vmem:[#allocation24_spill] sm:$0xff] }
 0x484   : > { %v6538_v12 = vpack.c.bf16 %v5500_v56, %v5499_v50  ;;  %v8957_v50 = vld [vmem:[#allocation21_spill] sm:$0xff]  ;;  %v8959_v56 = vld [vmem:[#allocation23_spill] sm:$0xff] }
 0x485   : > { %v6658_v42 = vpop.eup %6657  ;;  %v5374_v11 = vmul.f32 0.5, %v5322_v53  ;;  %v4438_v55 = vpack.c.b16 %v4422_v15, %v4421_v18  ;;  %v5321_v53 = vadd.f32 %v8460_v0, %v5251_v22  ;;  %v4994_v38 = vpack.c.b16 %v4978_v6, %v4977_v20 }
 0x486   : > { %6598 = vst [vmem:[%s8502_s21 + $0x20] sm:$0xff] %v6538_v12   ;;  %v5437_v45 = vmul.f32 0.5, %v6658_v42  ;;  %6463 = vmatmul.msk.bf16.gmra.mxu1 %vm684_vm3, %v4993_v44  ;;  %v4534_v21 = vpop.f32.mrf.mxu2  ;;  %v4623_v3 = vpop.f32.mrf.mxu3  ;;  %6447 = vmatmul.msk.bf16.gmra.mxu0 %vm684_vm3, %v4993_v44 }
 0x487   : > { %6659 = vtanh.f32 %v5374_v11  ;;  %v4698_v46 = vadd.f32 %v4623_v3, %v8957_v50  ;;  %v4697_v10 = vadd.f32 %v4534_v21, %v8960_v17 }
 0x488   : > { %v5469_v41 = vadd.f32 0.5, %v5437_v45 }
 0x489   : > { %v5254_v25 = vadd.f32 %v5179_v63, %v4698_v46  ;;  %v5253_v42 = vadd.f32 %v5090_v43, %v4697_v10  ;;  %v8963_v10 = vld [vmem:[#allocation31_spill] sm:$0xff] }
 0x48a   : > { %v5501_v9 = vmul.f32 %v5469_v41, %v5319_v37 }
 0x48b   : > { %v5324_v47 = vadd.f32 %v8430_v8, %v5254_v25  ;;  %v5181_v60 = vpop.f32.mrf.mxu1  ;;  %v5092_v13 = vpop.f32.mrf.mxu0  ;;  %v5323_v50 = vadd.f32 %v8460_v0, %v5253_v42 }
 0x48d   : > { %v6660_v51 = vpop.eup %6659  ;;  %v5375_v24 = vmul.f32 0.5, %v5324_v47 }
 0x48e   : > { %v5438_v29 = vmul.f32 0.5, %v6660_v51  ;;  %v4536_v2 = vpop.f32.mrf.mxu2  ;;  %v4625_v5 = vpop.f32.mrf.mxu3 }
 0x48f   : > { %6661 = vtanh.f32 %v5375_v24  ;;  %v4700_v44 = vadd.f32 %v4625_v5, %v8959_v56  ;;  %v4699_v36 = vadd.f32 %v4536_v2, %v8961_v40 }
 0x490   : > { %v5470_v63 = vadd.f32 0.5, %v5438_v29 }
 0x491   : > { %v5256_v35 = vadd.f32 %v5181_v60, %v4700_v44  ;;  %v5255_v59 = vadd.f32 %v5092_v13, %v4699_v36 }
 0x492   : > { %v5502_v12 = vmul.f32 %v5470_v63, %v5321_v53 }
 0x493   : > { %v5326_v58 = vadd.f32 %v8430_v8, %v5256_v35  ;;  %v5184_v23 = vpop.f32.mrf.mxu1  ;;  %6351 = vmatmul.msk.bf16.gmra.mxu2 %vm684_vm3, %v4438_v55  ;;  %6367 = vmatmul.msk.bf16.gmra.mxu3 %vm684_vm3, %v4438_v55  ;;  %v5095_v48 = vpop.f32.mrf.mxu0  ;;  %v5325_v15 = vadd.f32 %v8460_v0, %v5255_v59 }
 0x494   : > { %v6543_v19 = vpack.c.bf16 %v5502_v12, %v5501_v9 }
 0x495   : > { %v6662_v11 = vpop.eup %6661  ;;  %v5376_v45 = vmul.f32 0.5, %v5326_v58 }
 0x496   : > { %6599 = vst [vmem:[%s8502_s21 + $0x28] sm:$0xff] %v6543_v19   ;;  %v5439_v3 = vmul.f32 0.5, %v6662_v11  ;;  %6464 = vmatmul.msk.bf16.gmra.mxu1 %vm684_vm3, %v4994_v38  ;;  %v4539_v21 = vpop.f32.mrf.mxu2  ;;  %v4628_v52 = vpop.f32.mrf.mxu3  ;;  %6448 = vmatmul.msk.bf16.gmra.mxu0 %vm684_vm3, %v4994_v38 }
 0x497   : > { %6663 = vtanh.f32 %v5376_v45  ;;  %v4702_v39 = vadd.f32 %v4628_v52, %v8161_v1  ;;  %v4701_v22 = vadd.f32 %v4539_v21, %v8962_v26 }
 0x498   : > { %v5471_v46 = vadd.f32 0.5, %v5439_v3 }
 0x499   : > { %v5258_v37 = vadd.f32 %v5184_v23, %v4702_v39  ;;  %v5257_v20 = vadd.f32 %v5095_v48, %v4701_v22 }
 0x49a   : > { %v5503_v43 = vmul.f32 %v5471_v46, %v5323_v50 }
 0x49b   : > { %v5328_v41 = vadd.f32 %v8430_v8, %v5258_v37  ;;  %v5186_v27 = vpop.f32.mrf.mxu1  ;;  %v5097_v14 = vpop.f32.mrf.mxu0  ;;  %v5327_v63 = vadd.f32 %v8460_v0, %v5257_v20 }
 0x49d   : > { %v6664_v25 = vpop.eup %6663  ;;  %v5377_v9 = vmul.f32 0.5, %v5328_v41 }
 0x49e   : > { %v5440_v18 = vmul.f32 0.5, %v6664_v25  ;;  %v4541_v47 = vpop.f32.mrf.mxu2  ;;  %v4630_v60 = vpop.f32.mrf.mxu3 }
 0x49f   : > { %6665 = vtanh.f32 %v5377_v9  ;;  %v4704_v1 = vadd.f32 %v4630_v60, %v8172_v30  ;;  %v4703_v35 = vadd.f32 %v4541_v47, %v8963_v10 }
 0x4a0   : > { %v5472_v49 = vadd.f32 0.5, %v5440_v18 }
 0x4a1   : > { %v5260_v51 = vadd.f32 %v5186_v27, %v4704_v1  ;;  %v5259_v19 = vadd.f32 %v5097_v14, %v4703_v35 }
 0x4a2   : > { %v5504_v24 = vmul.f32 %v5472_v49, %v5325_v15 }
 0x4a3   : > { %v5330_v29 = vadd.f32 %v8430_v8, %v5260_v51  ;;  %v5189_v2 = vpop.f32.mrf.mxu1  ;;  %v5100_v13 = vpop.f32.mrf.mxu0  ;;  %v5329_v52 = vadd.f32 %v8460_v0, %v5259_v19  ;;  %v8965_v19 = vld [vmem:[#allocation32_spill] sm:$0xff] }
 0x4a4   : > { %v6548_v5 = vpack.c.bf16 %v5504_v24, %v5503_v43 }
 0x4a5   : > { %v6666_v6 = vpop.eup %6665  ;;  %v5378_v56 = vmul.f32 0.5, %v5330_v29 }
 0x4a6   : > { %6600 = vst [vmem:[%s8502_s21 + $0x30] sm:$0xff] %v6548_v5   ;;  %v5441_v44 = vmul.f32 0.5, %v6666_v6  ;;  %v4544_v55 = vpop.f32.mrf.mxu2  ;;  %v4633_v53 = vpop.f32.mrf.mxu3 }
 0x4a7   : > { %6667 = vtanh.f32 %v5378_v56  ;;  %v4706_v30 = vadd.f32 %v4633_v53, %v8189_v7  ;;  %v4705_v50 = vadd.f32 %v4544_v55, %v8187_v62 }
 0x4a8   : > { %v5473_v17 = vadd.f32 0.5, %v5441_v44 }
 0x4a9   : > { %v5262_v12 = vadd.f32 %v5189_v2, %v4706_v30  ;;  %v5261_v27 = vadd.f32 %v5100_v13, %v4705_v50 }
 0x4aa   : > { %v5505_v38 = vmul.f32 %v5473_v17, %v5327_v63 }
 0x4ab   : > { %v5332_v58 = vadd.f32 %v8430_v8, %v5262_v12  ;;  %v5191_v23 = vpop.f32.mrf.mxu1  ;;  %v5102_v48 = vpop.f32.mrf.mxu0  ;;  %v5331_v47 = vadd.f32 %v8460_v0, %v5261_v27 }
 0x4ad   : > { %v6668_v42 = vpop.eup %6667  ;;  %v5379_v11 = vmul.f32 0.5, %v5332_v58 }
 0x4ae   : > { %v5442_v45 = vmul.f32 0.5, %v6668_v42  ;;  %v4546_v3 = vpop.f32.mrf.mxu2  ;;  %v4635_v21 = vpop.f32.mrf.mxu3 }
 0x4af   : > { %6669 = vtanh.f32 %v5379_v11  ;;  %v4708_v7 = vadd.f32 %v4635_v21, %v8201_v54  ;;  %v4707_v60 = vadd.f32 %v4546_v3, %v8199_v16 }
 0x4b0   : > { %v5474_v39 = vadd.f32 0.5, %v5442_v45 }
 0x4b1   : > { %v5264_v46 = vadd.f32 %v5191_v23, %v4708_v7  ;;  %v5263_v51 = vadd.f32 %v5102_v48, %v4707_v60 }
 0x4b2   : > { %v5506_v40 = vmul.f32 %v5474_v39, %v5329_v52 }
 0x4b3   : > { %v5334_v36 = vadd.f32 %v8430_v8, %v5264_v46  ;;  %v5194_v37 = vpop.f32.mrf.mxu1  ;;  %v5105_v43 = vpop.f32.mrf.mxu0  ;;  %v5333_v20 = vadd.f32 %v8460_v0, %v5263_v51 }
 0x4b4   : > { %v6553_v41 = vpack.c.bf16 %v5506_v40, %v5505_v38 }
 0x4b5   : > { %v6670_v14 = vpop.eup %6669  ;;  %v5380_v59 = vmul.f32 0.5, %v5334_v36 }
 0x4b6   : > { %6601 = vst [vmem:[%s8502_s21 + $0x38] sm:$0xff] %v6553_v41   ;;  %v5443_v25 = vmul.f32 0.5, %v6670_v14  ;;  %v4549_v9 = vpop.f32.mrf.mxu2  ;;  %v4638_v18 = vpop.f32.mrf.mxu3  ;;  %v8967_v14 = vld [vmem:[#allocation25_spill] sm:$0xff] }
 0x4b7   : > { %6671 = vtanh.f32 %v5380_v59  ;;  %v4710_v54 = vadd.f32 %v4638_v18, %v8219_v28  ;;  %v4709_v16 = vadd.f32 %v4549_v9, %v8217_v33 }
 0x4b8   : > { %v5475_v62 = vadd.f32 0.5, %v5443_v25 }
 0x4b9   : > { %v5266_v1 = vadd.f32 %v5194_v37, %v4710_v54  ;;  %v5265_v17 = vadd.f32 %v5105_v43, %v4709_v16  ;;  %v8966_v37 = vld [vmem:[#allocation27_spill] sm:$0xff] }
 0x4ba   : > { %v5507_v15 = vmul.f32 %v5475_v62, %v5331_v47 }
 0x4bb   : > { %v5336_v49 = vadd.f32 %v8430_v8, %v5266_v1  ;;  %v5196_v26 = vpop.f32.mrf.mxu1  ;;  %v5107_v22 = vpop.f32.mrf.mxu0  ;;  %v5335_v48 = vadd.f32 %v8460_v0, %v5265_v17 }
 0x4bd   : > { %v6672_v24 = vpop.eup %6671  ;;  %v5381_v29 = vmul.f32 0.5, %v5336_v49 }
 0x4be   : > { %v5444_v2 = vmul.f32 0.5, %v6672_v24  ;;  %v4551_v13 = vpop.f32.mrf.mxu2  ;;  %v4640_v5 = vpop.f32.mrf.mxu3 }
 0x4bf   : > { %6673 = vtanh.f32 %v5381_v29  ;;  %v4712_v28 = vadd.f32 %v4640_v5, %v8231_v57  ;;  %v8964_v57 = vld [vmem:[#allocation33_spill] sm:$0xff]  ;;  %v4711_v42 = vadd.f32 %v4551_v13, %v8965_v19 }
 0x4c0   : > { %v5476_v6 = vadd.f32 0.5, %v5444_v2  ;;  %v8968_v2 = vld [vmem:[#allocation26_spill] sm:$0xff] }
 0x4c1   : > { %v5268_v56 = vadd.f32 %v5196_v26, %v4712_v28  ;;  %v5267_v52 = vadd.f32 %v5107_v22, %v4711_v42 }
 0x4c2   : > { %v5508_v44 = vmul.f32 %v5476_v6, %v5333_v20 }
 0x4c3   : > { %v5338_v55 = vadd.f32 %v8430_v8, %v5268_v56  ;;  %v5199_v53 = vpop.f32.mrf.mxu1  ;;  %v5110_v30 = vpop.f32.mrf.mxu0  ;;  %v5337_v41 = vadd.f32 %v8460_v0, %v5267_v52  ;;  %v8971_v52 = vld [vmem:[#allocation3_spill] sm:$0xff] }
 0x4c4   : > { %v6558_v63 = vpack.c.bf16 %v5508_v44, %v5507_v15 }
 0x4c5   : > { %v6674_v10 = vpop.eup %6673  ;;  %v5382_v35 = vmul.f32 0.5, %v5338_v55 }
 0x4c6   : > { %6602 = vst [vmem:[%s8502_s21 + $0x40] sm:$0xff] %v6558_v63   ;;  %v5445_v12 = vmul.f32 0.5, %v6674_v10  ;;  %v4554_v38 = vpop.f32.mrf.mxu2  ;;  %v4643_v58 = vpop.f32.mrf.mxu3 }
 0x4c7   : > { %6675 = vtanh.f32 %v5382_v35  ;;  %v4714_v23 = vadd.f32 %v4643_v58, %v8964_v57  ;;  %v4713_v59 = vadd.f32 %v4554_v38, %v8967_v14 }
 0x4c8   : > { %v5477_v33 = vadd.f32 0.5, %v5445_v12  ;;  %v8970_v12 = vld [vmem:[#allocation28_spill] sm:$0xff] }
 0x4c9   : > { %v5270_v11 = vadd.f32 %v5199_v53, %v4714_v23  ;;  %v5269_v60 = vadd.f32 %v5110_v30, %v4713_v59 }
 0x4ca   : > { %v5509_v45 = vmul.f32 %v5477_v33, %v5335_v48 }
 0x4cb   : > { %v5340_v3 = vadd.f32 %v8430_v8, %v5270_v11  ;;  %v5201_v21 = vpop.f32.mrf.mxu1  ;;  %v5112_v7 = vpop.f32.mrf.mxu0  ;;  %v5339_v24 = vadd.f32 %v8460_v0, %v5269_v60 }
 0x4cd   : > { %v6676_v39 = vpop.eup %6675  ;;  %v5383_v50 = vmul.f32 0.5, %v5340_v3 }
 0x4ce   : > { %v5446_v46 = vmul.f32 0.5, %v6676_v39  ;;  %v4556_v40 = vpop.f32.mrf.mxu2  ;;  %v4645_v36 = vpop.f32.mrf.mxu3 }
 0x4cf   : > { %6677 = vtanh.f32 %v5383_v50  ;;  %v4716_v43 = vadd.f32 %v4645_v36, %v8966_v37  ;;  %v4715_v13 = vadd.f32 %v4556_v40, %v8968_v2  ;;  %v8972_v40 = vld [vmem:[#allocation2_spill] sm:$0xff] }
 0x4d0   : > { %v5478_v27 = vadd.f32 0.5, %v5446_v46 }
 0x4d1   : > { %v5272_v25 = vadd.f32 %v5201_v21, %v4716_v43  ;;  %v5271_v56 = vadd.f32 %v5112_v7, %v4715_v13 }
 0x4d2   : > { %v5510_v9 = vmul.f32 %v5478_v27, %v5337_v41 }
 0x4d3   : > { %v5342_v18 = vadd.f32 %v8430_v8, %v5272_v25  ;;  %v5204_v54 = vpop.f32.mrf.mxu1  ;;  %v5115_v47 = vpop.f32.mrf.mxu0  ;;  %v5341_v10 = vadd.f32 %v8460_v0, %v5271_v56  ;;  %v8975_v56 = vld [vmem:[#allocation7_spill] sm:$0xff] }
 0x4d4   : > { %v6563_v62 = vpack.c.bf16 %v5510_v9, %v5509_v45 }
 0x4d5   : > { %v6678_v1 = vpop.eup %6677  ;;  %v5384_v15 = vmul.f32 0.5, %v5342_v18 }
 0x4d6   : > { %6603 = vst [vmem:[%s8502_s21 + $0x48] sm:$0xff] %v6563_v62   ;;  %v5447_v49 = vmul.f32 0.5, %v6678_v1  ;;  %v4559_v26 = vpop.f32.mrf.mxu2  ;;  %v4648_v22 = vpop.f32.mrf.mxu3  ;;  %v8973_v62 = vld [vmem:[#allocation5_spill] sm:$0xff] }
 0x4d7   : > { %6679 = vtanh.f32 %v5384_v15  ;;  %v4718_v51 = vadd.f32 %v4648_v22, %v8279_v4  ;;  %v8969_v4 = vld [vmem:[#allocation29_spill] sm:$0xff]  ;;  %v4717_v38 = vadd.f32 %v4559_v26, %v8970_v12 }
 0x4d8   : > { %v5479_v29 = vadd.f32 0.5, %v5447_v49  ;;  %v8974_v49 = vld [vmem:[#allocation30_spill] sm:$0xff] }
 0x4d9   : > { %v5274_v5 = vadd.f32 %v5204_v54, %v4718_v51  ;;  %v5273_v42 = vadd.f32 %v5115_v47, %v4717_v38 }
 0x4da   : > { %v5511_v28 = vmul.f32 %v5479_v29, %v5339_v24 }
 0x4db   : > { %v5344_v20 = vadd.f32 %v8430_v8, %v5274_v5  ;;  %v5206_v6 = vpop.f32.mrf.mxu1  ;;  %v5117_v16 = vpop.f32.mrf.mxu0  ;;  %v5343_v50 = vadd.f32 %v8460_v0, %v5273_v42 }
 0x4dd   : > { %v6680_v44 = vpop.eup %6679  ;;  %v5385_v55 = vmul.f32 0.5, %v5344_v20 }
 0x4de   : > { %v5448_v53 = vmul.f32 0.5, %v6680_v44  ;;  %v4561_v30 = vpop.f32.mrf.mxu2  ;;  %v4650_v63 = vpop.f32.mrf.mxu3 }
 0x4df   : > { %6681 = vtanh.f32 %v5385_v55  ;;  %v4720_v17 = vadd.f32 %v4650_v63, %v8969_v4  ;;  %v4719_v36 = vadd.f32 %v4561_v30, %v8972_v40  ;;  %v8976_v63 = vld [vmem:[#allocation4_spill] sm:$0xff] }
 0x4e0   : > { %v5480_v35 = vadd.f32 0.5, %v5448_v53 }
 0x4e1   : > { %v5276_v58 = vadd.f32 %v5206_v6, %v4720_v17  ;;  %v5275_v14 = vadd.f32 %v5117_v16, %v4719_v36 }
 0x4e2   : > { %v5512_v57 = vmul.f32 %v5480_v35, %v5341_v10 }
 0x4e3   : > { %v5346_v23 = vadd.f32 %v8430_v8, %v5276_v58  ;;  %v5209_v48 = vpop.f32.mrf.mxu1  ;;  %v5120_v33 = vpop.f32.mrf.mxu0  ;;  %v5345_v1 = vadd.f32 %v8460_v0, %v5275_v14 }
 0x4e4   : > { %v6568_v19 = vpack.c.bf16 %v5512_v57, %v5511_v28 }
 0x4e5   : > { %v6682_v11 = vpop.eup %6681  ;;  %v5386_v45 = vmul.f32 0.5, %v5346_v23 }
 0x4e6   : > { %6604 = vst [vmem:[%s8502_s21 + $0x50] sm:$0xff] %v6568_v19   ;;  %v5449_v3 = vmul.f32 0.5, %v6682_v11  ;;  %v4564_v21 = vpop.f32.mrf.mxu2  ;;  %v4653_v7 = vpop.f32.mrf.mxu3  ;;  %v8977_v19 = vld [vmem:[#allocation9_spill] sm:$0xff] }
 0x4e7   : > { %6683 = vtanh.f32 %v5386_v45  ;;  %v4722_v39 = vadd.f32 %v4653_v7, %v8971_v52  ;;  %v4721_v26 = vadd.f32 %v4564_v21, %v8974_v49 }
 0x4e8   : > { %v5481_v46 = vadd.f32 0.5, %v5449_v3  ;;  %v8978_v3 = vld [vmem:[#allocation6_spill] sm:$0xff] }
 0x4e9   : > { %v5278_v37 = vadd.f32 %v5209_v48, %v4722_v39  ;;  %v5277_v13 = vadd.f32 %v5120_v33, %v4721_v26 }
 0x4ea   : > { %v5513_v43 = vmul.f32 %v5481_v46, %v5343_v50 }
 0x4eb   : > { %v5348_v41 = vadd.f32 %v8430_v8, %v5278_v37  ;;  %v5211_v27 = vpop.f32.mrf.mxu1  ;;  %v5122_v9 = vpop.f32.mrf.mxu0  ;;  %v5347_v53 = vadd.f32 %v8460_v0, %v5277_v13 }
 0x4ed   : > { %v6684_v59 = vpop.eup %6683  ;;  %v5387_v25 = vmul.f32 0.5, %v5348_v41 }
 0x4ee   : > { %v5450_v18 = vmul.f32 0.5, %v6684_v59  ;;  %v4566_v54 = vpop.f32.mrf.mxu2  ;;  %v4655_v47 = vpop.f32.mrf.mxu3 }
 0x4ef   : > { %6685 = vtanh.f32 %v5387_v25  ;;  %v4724_v60 = vadd.f32 %v4655_v47, %v8973_v62  ;;  %v4723_v4 = vadd.f32 %v4566_v54, %v8976_v63 }
 0x4f0   : > { %v5482_v15 = vadd.f32 0.5, %v5450_v18  ;;  %v8979_v18 = vld [vmem:[#allocation8_spill] sm:$0xff] }
 0x4f1   : > { %v5280_v22 = vadd.f32 %v5211_v27, %v4724_v60  ;;  %v5279_v38 = vadd.f32 %v5122_v9, %v4723_v4 }
 0x4f2   : > { %v5514_v51 = vmul.f32 %v5482_v15, %v5345_v1 }
 0x4f3   : > { %v5350_v24 = vadd.f32 %v8430_v8, %v5280_v22  ;;  %v5214_v29 = vpop.f32.mrf.mxu1  ;;  %v5125_v55 = vpop.f32.mrf.mxu0  ;;  %v5349_v11 = vadd.f32 %v8460_v0, %v5279_v38 }
 0x4f4   : > { %v6573_v2 = vpack.c.bf16 %v5514_v51, %v5513_v43 }
 0x4f5   : > { %v6686_v5 = vpop.eup %6685  ;;  %v5388_v28 = vmul.f32 0.5, %v5350_v24 }
 0x4f6   : > { %6605 = vst [vmem:[%s8502_s21 + $0x58] sm:$0xff] %v6573_v2   ;;  %v5451_v20 = vmul.f32 0.5, %v6686_v5  ;;  %v4569_v6 = vpop.f32.mrf.mxu2  ;;  %v4658_v16 = vpop.f32.mrf.mxu3 }
 0x4f7   : > { %6687 = vtanh.f32 %v5388_v28  ;;  %v4726_v44 = vadd.f32 %v4658_v16, %v8975_v56  ;;  %v4725_v21 = vadd.f32 %v4569_v6, %v8978_v3 }
 0x4f8   : > { %v5483_v30 = vadd.f32 0.5, %v5451_v20 }
 0x4f9   : > { %v5282_v17 = vadd.f32 %v5214_v29, %v4726_v44  ;;  %v5281_v36 = vadd.f32 %v5125_v55, %v4725_v21 }
 0x4fa   : > { %v5515_v10 = vmul.f32 %v5483_v30, %v5347_v53 }
 0x4fb   : > { %v5352_v35 = vadd.f32 %v8430_v8, %v5282_v17  ;;  %v5216_v12 = vpop.f32.mrf.mxu1  ;;  %v5127_v52 = vpop.f32.mrf.mxu0  ;;  %v5351_v25 = vadd.f32 %v8460_v0, %v5281_v36 }
 0x4fd   : > { %v6688_v58 = vpop.eup %6687  ;;  %v5389_v57 = vmul.f32 0.5, %v5352_v35 }
 0x4fe   : > { %v5452_v23 = vmul.f32 0.5, %v6688_v58  ;;  %v4571_v48 = vpop.f32.mrf.mxu2  ;;  %v4660_v33 = vpop.f32.mrf.mxu3 }
 0x4ff   : > { %6689 = vtanh.f32 %v5389_v57  ;;  %v4728_v42 = vadd.f32 %v4660_v33, %v8977_v19  ;;  %v4727_v54 = vadd.f32 %v4571_v48, %v8979_v18 }
 0x500   : > { %v5484_v45 = vadd.f32 0.5, %v5452_v23 }
 0x501   : > { %v5284_v7 = vadd.f32 %v5216_v12, %v4728_v42  ;;  %v5283_v15 = vadd.f32 %v5127_v52, %v4727_v54 }
 0x502   : > { %v5516_v39 = vmul.f32 %v5484_v45, %v5349_v11  ;;  %v8981_v45 = vld [vmem:[#allocation13_spill] sm:$0xff] }
 0x503   : > { %v5354_v50 = vadd.f32 %v8430_v8, %v5284_v7  ;;  %v5219_v46 = vpop.f32.mrf.mxu1  ;;  %v5130_v1 = vpop.f32.mrf.mxu0  ;;  %v5353_v29 = vadd.f32 %v8460_v0, %v5283_v15  ;;  %v8982_v7 = vld [vmem:[#allocation11_spill] sm:$0xff] }
 0x504   : > { %v6578_v40 = vpack.c.bf16 %v5516_v39, %v5515_v10  ;;  %v8980_v10 = vld [vmem:[#allocation10_spill] sm:$0xff] }
 0x505   : > { %v6690_v37 = vpop.eup %6689  ;;  %v5390_v43 = vmul.f32 0.5, %v5354_v50 }
 0x506   : > { %6606 = vst [vmem:[%s8502_s21 + $0x60] sm:$0xff] %v6578_v40   ;;  %v5453_v41 = vmul.f32 0.5, %v6690_v37  ;;  %v4663_v27 = vpop.f32.mrf.mxu3  ;;  %v4574_v14 = vpop.f32.mrf.mxu2 }
 0x507   : > { %6691 = vtanh.f32 %v5390_v43  ;;  %v4730_v59 = vadd.f32 %v4663_v27, %v8369_v31  ;;  %v4729_v13 = vadd.f32 %v4574_v14, %v8367_v32 }
 0x508   : > { %v5485_v9 = vadd.f32 0.5, %v5453_v41 }
 0x509   : > { %v5286_v47 = vadd.f32 %v5219_v46, %v4730_v59  ;;  %v5285_v56 = vadd.f32 %v5130_v1, %v4729_v13 }
 0x50a   : > { %v5517_v62 = vmul.f32 %v5485_v9, %v5351_v25  ;;  %v8983_v9 = vld [vmem:[#allocation12_spill] sm:$0xff] }
 0x50b   : > { %v5356_v60 = vadd.f32 %v8430_v8, %v5286_v47  ;;  %v5221_v49 = vpop.f32.mrf.mxu1  ;;  %v5132_v53 = vpop.f32.mrf.mxu0  ;;  %v5355_v17 = vadd.f32 %v8460_v0, %v5285_v56 }
 0x50d   : > { %v6692_v26 = vpop.eup %6691  ;;  %v5391_v22 = vmul.f32 0.5, %v5356_v60 }
 0x50e   : > { %v5454_v51 = vmul.f32 0.5, %v6692_v26  ;;  %v4665_v24 = vpop.f32.mrf.mxu3  ;;  %v4576_v5 = vpop.f32.mrf.mxu2 }
 0x50f   : > { %6693 = vtanh.f32 %v5391_v22  ;;  %v4732_v31 = vadd.f32 %v4665_v24, %v8381_v34  ;;  %v4731_v35 = vadd.f32 %v4576_v5, %v8980_v10 }
 0x510   : > { %v5486_v2 = vadd.f32 0.5, %v5454_v51 }
 0x511   : > { %v5288_v28 = vadd.f32 %v5221_v49, %v4732_v31  ;;  %v5287_v23 = vadd.f32 %v5132_v53, %v4731_v35 }
 0x512   : > { %v5518_v20 = vmul.f32 %v5486_v2, %v5353_v29 }
 0x513   : > { %v5358_v6 = vadd.f32 %v8430_v8, %v5288_v28  ;;  %v5224_v63 = vpop.f32.mrf.mxu1  ;;  %v5135_v11 = vpop.f32.mrf.mxu0  ;;  %v5357_v3 = vadd.f32 %v8460_v0, %v5287_v23 }
 0x514   : > { %v6583_v16 = vpack.c.bf16 %v5518_v20, %v5517_v62 }
 0x515   : > { %v6694_v44 = vpop.eup %6693  ;;  %v5392_v55 = vmul.f32 0.5, %v5358_v6 }
 0x516   : > { %6607 = vst [vmem:[%s8502_s21 + $0x68] sm:$0xff] %v6583_v16   ;;  %v5455_v30 = vmul.f32 0.5, %v6694_v44  ;;  %v4668_v4 = vpop.f32.mrf.mxu3  ;;  %v4579_v58 = vpop.f32.mrf.mxu2 }
 0x517   : > { %6695 = vtanh.f32 %v5392_v55  ;;  %v4734_v34 = vadd.f32 %v4668_v4, %v8399_v61  ;;  %v4733_v52 = vadd.f32 %v4579_v58, %v8982_v7 }
 0x518   : > { %v5487_v32 = vadd.f32 0.5, %v5455_v30 }
 0x519   : > { %v5290_v12 = vadd.f32 %v5224_v63, %v4734_v34  ;;  %v5289_v37 = vadd.f32 %v5135_v11, %v4733_v52 }
 0x51a   : > { %v5519_v38 = vmul.f32 %v5487_v32, %v5355_v17 }
 0x51b   : > { %v5360_v57 = vadd.f32 %v8430_v8, %v5290_v12  ;;  %v5226_v39 = vpop.f32.mrf.mxu1  ;;  %v5359_v59 = vadd.f32 %v8460_v0, %v5289_v37  ;;  %v5137_v54 = vpop.f32.mrf.mxu0 }
 0x51d   : > { %v6696_v48 = vpop.eup %6695  ;;  %v5393_v33 = vmul.f32 0.5, %v5360_v57 }
 0x51e   : > { %v5456_v19 = vmul.f32 0.5, %v6696_v48  ;;  %v4670_v42 = vpop.f32.mrf.mxu3  ;;  %v4581_v41 = vpop.f32.mrf.mxu2 }
 0x51f   : > { %6697 = vtanh.f32 %v5393_v33  ;;  %v4736_v61 = vadd.f32 %v4670_v42, %v8981_v45  ;;  %v4735_v18 = vadd.f32 %v4581_v41, %v8983_v9 }
 0x520   : > { %v5488_v21 = vadd.f32 0.5, %v5456_v19 }
 0x521   : > { %v5292_v50 = vadd.f32 %v5226_v39, %v4736_v61  ;;  %v5291_v62 = vadd.f32 %v5137_v54, %v4735_v18 }
 0x522   : > { %v5520_v46 = vmul.f32 %v5488_v21, %v5357_v3 }
 0x523   : > { %v5362_v40 = vadd.f32 %v8430_v8, %v5292_v50  ;;  %v5361_v8 = vadd.f32 %v8460_v0, %v5291_v62 }
 0x524   : > { %v6588_v36 = vpack.c.bf16 %v5520_v46, %v5519_v38 }
 0x525   : > { %v6698_v43 = vpop.eup %6697  ;;  %v5394_v27 = vmul.f32 0.5, %v5362_v40 }
 0x526   : > { %6608 = vst [vmem:[%s8502_s21 + $0x70] sm:$0xff] %v6588_v36   ;;  %v5457_v14 = vmul.f32 0.5, %v6698_v43 }
 0x527   : > { %6699 = vtanh.f32 %v5394_v27 }
 0x528   : > { %v5489_v25 = vadd.f32 0.5, %v5457_v14 }
 0x52a   : > { %v5521_v47 = vmul.f32 %v5489_v25, %v5359_v59 }
 0x52d   : > { %v6700_v60 = vpop.eup %6699 }
 0x52e   : > { %v5458_v1 = vmul.f32 0.5, %v6700_v60 }
 0x530   : > { %v5490_v15 = vadd.f32 0.5, %v5458_v1 }
 0x532   : > { %v5522_v49 = vmul.f32 %v5490_v15, %v5361_v8 }
 0x534   : > { %v6593_v26 = vpack.c.bf16 %v5522_v49, %v5521_v47 }
 0x536   : > { %6609 = vst [vmem:[%s8502_s21 + $0x78] sm:$0xff] %v6593_v26  }
 0x537 PF: > { %s13_s14 = sadd.s32 1, %s6723_s14   ;;  %s8984_s12 = smov %s6719_s13 }
 0x538   : > { %p10_p6 = scmp.ge.s32.totalorder %s13_s14, 4   ;;  %s8985_s13 = smov %s8987_s15 }
 0x53a   :  { %12 = sbr.rel (!%p10_p6) target bundleno = 2 (0x2), region = 73 }

</bundles_post_ra>
